<compile_context>
chip_gen: v7x
topology: tpu7x:2x2x1
jax: 0.10.0
libtpu: 0.0.40
codegen_flags: <defaults>
</compile_context>

<pallas_src>
import functools

import jax
import jax.numpy as jnp
from jax.experimental import pallas as pl
from jax.experimental.pallas import tpu as pltpu

EPS = 1e-5
CP = 128  # lane-tile-aligned width of every feature chunk / conv output
_VMEM = pl.BlockSpec(memory_space=pltpu.MemorySpace.VMEM)


def _leaky(x, slope):
    return jnp.where(x >= 0, x, slope * x)


def _bn_rows(y, gamma, beta):
    """Training-mode batch norm over the row axis of an (M, C) activation."""
    n = y.shape[0]
    s = jnp.sum(y, axis=0, keepdims=True)
    ss = jnp.sum(y * y, axis=0, keepdims=True)
    mean = s * (1.0 / n)
    var = jnp.maximum(ss * (1.0 / n) - mean * mean, 0.0)
    return (y - mean) * jax.lax.rsqrt(var + EPS) * gamma + beta


def _pack_base(layer):
    """Row offset of layer's (K = (layer+1)*CP)-row block in the packed weight stacks."""
    return CP * (layer * (layer + 1) // 2)


# --------------------------- fused forward kernel ---------------------------
def gnn_kernel(x_ref, w1_ref, w2_ref, wg_ref, vec_ref, logits_ref, a_ref,
               *, B, V, num_layers):
    n_adj = num_layers + 1
    vg0 = 5 * n_adj  # first Gconv gamma row inside vec_ref

    def adj_layer(x_slab, li, k):
        # phi[b,i,j,:] = |x[b,i,:] - x[b,j,:]| (bf16), flattened so every conv
        # is a single large-M MXU matmul over the channel axis.
        phi = jnp.abs(x_slab[:, :, None, :] - x_slab[:, None, :, :])     # (B,V,V,k)
        phi2 = phi.reshape(B * V * V, k)
        base = _pack_base(li)

        # Conv(k, 2h) -> BN2d -> LeakyReLU(0.01)   (conv bias dead under BN)
        h = jnp.dot(phi2, w1_ref[base:base + k, :],
                    preferred_element_type=jnp.float32)                   # (BVV, CP) f32
        h = _leaky(_bn_rows(h, vec_ref[5 * li:5 * li + 1, :],
                            vec_ref[5 * li + 1:5 * li + 2, :]), 0.01)

        # Conv(2h, h) -> BN2d -> LeakyReLU(0.01)
        h = jnp.dot(h.astype(jnp.bfloat16), w2_ref[li * CP:(li + 1) * CP, :],
                    preferred_element_type=jnp.float32)
        h = _leaky(_bn_rows(h, vec_ref[5 * li + 2:5 * li + 3, :],
                            vec_ref[5 * li + 3:5 * li + 4, :]), 0.01)

        # Conv(h, 1) score, produced directly in the (B*V, V) softmax layout
        # (lane-axis reduce; no (BVV,1)->(B,V,V) relayout).  Its bias is dead
        # (softmax is shift-invariant over j).
        w3 = vec_ref[5 * li + 4:5 * li + 5, :]                            # (1, CP) f32
        s = jnp.sum(h.reshape(B * V, V, CP) * w3, axis=-1)                # (B*V, V) f32

        # softmax over j (lane axis), exact divide (A is a returned output)
        s = s - jnp.max(s, axis=-1, keepdims=True)
        e = jnp.exp(s)
        return e / jnp.sum(e, axis=-1, keepdims=True)                     # (B*V, V) f32

    x_slab = x_ref[...]                                                   # (B, V, CP) bf16

    for li in range(num_layers):
        k = (li + 1) * CP
        a2 = adj_layer(x_slab, li, k)
        a3 = a2.reshape(B, V, V)                                          # free leading split
        xn = jnp.einsum('bij,bjd->bid', a3.astype(jnp.bfloat16), x_slab,
                        preferred_element_type=jnp.float32)               # (B, V, k) f32
        base = _pack_base(li)
        y = jnp.dot(xn.reshape(B * V, k).astype(jnp.bfloat16),
                    wg_ref[base:base + k, :],
                    preferred_element_type=jnp.float32)                   # (B*V, CP) f32
        # Gconv bias is dead under BN1d; BN stats over (batch, nodes) rows.
        y = _leaky(_bn_rows(y, vec_ref[vg0 + 2 * li:vg0 + 2 * li + 1, :],
                            vec_ref[vg0 + 2 * li + 1:vg0 + 2 * li + 2, :]), 0.1)
        # dense feature growth: new 128-lane chunk spliced at lane offset k
        # (lane-tile aligned -> full-vreg stores, contiguous K downstream)
        x_slab = jnp.concatenate(
            [x_slab, y.astype(jnp.bfloat16).reshape(B, V, CP)], axis=-1)

    # ---- last Adj_layer (returned A) + last Gconv (no BN, bias kept) ----
    k = n_adj * CP
    a2 = adj_layer(x_slab, num_layers, k)
    a_ref[...] = a2

    # With no BN, logits[:, 0, :] depends only on node-0 rows of A @ x, so we
    # only aggregate node 0 (exact, saves a factor V on the last Gconv).
    a0 = a2.reshape(B, V, V)[:, 0, :]                                     # (B, V) f32
    xn0 = jnp.sum(a0[:, :, None] * x_slab.astype(jnp.float32), axis=1)    # (B, k) f32
    base = _pack_base(num_layers)
    logits_ref[...] = (jnp.dot(xn0.astype(jnp.bfloat16), wg_ref[base:base + k, :],
                               preferred_element_type=jnp.float32)
                       + vec_ref[vg0 + 2 * num_layers:vg0 + 2 * num_layers + 1, :])


# --------------------------------- wrapper ----------------------------------
def gnn_forward(packed, x, *, nway):
    """x: (B, V, cnn_feature_size + nway) -> (logits (B, nway), A (B, V, V))."""
    B, V, d0 = x.shape
    num_layers = packed['w2'].shape[0] // CP - 1
    # lane-dense, bf16 input slab (free wrapper-side plumbing)
    x_pad = jnp.pad(x.astype(jnp.bfloat16), ((0, 0), (0, 0), (0, CP - d0)))

    kern = functools.partial(gnn_kernel, B=B, V=V, num_layers=num_layers)
    logits_pad, a2 = pl.pallas_call(
        kern,
        out_shape=(jax.ShapeDtypeStruct((B, CP), jnp.float32),      # lane-dense logits slab
                   jax.ShapeDtypeStruct((B * V, V), jnp.float32)),  # A in its natural layout
        in_specs=[_VMEM] * 5,
        out_specs=(_VMEM, _VMEM),
        compiler_params=pltpu.CompilerParams(
            vmem_limit_bytes=32 * 1024 * 1024),  # plenty here; raise on v5e/v6e for prod sizes
    )(x_pad, packed['w1'], packed['w2'], packed['wg'], packed['vec'])
    return logits_pad[:, :nway], a2.reshape(B, V, V)


# ------------------------------ parameter init ------------------------------
def init_gnn_packed(key, cnn_feature_size, gnn_feature_size, nway, num_layers=2):
    """Packed, lane-padded parameters.

    w1 / wg : (CP*(1+2+..+n_adj), CP) bf16 stacks of per-layer input-padded weights
    w2      : (n_adj*CP, CP) bf16 stack
    vec     : f32 table — per adj layer [gamma1, beta1, gamma2, beta2, w3-row],
              then per BN-Gconv [gamma, beta], then the last Gconv bias.
    Biases cancelled by BN / softmax are not materialised.
    """
    d0 = cnn_feature_size + nway
    h = gnn_feature_size
    c1, c2, half = 2 * h, h, h // 2
    assert max(d0, c1, c2, half, nway) <= CP, "channel counts must fit one lane tile"
    n_adj = num_layers + 1
    real_in = [d0] + [half] * num_layers          # real channels per 128-lane chunk

    w_rows = CP * (n_adj * (n_adj + 1) // 2)
    w1 = jnp.zeros((w_rows, CP), jnp.float32)
    wg = jnp.zeros((w_rows, CP), jnp.float32)
    w2 = jnp.zeros((n_adj * CP, CP), jnp.float32)
    vec = jnp.zeros((5 * n_adj + 2 * num_layers + 1, CP), jnp.float32)

    kiter = iter(jax.random.split(key, n_adj * (2 * n_adj + 4)))
    for li in range(n_adj):
        base = _pack_base(li)
        out_g = half if li < num_layers else nway
        for c in range(li + 1):
            w1 = w1.at[base + c * CP: base + c * CP + real_in[c], :c1].set(
                jax.random.normal(next(kiter), (real_in[c], c1)) * 0.1)
            wg = wg.at[base + c * CP: base + c * CP + real_in[c], :out_g].set(
                jax.random.normal(next(kiter), (real_in[c], out_g)) * 0.1)
        w2 = w2.at[li * CP: li * CP + c1, :c2].set(
            jax.random.normal(next(kiter), (c1, c2)) * 0.1)
        vec = vec.at[5 * li + 0, :].set(1.0)          # BN2d #1 gamma (beta row stays 0)
        vec = vec.at[5 * li + 2, :].set(1.0)          # BN2d #2 gamma
        vec = vec.at[5 * li + 4, :c2].set(jax.random.normal(next(kiter), (c2,)) * 0.1)
    vg0 = 5 * n_adj
    for li in range(num_layers):
        vec = vec.at[vg0 + 2 * li, :].set(1.0)        # Gconv BN1d gamma
    vec = vec.at[vg0 + 2 * num_layers, :nway].set(    # last Gconv bias (only live bias)
        jax.random.normal(next(kiter), (nway,)) * 0.1)

    return dict(w1=w1.astype(jnp.bfloat16), w2=w2.astype(jnp.bfloat16),
                wg=wg.astype(jnp.bfloat16), vec=vec)


if __name__ == "__main__":
    B, V = 2, 8
    cnn_feature_size, gnn_feature_size, nway = 16, 32, 4

    key = jax.random.PRNGKey(0)
    kp, kx = jax.random.split(key)
    packed = init_gnn_packed(kp, cnn_feature_size, gnn_feature_size, nway, num_layers=2)
    inputs = jax.random.normal(kx, (B, V, cnn_feature_size + nway), jnp.float32)

    fwd = jax.jit(functools.partial(gnn_forward, nway=nway))
    logits, A = fwd(packed, inputs)
    jax.block_until_ready((logits, A))

    assert logits.shape == (B, nway)
    assert A.shape == (B, V, V)
    assert bool(jnp.all(jnp.isfinite(logits))) and bool(jnp.all(jnp.isfinite(A)))
    # softmax rows of the adjacency must sum to ~1 (exact divide used)
    assert bool(jnp.allclose(jnp.sum(A, axis=2), 1.0, atol=1e-3))
    print("KERNEL_OK")
</pallas_src>

<mosaic_0001>
module attributes {stable_mosaic.version = 11 : i64} {
  func.func @gnn_kernel(%arg0: memref<2x8x128xbf16, #tpu.memory_space<vmem>>, %arg1: memref<768x128xbf16, #tpu.memory_space<vmem>>, %arg2: memref<384x128xbf16, #tpu.memory_space<vmem>>, %arg3: memref<768x128xbf16, #tpu.memory_space<vmem>>, %arg4: memref<20x128xf32, #tpu.memory_space<vmem>>, %arg5: memref<2x128xf32, #tpu.memory_space<vmem>>, %arg6: memref<16x8xf32, #tpu.memory_space<vmem>>) attributes {dimension_semantics = [], scalar_prefetch = 0 : i64, scratch_operands = 0 : i64, tpu.core_type = #tpu.core_type<tc>} {
    %c0 = arith.constant 0 : index
    %c0_0 = arith.constant 0 : index
    %c0_1 = arith.constant 0 : index
    %0 = vector.load %arg0[%c0, %c0_0, %c0_1] : memref<2x8x128xbf16, #tpu.memory_space<vmem>>, vector<2x8x128xbf16>
    %1 = vector.shape_cast %0 : vector<2x8x128xbf16> to vector<2x8x1x128xbf16>
    %2 = vector.shape_cast %0 : vector<2x8x128xbf16> to vector<2x1x8x128xbf16>
    %3 = vector.broadcast %1 : vector<2x8x1x128xbf16> to vector<2x8x8x128xbf16>
    %4 = vector.broadcast %2 : vector<2x1x8x128xbf16> to vector<2x8x8x128xbf16>
    %5 = arith.subf %3, %4 : vector<2x8x8x128xbf16>
    %6 = math.absf %5 : vector<2x8x8x128xbf16>
    %7 = vector.shape_cast %6 : vector<2x8x8x128xbf16> to vector<128x128xbf16>
    %c0_2 = arith.constant 0 : index
    %c0_3 = arith.constant 0 : index
    %8 = vector.load %arg1[%c0_2, %c0_3] : memref<768x128xbf16, #tpu.memory_space<vmem>>, vector<128x128xbf16>
    %cst = arith.constant dense<0.000000e+00> : vector<128x128xf32>
    %9 = tpu.matmul %7, %8, %cst {dimension_numbers = #tpu.dot_dimension_numbers<[1], [0], [0], [1], [0, 0, 1, 1], [], []>} : vector<128x128xbf16>, vector<128x128xbf16>, vector<128x128xf32> -> vector<128x128xf32>
    %c0_4 = arith.constant 0 : index
    %c0_5 = arith.constant 0 : index
    %10 = vector.load %arg4[%c0_4, %c0_5] : memref<20x128xf32, #tpu.memory_space<vmem>>, vector<1x128xf32>
    %c1 = arith.constant 1 : index
    %c0_6 = arith.constant 0 : index
    %11 = vector.load %arg4[%c1, %c0_6] : memref<20x128xf32, #tpu.memory_space<vmem>>, vector<1x128xf32>
    %cst_7 = arith.constant dense<0.000000e+00> : vector<128xf32>
    %12 = vector.multi_reduction <add>, %9, %cst_7 [0] : vector<128x128xf32> to vector<128xf32>
    %13 = vector.shape_cast %12 : vector<128xf32> to vector<1x128xf32>
    %14 = arith.mulf %9, %9 : vector<128x128xf32>
    %cst_8 = arith.constant dense<0.000000e+00> : vector<128xf32>
    %15 = vector.multi_reduction <add>, %14, %cst_8 [0] : vector<128x128xf32> to vector<128xf32>
    %16 = vector.shape_cast %15 : vector<128xf32> to vector<1x128xf32>
    %cst_9 = arith.constant 7.812500e-03 : f32
    %17 = vector.broadcast %cst_9 : f32 to vector<1x128xf32>
    %18 = arith.mulf %13, %17 : vector<1x128xf32>
    %cst_10 = arith.constant 7.812500e-03 : f32
    %19 = vector.broadcast %cst_10 : f32 to vector<1x128xf32>
    %20 = arith.mulf %16, %19 : vector<1x128xf32>
    %21 = arith.mulf %18, %18 : vector<1x128xf32>
    %22 = arith.subf %20, %21 : vector<1x128xf32>
    %cst_11 = arith.constant 0.000000e+00 : f32
    %23 = vector.broadcast %cst_11 : f32 to vector<1x128xf32>
    %24 = arith.maximumf %22, %23 : vector<1x128xf32>
    %25 = vector.broadcast %18 : vector<1x128xf32> to vector<128x128xf32>
    %26 = arith.subf %9, %25 : vector<128x128xf32>
    %cst_12 = arith.constant 9.99999974E-6 : f32
    %27 = vector.broadcast %cst_12 : f32 to vector<1x128xf32>
    %28 = arith.addf %24, %27 : vector<1x128xf32>
    %29 = math.rsqrt %28 : vector<1x128xf32>
    %30 = vector.broadcast %29 : vector<1x128xf32> to vector<128x128xf32>
    %31 = arith.mulf %26, %30 : vector<128x128xf32>
    %32 = vector.broadcast %10 : vector<1x128xf32> to vector<128x128xf32>
    %33 = arith.mulf %31, %32 : vector<128x128xf32>
    %34 = vector.broadcast %11 : vector<1x128xf32> to vector<128x128xf32>
    %35 = arith.addf %33, %34 : vector<128x128xf32>
    %cst_13 = arith.constant 0.000000e+00 : f32
    %36 = vector.broadcast %cst_13 : f32 to vector<128x128xf32>
    %37 = arith.cmpf oge, %35, %36 : vector<128x128xf32>
    %cst_14 = arith.constant 0.00999999977 : f32
    %38 = vector.broadcast %cst_14 : f32 to vector<128x128xf32>
    %39 = arith.mulf %38, %35 : vector<128x128xf32>
    %40 = arith.select %37, %35, %39 : vector<128x128xi1>, vector<128x128xf32>
    %41 = arith.truncf %40 : vector<128x128xf32> to vector<128x128xbf16>
    %c0_15 = arith.constant 0 : index
    %c0_16 = arith.constant 0 : index
    %42 = vector.load %arg2[%c0_15, %c0_16] : memref<384x128xbf16, #tpu.memory_space<vmem>>, vector<128x128xbf16>
    %cst_17 = arith.constant dense<0.000000e+00> : vector<128x128xf32>
    %43 = tpu.matmul %41, %42, %cst_17 {dimension_numbers = #tpu.dot_dimension_numbers<[1], [0], [0], [1], [0, 0, 1, 1], [], []>} : vector<128x128xbf16>, vector<128x128xbf16>, vector<128x128xf32> -> vector<128x128xf32>
    %c2 = arith.constant 2 : index
    %c0_18 = arith.constant 0 : index
    %44 = vector.load %arg4[%c2, %c0_18] : memref<20x128xf32, #tpu.memory_space<vmem>>, vector<1x128xf32>
    %c3 = arith.constant 3 : index
    %c0_19 = arith.constant 0 : index
    %45 = vector.load %arg4[%c3, %c0_19] : memref<20x128xf32, #tpu.memory_space<vmem>>, vector<1x128xf32>
    %cst_20 = arith.constant dense<0.000000e+00> : vector<128xf32>
    %46 = vector.multi_reduction <add>, %43, %cst_20 [0] : vector<128x128xf32> to vector<128xf32>
    %47 = vector.shape_cast %46 : vector<128xf32> to vector<1x128xf32>
    %48 = arith.mulf %43, %43 : vector<128x128xf32>
    %cst_21 = arith.constant dense<0.000000e+00> : vector<128xf32>
    %49 = vector.multi_reduction <add>, %48, %cst_21 [0] : vector<128x128xf32> to vector<128xf32>
    %50 = vector.shape_cast %49 : vector<128xf32> to vector<1x128xf32>
    %cst_22 = arith.constant 7.812500e-03 : f32
    %51 = vector.broadcast %cst_22 : f32 to vector<1x128xf32>
    %52 = arith.mulf %47, %51 : vector<1x128xf32>
    %cst_23 = arith.constant 7.812500e-03 : f32
    %53 = vector.broadcast %cst_23 : f32 to vector<1x128xf32>
    %54 = arith.mulf %50, %53 : vector<1x128xf32>
    %55 = arith.mulf %52, %52 : vector<1x128xf32>
    %56 = arith.subf %54, %55 : vector<1x128xf32>
    %cst_24 = arith.constant 0.000000e+00 : f32
    %57 = vector.broadcast %cst_24 : f32 to vector<1x128xf32>
    %58 = arith.maximumf %56, %57 : vector<1x128xf32>
    %59 = vector.broadcast %52 : vector<1x128xf32> to vector<128x128xf32>
    %60 = arith.subf %43, %59 : vector<128x128xf32>
    %cst_25 = arith.constant 9.99999974E-6 : f32
    %61 = vector.broadcast %cst_25 : f32 to vector<1x128xf32>
    %62 = arith.addf %58, %61 : vector<1x128xf32>
    %63 = math.rsqrt %62 : vector<1x128xf32>
    %64 = vector.broadcast %63 : vector<1x128xf32> to vector<128x128xf32>
    %65 = arith.mulf %60, %64 : vector<128x128xf32>
    %66 = vector.broadcast %44 : vector<1x128xf32> to vector<128x128xf32>
    %67 = arith.mulf %65, %66 : vector<128x128xf32>
    %68 = vector.broadcast %45 : vector<1x128xf32> to vector<128x128xf32>
    %69 = arith.addf %67, %68 : vector<128x128xf32>
    %cst_26 = arith.constant 0.000000e+00 : f32
    %70 = vector.broadcast %cst_26 : f32 to vector<128x128xf32>
    %71 = arith.cmpf oge, %69, %70 : vector<128x128xf32>
    %cst_27 = arith.constant 0.00999999977 : f32
    %72 = vector.broadcast %cst_27 : f32 to vector<128x128xf32>
    %73 = arith.mulf %72, %69 : vector<128x128xf32>
    %74 = arith.select %71, %69, %73 : vector<128x128xi1>, vector<128x128xf32>
    %c4 = arith.constant 4 : index
    %c0_28 = arith.constant 0 : index
    %75 = vector.load %arg4[%c4, %c0_28] : memref<20x128xf32, #tpu.memory_space<vmem>>, vector<1x128xf32>
    %76 = vector.shape_cast %74 : vector<128x128xf32> to vector<16x8x128xf32>
    %77 = vector.shape_cast %75 : vector<1x128xf32> to vector<1x1x128xf32>
    %78 = vector.broadcast %77 : vector<1x1x128xf32> to vector<16x8x128xf32>
    %79 = arith.mulf %76, %78 : vector<16x8x128xf32>
    %cst_29 = arith.constant dense<0.000000e+00> : vector<16x8xf32>
    %80 = vector.multi_reduction <add>, %79, %cst_29 [2] : vector<16x8x128xf32> to vector<16x8xf32>
    %cst_30 = arith.constant dense<0xFF800000> : vector<16xf32>
    %81 = vector.multi_reduction <maximumf>, %80, %cst_30 [1] : vector<16x8xf32> to vector<16xf32>
    %82 = vector.shape_cast %81 : vector<16xf32> to vector<16x1xf32>
    %83 = vector.broadcast %82 : vector<16x1xf32> to vector<16x8xf32>
    %84 = arith.subf %80, %83 : vector<16x8xf32>
    %85 = math.exp %84 : vector<16x8xf32>
    %cst_31 = arith.constant dense<0.000000e+00> : vector<16xf32>
    %86 = vector.multi_reduction <add>, %85, %cst_31 [1] : vector<16x8xf32> to vector<16xf32>
    %87 = vector.shape_cast %86 : vector<16xf32> to vector<16x1xf32>
    %88 = vector.broadcast %87 : vector<16x1xf32> to vector<16x8xf32>
    %89 = arith.divf %85, %88 : vector<16x8xf32>
    %90 = vector.shape_cast %89 : vector<16x8xf32> to vector<2x8x8xf32>
    %91 = arith.truncf %90 : vector<2x8x8xf32> to vector<2x8x8xbf16>
    "tpu.trace_start"() <{level = 10 : i32, message = "bij,bjd->bid"}> : () -> ()
    %cst_32 = arith.constant dense<0.000000e+00> : vector<2x8x128xf32>
    %92 = tpu.matmul %91, %0, %cst_32 {dimension_numbers = #tpu.dot_dimension_numbers<[2], [1], [1], [2], [0, 0, 0, 1, 1, 2], [0], [0]>} : vector<2x8x8xbf16>, vector<2x8x128xbf16>, vector<2x8x128xf32> -> vector<2x8x128xf32>
    "tpu.trace_stop"() : () -> ()
    %93 = vector.shape_cast %92 : vector<2x8x128xf32> to vector<16x128xf32>
    %94 = arith.truncf %93 : vector<16x128xf32> to vector<16x128xbf16>
    %c0_33 = arith.constant 0 : index
    %c0_34 = arith.constant 0 : index
    %95 = vector.load %arg3[%c0_33, %c0_34] : memref<768x128xbf16, #tpu.memory_space<vmem>>, vector<128x128xbf16>
    %cst_35 = arith.constant dense<0.000000e+00> : vector<16x128xf32>
    %96 = tpu.matmul %94, %95, %cst_35 {dimension_numbers = #tpu.dot_dimension_numbers<[1], [0], [0], [1], [0, 0, 1, 1], [], []>} : vector<16x128xbf16>, vector<128x128xbf16>, vector<16x128xf32> -> vector<16x128xf32>
    %c15 = arith.constant 15 : index
    %c0_36 = arith.constant 0 : index
    %97 = vector.load %arg4[%c15, %c0_36] : memref<20x128xf32, #tpu.memory_space<vmem>>, vector<1x128xf32>
    %c16 = arith.constant 16 : index
    %c0_37 = arith.constant 0 : index
    %98 = vector.load %arg4[%c16, %c0_37] : memref<20x128xf32, #tpu.memory_space<vmem>>, vector<1x128xf32>
    %cst_38 = arith.constant dense<0.000000e+00> : vector<128xf32>
    %99 = vector.multi_reduction <add>, %96, %cst_38 [0] : vector<16x128xf32> to vector<128xf32>
    %100 = vector.shape_cast %99 : vector<128xf32> to vector<1x128xf32>
    %101 = arith.mulf %96, %96 : vector<16x128xf32>
    %cst_39 = arith.constant dense<0.000000e+00> : vector<128xf32>
    %102 = vector.multi_reduction <add>, %101, %cst_39 [0] : vector<16x128xf32> to vector<128xf32>
    %103 = vector.shape_cast %102 : vector<128xf32> to vector<1x128xf32>
    %cst_40 = arith.constant 6.250000e-02 : f32
    %104 = vector.broadcast %cst_40 : f32 to vector<1x128xf32>
    %105 = arith.mulf %100, %104 : vector<1x128xf32>
    %cst_41 = arith.constant 6.250000e-02 : f32
    %106 = vector.broadcast %cst_41 : f32 to vector<1x128xf32>
    %107 = arith.mulf %103, %106 : vector<1x128xf32>
    %108 = arith.mulf %105, %105 : vector<1x128xf32>
    %109 = arith.subf %107, %108 : vector<1x128xf32>
    %cst_42 = arith.constant 0.000000e+00 : f32
    %110 = vector.broadcast %cst_42 : f32 to vector<1x128xf32>
    %111 = arith.maximumf %109, %110 : vector<1x128xf32>
    %112 = vector.broadcast %105 : vector<1x128xf32> to vector<16x128xf32>
    %113 = arith.subf %96, %112 : vector<16x128xf32>
    %cst_43 = arith.constant 9.99999974E-6 : f32
    %114 = vector.broadcast %cst_43 : f32 to vector<1x128xf32>
    %115 = arith.addf %111, %114 : vector<1x128xf32>
    %116 = math.rsqrt %115 : vector<1x128xf32>
    %117 = vector.broadcast %116 : vector<1x128xf32> to vector<16x128xf32>
    %118 = arith.mulf %113, %117 : vector<16x128xf32>
    %119 = vector.broadcast %97 : vector<1x128xf32> to vector<16x128xf32>
    %120 = arith.mulf %118, %119 : vector<16x128xf32>
    %121 = vector.broadcast %98 : vector<1x128xf32> to vector<16x128xf32>
    %122 = arith.addf %120, %121 : vector<16x128xf32>
    %cst_44 = arith.constant 0.000000e+00 : f32
    %123 = vector.broadcast %cst_44 : f32 to vector<16x128xf32>
    %124 = arith.cmpf oge, %122, %123 : vector<16x128xf32>
    %cst_45 = arith.constant 1.000000e-01 : f32
    %125 = vector.broadcast %cst_45 : f32 to vector<16x128xf32>
    %126 = arith.mulf %125, %122 : vector<16x128xf32>
    %127 = arith.select %124, %122, %126 : vector<16x128xi1>, vector<16x128xf32>
    %128 = arith.truncf %127 : vector<16x128xf32> to vector<16x128xbf16>
    %129 = vector.shape_cast %128 : vector<16x128xbf16> to vector<2x8x128xbf16>
    %130 = tpu.concatenate %0, %129 in 2 : vector<2x8x128xbf16>, vector<2x8x128xbf16> -> vector<2x8x256xbf16>
    %131 = vector.shape_cast %130 : vector<2x8x256xbf16> to vector<2x8x1x256xbf16>
    %132 = vector.shape_cast %130 : vector<2x8x256xbf16> to vector<2x1x8x256xbf16>
    %133 = vector.broadcast %131 : vector<2x8x1x256xbf16> to vector<2x8x8x256xbf16>
    %134 = vector.broadcast %132 : vector<2x1x8x256xbf16> to vector<2x8x8x256xbf16>
    %135 = arith.subf %133, %134 : vector<2x8x8x256xbf16>
    %136 = math.absf %135 : vector<2x8x8x256xbf16>
    %137 = vector.shape_cast %136 : vector<2x8x8x256xbf16> to vector<128x256xbf16>
    %c128 = arith.constant 128 : index
    %c0_46 = arith.constant 0 : index
    %138 = vector.load %arg1[%c128, %c0_46] : memref<768x128xbf16, #tpu.memory_space<vmem>>, vector<256x128xbf16>
    %cst_47 = arith.constant dense<0.000000e+00> : vector<128x128xf32>
    %139 = tpu.matmul %137, %138, %cst_47 {dimension_numbers = #tpu.dot_dimension_numbers<[1], [0], [0], [1], [0, 0, 1, 1], [], []>} : vector<128x256xbf16>, vector<256x128xbf16>, vector<128x128xf32> -> vector<128x128xf32>
    %c5 = arith.constant 5 : index
    %c0_48 = arith.constant 0 : index
    %140 = vector.load %arg4[%c5, %c0_48] : memref<20x128xf32, #tpu.memory_space<vmem>>, vector<1x128xf32>
    %c6 = arith.constant 6 : index
    %c0_49 = arith.constant 0 : index
    %141 = vector.load %arg4[%c6, %c0_49] : memref<20x128xf32, #tpu.memory_space<vmem>>, vector<1x128xf32>
    %cst_50 = arith.constant dense<0.000000e+00> : vector<128xf32>
    %142 = vector.multi_reduction <add>, %139, %cst_50 [0] : vector<128x128xf32> to vector<128xf32>
    %143 = vector.shape_cast %142 : vector<128xf32> to vector<1x128xf32>
    %144 = arith.mulf %139, %139 : vector<128x128xf32>
    %cst_51 = arith.constant dense<0.000000e+00> : vector<128xf32>
    %145 = vector.multi_reduction <add>, %144, %cst_51 [0] : vector<128x128xf32> to vector<128xf32>
    %146 = vector.shape_cast %145 : vector<128xf32> to vector<1x128xf32>
    %cst_52 = arith.constant 7.812500e-03 : f32
    %147 = vector.broadcast %cst_52 : f32 to vector<1x128xf32>
    %148 = arith.mulf %143, %147 : vector<1x128xf32>
    %cst_53 = arith.constant 7.812500e-03 : f32
    %149 = vector.broadcast %cst_53 : f32 to vector<1x128xf32>
    %150 = arith.mulf %146, %149 : vector<1x128xf32>
    %151 = arith.mulf %148, %148 : vector<1x128xf32>
    %152 = arith.subf %150, %151 : vector<1x128xf32>
    %cst_54 = arith.constant 0.000000e+00 : f32
    %153 = vector.broadcast %cst_54 : f32 to vector<1x128xf32>
    %154 = arith.maximumf %152, %153 : vector<1x128xf32>
    %155 = vector.broadcast %148 : vector<1x128xf32> to vector<128x128xf32>
    %156 = arith.subf %139, %155 : vector<128x128xf32>
    %cst_55 = arith.constant 9.99999974E-6 : f32
    %157 = vector.broadcast %cst_55 : f32 to vector<1x128xf32>
    %158 = arith.addf %154, %157 : vector<1x128xf32>
    %159 = math.rsqrt %158 : vector<1x128xf32>
    %160 = vector.broadcast %159 : vector<1x128xf32> to vector<128x128xf32>
    %161 = arith.mulf %156, %160 : vector<128x128xf32>
    %162 = vector.broadcast %140 : vector<1x128xf32> to vector<128x128xf32>
    %163 = arith.mulf %161, %162 : vector<128x128xf32>
    %164 = vector.broadcast %141 : vector<1x128xf32> to vector<128x128xf32>
    %165 = arith.addf %163, %164 : vector<128x128xf32>
    %cst_56 = arith.constant 0.000000e+00 : f32
    %166 = vector.broadcast %cst_56 : f32 to vector<128x128xf32>
    %167 = arith.cmpf oge, %165, %166 : vector<128x128xf32>
    %cst_57 = arith.constant 0.00999999977 : f32
    %168 = vector.broadcast %cst_57 : f32 to vector<128x128xf32>
    %169 = arith.mulf %168, %165 : vector<128x128xf32>
    %170 = arith.select %167, %165, %169 : vector<128x128xi1>, vector<128x128xf32>
    %171 = arith.truncf %170 : vector<128x128xf32> to vector<128x128xbf16>
    %c128_58 = arith.constant 128 : index
    %c0_59 = arith.constant 0 : index
    %172 = vector.load %arg2[%c128_58, %c0_59] : memref<384x128xbf16, #tpu.memory_space<vmem>>, vector<128x128xbf16>
    %cst_60 = arith.constant dense<0.000000e+00> : vector<128x128xf32>
    %173 = tpu.matmul %171, %172, %cst_60 {dimension_numbers = #tpu.dot_dimension_numbers<[1], [0], [0], [1], [0, 0, 1, 1], [], []>} : vector<128x128xbf16>, vector<128x128xbf16>, vector<128x128xf32> -> vector<128x128xf32>
    %c7 = arith.constant 7 : index
    %c0_61 = arith.constant 0 : index
    %174 = vector.load %arg4[%c7, %c0_61] : memref<20x128xf32, #tpu.memory_space<vmem>>, vector<1x128xf32>
    %c8 = arith.constant 8 : index
    %c0_62 = arith.constant 0 : index
    %175 = vector.load %arg4[%c8, %c0_62] : memref<20x128xf32, #tpu.memory_space<vmem>>, vector<1x128xf32>
    %cst_63 = arith.constant dense<0.000000e+00> : vector<128xf32>
    %176 = vector.multi_reduction <add>, %173, %cst_63 [0] : vector<128x128xf32> to vector<128xf32>
    %177 = vector.shape_cast %176 : vector<128xf32> to vector<1x128xf32>
    %178 = arith.mulf %173, %173 : vector<128x128xf32>
    %cst_64 = arith.constant dense<0.000000e+00> : vector<128xf32>
    %179 = vector.multi_reduction <add>, %178, %cst_64 [0] : vector<128x128xf32> to vector<128xf32>
    %180 = vector.shape_cast %179 : vector<128xf32> to vector<1x128xf32>
    %cst_65 = arith.constant 7.812500e-03 : f32
    %181 = vector.broadcast %cst_65 : f32 to vector<1x128xf32>
    %182 = arith.mulf %177, %181 : vector<1x128xf32>
    %cst_66 = arith.constant 7.812500e-03 : f32
    %183 = vector.broadcast %cst_66 : f32 to vector<1x128xf32>
    %184 = arith.mulf %180, %183 : vector<1x128xf32>
    %185 = arith.mulf %182, %182 : vector<1x128xf32>
    %186 = arith.subf %184, %185 : vector<1x128xf32>
    %cst_67 = arith.constant 0.000000e+00 : f32
    %187 = vector.broadcast %cst_67 : f32 to vector<1x128xf32>
    %188 = arith.maximumf %186, %187 : vector<1x128xf32>
    %189 = vector.broadcast %182 : vector<1x128xf32> to vector<128x128xf32>
    %190 = arith.subf %173, %189 : vector<128x128xf32>
    %cst_68 = arith.constant 9.99999974E-6 : f32
    %191 = vector.broadcast %cst_68 : f32 to vector<1x128xf32>
    %192 = arith.addf %188, %191 : vector<1x128xf32>
    %193 = math.rsqrt %192 : vector<1x128xf32>
    %194 = vector.broadcast %193 : vector<1x128xf32> to vector<128x128xf32>
    %195 = arith.mulf %190, %194 : vector<128x128xf32>
    %196 = vector.broadcast %174 : vector<1x128xf32> to vector<128x128xf32>
    %197 = arith.mulf %195, %196 : vector<128x128xf32>
    %198 = vector.broadcast %175 : vector<1x128xf32> to vector<128x128xf32>
    %199 = arith.addf %197, %198 : vector<128x128xf32>
    %cst_69 = arith.constant 0.000000e+00 : f32
    %200 = vector.broadcast %cst_69 : f32 to vector<128x128xf32>
    %201 = arith.cmpf oge, %199, %200 : vector<128x128xf32>
    %cst_70 = arith.constant 0.00999999977 : f32
    %202 = vector.broadcast %cst_70 : f32 to vector<128x128xf32>
    %203 = arith.mulf %202, %199 : vector<128x128xf32>
    %204 = arith.select %201, %199, %203 : vector<128x128xi1>, vector<128x128xf32>
    %c9 = arith.constant 9 : index
    %c0_71 = arith.constant 0 : index
    %205 = vector.load %arg4[%c9, %c0_71] : memref<20x128xf32, #tpu.memory_space<vmem>>, vector<1x128xf32>
    %206 = vector.shape_cast %204 : vector<128x128xf32> to vector<16x8x128xf32>
    %207 = vector.shape_cast %205 : vector<1x128xf32> to vector<1x1x128xf32>
    %208 = vector.broadcast %207 : vector<1x1x128xf32> to vector<16x8x128xf32>
    %209 = arith.mulf %206, %208 : vector<16x8x128xf32>
    %cst_72 = arith.constant dense<0.000000e+00> : vector<16x8xf32>
    %210 = vector.multi_reduction <add>, %209, %cst_72 [2] : vector<16x8x128xf32> to vector<16x8xf32>
    %cst_73 = arith.constant dense<0xFF800000> : vector<16xf32>
    %211 = vector.multi_reduction <maximumf>, %210, %cst_73 [1] : vector<16x8xf32> to vector<16xf32>
    %212 = vector.shape_cast %211 : vector<16xf32> to vector<16x1xf32>
    %213 = vector.broadcast %212 : vector<16x1xf32> to vector<16x8xf32>
    %214 = arith.subf %210, %213 : vector<16x8xf32>
    %215 = math.exp %214 : vector<16x8xf32>
    %cst_74 = arith.constant dense<0.000000e+00> : vector<16xf32>
    %216 = vector.multi_reduction <add>, %215, %cst_74 [1] : vector<16x8xf32> to vector<16xf32>
    %217 = vector.shape_cast %216 : vector<16xf32> to vector<16x1xf32>
    %218 = vector.broadcast %217 : vector<16x1xf32> to vector<16x8xf32>
    %219 = arith.divf %215, %218 : vector<16x8xf32>
    %220 = vector.shape_cast %219 : vector<16x8xf32> to vector<2x8x8xf32>
    %221 = arith.truncf %220 : vector<2x8x8xf32> to vector<2x8x8xbf16>
    "tpu.trace_start"() <{level = 10 : i32, message = "bij,bjd->bid"}> : () -> ()
    %cst_75 = arith.constant dense<0.000000e+00> : vector<2x8x256xf32>
    %222 = tpu.matmul %221, %130, %cst_75 {dimension_numbers = #tpu.dot_dimension_numbers<[2], [1], [1], [2], [0, 0, 0, 1, 1, 2], [0], [0]>} : vector<2x8x8xbf16>, vector<2x8x256xbf16>, vector<2x8x256xf32> -> vector<2x8x256xf32>
    "tpu.trace_stop"() : () -> ()
    %223 = vector.shape_cast %222 : vector<2x8x256xf32> to vector<16x256xf32>
    %224 = arith.truncf %223 : vector<16x256xf32> to vector<16x256xbf16>
    %c128_76 = arith.constant 128 : index
    %c0_77 = arith.constant 0 : index
    %225 = vector.load %arg3[%c128_76, %c0_77] : memref<768x128xbf16, #tpu.memory_space<vmem>>, vector<256x128xbf16>
    %cst_78 = arith.constant dense<0.000000e+00> : vector<16x128xf32>
    %226 = tpu.matmul %224, %225, %cst_78 {dimension_numbers = #tpu.dot_dimension_numbers<[1], [0], [0], [1], [0, 0, 1, 1], [], []>} : vector<16x256xbf16>, vector<256x128xbf16>, vector<16x128xf32> -> vector<16x128xf32>
    %c17 = arith.constant 17 : index
    %c0_79 = arith.constant 0 : index
    %227 = vector.load %arg4[%c17, %c0_79] : memref<20x128xf32, #tpu.memory_space<vmem>>, vector<1x128xf32>
    %c18 = arith.constant 18 : index
    %c0_80 = arith.constant 0 : index
    %228 = vector.load %arg4[%c18, %c0_80] : memref<20x128xf32, #tpu.memory_space<vmem>>, vector<1x128xf32>
    %cst_81 = arith.constant dense<0.000000e+00> : vector<128xf32>
    %229 = vector.multi_reduction <add>, %226, %cst_81 [0] : vector<16x128xf32> to vector<128xf32>
    %230 = vector.shape_cast %229 : vector<128xf32> to vector<1x128xf32>
    %231 = arith.mulf %226, %226 : vector<16x128xf32>
    %cst_82 = arith.constant dense<0.000000e+00> : vector<128xf32>
    %232 = vector.multi_reduction <add>, %231, %cst_82 [0] : vector<16x128xf32> to vector<128xf32>
    %233 = vector.shape_cast %232 : vector<128xf32> to vector<1x128xf32>
    %cst_83 = arith.constant 6.250000e-02 : f32
    %234 = vector.broadcast %cst_83 : f32 to vector<1x128xf32>
    %235 = arith.mulf %230, %234 : vector<1x128xf32>
    %cst_84 = arith.constant 6.250000e-02 : f32
    %236 = vector.broadcast %cst_84 : f32 to vector<1x128xf32>
    %237 = arith.mulf %233, %236 : vector<1x128xf32>
    %238 = arith.mulf %235, %235 : vector<1x128xf32>
    %239 = arith.subf %237, %238 : vector<1x128xf32>
    %cst_85 = arith.constant 0.000000e+00 : f32
    %240 = vector.broadcast %cst_85 : f32 to vector<1x128xf32>
    %241 = arith.maximumf %239, %240 : vector<1x128xf32>
    %242 = vector.broadcast %235 : vector<1x128xf32> to vector<16x128xf32>
    %243 = arith.subf %226, %242 : vector<16x128xf32>
    %cst_86 = arith.constant 9.99999974E-6 : f32
    %244 = vector.broadcast %cst_86 : f32 to vector<1x128xf32>
    %245 = arith.addf %241, %244 : vector<1x128xf32>
    %246 = math.rsqrt %245 : vector<1x128xf32>
    %247 = vector.broadcast %246 : vector<1x128xf32> to vector<16x128xf32>
    %248 = arith.mulf %243, %247 : vector<16x128xf32>
    %249 = vector.broadcast %227 : vector<1x128xf32> to vector<16x128xf32>
    %250 = arith.mulf %248, %249 : vector<16x128xf32>
    %251 = vector.broadcast %228 : vector<1x128xf32> to vector<16x128xf32>
    %252 = arith.addf %250, %251 : vector<16x128xf32>
    %cst_87 = arith.constant 0.000000e+00 : f32
    %253 = vector.broadcast %cst_87 : f32 to vector<16x128xf32>
    %254 = arith.cmpf oge, %252, %253 : vector<16x128xf32>
    %cst_88 = arith.constant 1.000000e-01 : f32
    %255 = vector.broadcast %cst_88 : f32 to vector<16x128xf32>
    %256 = arith.mulf %255, %252 : vector<16x128xf32>
    %257 = arith.select %254, %252, %256 : vector<16x128xi1>, vector<16x128xf32>
    %258 = arith.truncf %257 : vector<16x128xf32> to vector<16x128xbf16>
    %259 = vector.shape_cast %258 : vector<16x128xbf16> to vector<2x8x128xbf16>
    %260 = tpu.concatenate %130, %259 in 2 : vector<2x8x256xbf16>, vector<2x8x128xbf16> -> vector<2x8x384xbf16>
    %261 = vector.shape_cast %260 : vector<2x8x384xbf16> to vector<2x8x1x384xbf16>
    %262 = vector.shape_cast %260 : vector<2x8x384xbf16> to vector<2x1x8x384xbf16>
    %263 = vector.broadcast %261 : vector<2x8x1x384xbf16> to vector<2x8x8x384xbf16>
    %264 = vector.broadcast %262 : vector<2x1x8x384xbf16> to vector<2x8x8x384xbf16>
    %265 = arith.subf %263, %264 : vector<2x8x8x384xbf16>
    %266 = math.absf %265 : vector<2x8x8x384xbf16>
    %267 = vector.shape_cast %266 : vector<2x8x8x384xbf16> to vector<128x384xbf16>
    %c384 = arith.constant 384 : index
    %c0_89 = arith.constant 0 : index
    %268 = vector.load %arg1[%c384, %c0_89] : memref<768x128xbf16, #tpu.memory_space<vmem>>, vector<384x128xbf16>
    %cst_90 = arith.constant dense<0.000000e+00> : vector<128x128xf32>
    %269 = tpu.matmul %267, %268, %cst_90 {dimension_numbers = #tpu.dot_dimension_numbers<[1], [0], [0], [1], [0, 0, 1, 1], [], []>} : vector<128x384xbf16>, vector<384x128xbf16>, vector<128x128xf32> -> vector<128x128xf32>
    %c10 = arith.constant 10 : index
    %c0_91 = arith.constant 0 : index
    %270 = vector.load %arg4[%c10, %c0_91] : memref<20x128xf32, #tpu.memory_space<vmem>>, vector<1x128xf32>
    %c11 = arith.constant 11 : index
    %c0_92 = arith.constant 0 : index
    %271 = vector.load %arg4[%c11, %c0_92] : memref<20x128xf32, #tpu.memory_space<vmem>>, vector<1x128xf32>
    %cst_93 = arith.constant dense<0.000000e+00> : vector<128xf32>
    %272 = vector.multi_reduction <add>, %269, %cst_93 [0] : vector<128x128xf32> to vector<128xf32>
    %273 = vector.shape_cast %272 : vector<128xf32> to vector<1x128xf32>
    %274 = arith.mulf %269, %269 : vector<128x128xf32>
    %cst_94 = arith.constant dense<0.000000e+00> : vector<128xf32>
    %275 = vector.multi_reduction <add>, %274, %cst_94 [0] : vector<128x128xf32> to vector<128xf32>
    %276 = vector.shape_cast %275 : vector<128xf32> to vector<1x128xf32>
    %cst_95 = arith.constant 7.812500e-03 : f32
    %277 = vector.broadcast %cst_95 : f32 to vector<1x128xf32>
    %278 = arith.mulf %273, %277 : vector<1x128xf32>
    %cst_96 = arith.constant 7.812500e-03 : f32
    %279 = vector.broadcast %cst_96 : f32 to vector<1x128xf32>
    %280 = arith.mulf %276, %279 : vector<1x128xf32>
    %281 = arith.mulf %278, %278 : vector<1x128xf32>
    %282 = arith.subf %280, %281 : vector<1x128xf32>
    %cst_97 = arith.constant 0.000000e+00 : f32
    %283 = vector.broadcast %cst_97 : f32 to vector<1x128xf32>
    %284 = arith.maximumf %282, %283 : vector<1x128xf32>
    %285 = vector.broadcast %278 : vector<1x128xf32> to vector<128x128xf32>
    %286 = arith.subf %269, %285 : vector<128x128xf32>
    %cst_98 = arith.constant 9.99999974E-6 : f32
    %287 = vector.broadcast %cst_98 : f32 to vector<1x128xf32>
    %288 = arith.addf %284, %287 : vector<1x128xf32>
    %289 = math.rsqrt %288 : vector<1x128xf32>
    %290 = vector.broadcast %289 : vector<1x128xf32> to vector<128x128xf32>
    %291 = arith.mulf %286, %290 : vector<128x128xf32>
    %292 = vector.broadcast %270 : vector<1x128xf32> to vector<128x128xf32>
    %293 = arith.mulf %291, %292 : vector<128x128xf32>
    %294 = vector.broadcast %271 : vector<1x128xf32> to vector<128x128xf32>
    %295 = arith.addf %293, %294 : vector<128x128xf32>
    %cst_99 = arith.constant 0.000000e+00 : f32
    %296 = vector.broadcast %cst_99 : f32 to vector<128x128xf32>
    %297 = arith.cmpf oge, %295, %296 : vector<128x128xf32>
    %cst_100 = arith.constant 0.00999999977 : f32
    %298 = vector.broadcast %cst_100 : f32 to vector<128x128xf32>
    %299 = arith.mulf %298, %295 : vector<128x128xf32>
    %300 = arith.select %297, %295, %299 : vector<128x128xi1>, vector<128x128xf32>
    %301 = arith.truncf %300 : vector<128x128xf32> to vector<128x128xbf16>
    %c256 = arith.constant 256 : index
    %c0_101 = arith.constant 0 : index
    %302 = vector.load %arg2[%c256, %c0_101] : memref<384x128xbf16, #tpu.memory_space<vmem>>, vector<128x128xbf16>
    %cst_102 = arith.constant dense<0.000000e+00> : vector<128x128xf32>
    %303 = tpu.matmul %301, %302, %cst_102 {dimension_numbers = #tpu.dot_dimension_numbers<[1], [0], [0], [1], [0, 0, 1, 1], [], []>} : vector<128x128xbf16>, vector<128x128xbf16>, vector<128x128xf32> -> vector<128x128xf32>
    %c12 = arith.constant 12 : index
    %c0_103 = arith.constant 0 : index
    %304 = vector.load %arg4[%c12, %c0_103] : memref<20x128xf32, #tpu.memory_space<vmem>>, vector<1x128xf32>
    %c13 = arith.constant 13 : index
    %c0_104 = arith.constant 0 : index
    %305 = vector.load %arg4[%c13, %c0_104] : memref<20x128xf32, #tpu.memory_space<vmem>>, vector<1x128xf32>
    %cst_105 = arith.constant dense<0.000000e+00> : vector<128xf32>
    %306 = vector.multi_reduction <add>, %303, %cst_105 [0] : vector<128x128xf32> to vector<128xf32>
    %307 = vector.shape_cast %306 : vector<128xf32> to vector<1x128xf32>
    %308 = arith.mulf %303, %303 : vector<128x128xf32>
    %cst_106 = arith.constant dense<0.000000e+00> : vector<128xf32>
    %309 = vector.multi_reduction <add>, %308, %cst_106 [0] : vector<128x128xf32> to vector<128xf32>
    %310 = vector.shape_cast %309 : vector<128xf32> to vector<1x128xf32>
    %cst_107 = arith.constant 7.812500e-03 : f32
    %311 = vector.broadcast %cst_107 : f32 to vector<1x128xf32>
    %312 = arith.mulf %307, %311 : vector<1x128xf32>
    %cst_108 = arith.constant 7.812500e-03 : f32
    %313 = vector.broadcast %cst_108 : f32 to vector<1x128xf32>
    %314 = arith.mulf %310, %313 : vector<1x128xf32>
    %315 = arith.mulf %312, %312 : vector<1x128xf32>
    %316 = arith.subf %314, %315 : vector<1x128xf32>
    %cst_109 = arith.constant 0.000000e+00 : f32
    %317 = vector.broadcast %cst_109 : f32 to vector<1x128xf32>
    %318 = arith.maximumf %316, %317 : vector<1x128xf32>
    %319 = vector.broadcast %312 : vector<1x128xf32> to vector<128x128xf32>
    %320 = arith.subf %303, %319 : vector<128x128xf32>
    %cst_110 = arith.constant 9.99999974E-6 : f32
    %321 = vector.broadcast %cst_110 : f32 to vector<1x128xf32>
    %322 = arith.addf %318, %321 : vector<1x128xf32>
    %323 = math.rsqrt %322 : vector<1x128xf32>
    %324 = vector.broadcast %323 : vector<1x128xf32> to vector<128x128xf32>
    %325 = arith.mulf %320, %324 : vector<128x128xf32>
    %326 = vector.broadcast %304 : vector<1x128xf32> to vector<128x128xf32>
    %327 = arith.mulf %325, %326 : vector<128x128xf32>
    %328 = vector.broadcast %305 : vector<1x128xf32> to vector<128x128xf32>
    %329 = arith.addf %327, %328 : vector<128x128xf32>
    %cst_111 = arith.constant 0.000000e+00 : f32
    %330 = vector.broadcast %cst_111 : f32 to vector<128x128xf32>
    %331 = arith.cmpf oge, %329, %330 : vector<128x128xf32>
    %cst_112 = arith.constant 0.00999999977 : f32
    %332 = vector.broadcast %cst_112 : f32 to vector<128x128xf32>
    %333 = arith.mulf %332, %329 : vector<128x128xf32>
    %334 = arith.select %331, %329, %333 : vector<128x128xi1>, vector<128x128xf32>
    %c14 = arith.constant 14 : index
    %c0_113 = arith.constant 0 : index
    %335 = vector.load %arg4[%c14, %c0_113] : memref<20x128xf32, #tpu.memory_space<vmem>>, vector<1x128xf32>
    %336 = vector.shape_cast %334 : vector<128x128xf32> to vector<16x8x128xf32>
    %337 = vector.shape_cast %335 : vector<1x128xf32> to vector<1x1x128xf32>
    %338 = vector.broadcast %337 : vector<1x1x128xf32> to vector<16x8x128xf32>
    %339 = arith.mulf %336, %338 : vector<16x8x128xf32>
    %cst_114 = arith.constant dense<0.000000e+00> : vector<16x8xf32>
    %340 = vector.multi_reduction <add>, %339, %cst_114 [2] : vector<16x8x128xf32> to vector<16x8xf32>
    %cst_115 = arith.constant dense<0xFF800000> : vector<16xf32>
    %341 = vector.multi_reduction <maximumf>, %340, %cst_115 [1] : vector<16x8xf32> to vector<16xf32>
    %342 = vector.shape_cast %341 : vector<16xf32> to vector<16x1xf32>
    %343 = vector.broadcast %342 : vector<16x1xf32> to vector<16x8xf32>
    %344 = arith.subf %340, %343 : vector<16x8xf32>
    %345 = math.exp %344 : vector<16x8xf32>
    %cst_116 = arith.constant dense<0.000000e+00> : vector<16xf32>
    %346 = vector.multi_reduction <add>, %345, %cst_116 [1] : vector<16x8xf32> to vector<16xf32>
    %347 = vector.shape_cast %346 : vector<16xf32> to vector<16x1xf32>
    %348 = vector.broadcast %347 : vector<16x1xf32> to vector<16x8xf32>
    %349 = arith.divf %345, %348 : vector<16x8xf32>
    %c0_117 = arith.constant 0 : index
    %c0_118 = arith.constant 0 : index
    %350 = vector.load %arg6[%c0_117, %c0_118] : memref<16x8xf32, #tpu.memory_space<vmem>>, vector<16x8xf32>
    tpu.vector_store %arg6[%c0_117, %c0_118], %349 {strides = array<i32>} : memref<16x8xf32, #tpu.memory_space<vmem>>, vector<16x8xf32>,
    %351 = vector.shape_cast %349 : vector<16x8xf32> to vector<2x8x8xf32>
    %352 = vector.extract_strided_slice %351 {offsets = [0, 0, 0], sizes = [2, 1, 8], strides = [1, 1, 1]} : vector<2x8x8xf32> to vector<2x1x8xf32>
    %353 = vector.shape_cast %352 : vector<2x1x8xf32> to vector<2x8xf32>
    %354 = vector.shape_cast %353 : vector<2x8xf32> to vector<2x8x1xf32>
    %355 = arith.extf %260 : vector<2x8x384xbf16> to vector<2x8x384xf32>
    %356 = vector.broadcast %354 : vector<2x8x1xf32> to vector<2x8x384xf32>
    %357 = arith.mulf %356, %355 : vector<2x8x384xf32>
    %cst_119 = arith.constant dense<0.000000e+00> : vector<2x384xf32>
    %358 = vector.multi_reduction <add>, %357, %cst_119 [1] : vector<2x8x384xf32> to vector<2x384xf32>
    %359 = arith.truncf %358 : vector<2x384xf32> to vector<2x384xbf16>
    %c384_120 = arith.constant 384 : index
    %c0_121 = arith.constant 0 : index
    %360 = vector.load %arg3[%c384_120, %c0_121] : memref<768x128xbf16, #tpu.memory_space<vmem>>, vector<384x128xbf16>
    %cst_122 = arith.constant dense<0.000000e+00> : vector<2x128xf32>
    %361 = tpu.matmul %359, %360, %cst_122 {dimension_numbers = #tpu.dot_dimension_numbers<[1], [0], [0], [1], [0, 0, 1, 1], [], []>} : vector<2x384xbf16>, vector<384x128xbf16>, vector<2x128xf32> -> vector<2x128xf32>
    %c19 = arith.constant 19 : index
    %c0_123 = arith.constant 0 : index
    %362 = vector.load %arg4[%c19, %c0_123] : memref<20x128xf32, #tpu.memory_space<vmem>>, vector<1x128xf32>
    %363 = vector.broadcast %362 : vector<1x128xf32> to vector<2x128xf32>
    %364 = arith.addf %361, %363 : vector<2x128xf32>
    %c0_124 = arith.constant 0 : index
    %c0_125 = arith.constant 0 : index
    %365 = vector.load %arg5[%c0_124, %c0_125] : memref<2x128xf32, #tpu.memory_space<vmem>>, vector<2x128xf32>
    tpu.vector_store %arg5[%c0_124, %c0_125], %364 {strides = array<i32>} : memref<2x128xf32, #tpu.memory_space<vmem>>, vector<2x128xf32>,
    return
  }
}

</mosaic_0001>

<bundles_post_ra>
// kernel: gnn_forward.1
= control target key start
LH: loop header
LB: loop body
LE: loop exit
PB: predicated region body
PF: predicated region fallthrough
CT: control target
= control target key end

     0   :  { %12 = vsyncpa [#allocation3], 0  ;;  %s11252_s0 = inlined_call_operand.vmem [shape: bf16[2,8,128], index: 0, kind: input, shape index: {}]   ;;  %s11253_s1 = inlined_call_operand.hbm [shape: bf16[768,128], index: 1, kind: input, shape index: {}]   ;;  %s11254_s2 = inlined_call_operand.hbm [shape: bf16[384,128], index: 2, kind: input, shape index: {}]   ;;  %s11255_s3 = inlined_call_operand.hbm [shape: bf16[768,128], index: 3, kind: input, shape index: {}]   ;;  %s11256_s4 = inlined_call_operand.vmem [shape: f32[20,128], index: 4, kind: input, shape index: {}]   ;;  %s11257_s5 = inlined_call_operand.hbm [shape: f32[2,128], index: 5, kind: output, shape index: {0}]   ;;  %s11258_s6 = inlined_call_operand.hbm [shape: f32[16,8], index: 6, kind: output, shape index: {1}]  }
   0x1   :  { %13 = vsyncpa [#allocation6], 0 }
   0x2   :  { %14 = vsyncpa [#allocation4], 0 }
   0x3   :  { %15 = vsyncpa [#allocation10], 0  ;;  %s8547_s21 = smov [#allocation5]   ;;  %s8548_s23 = smov [#allocation2]  }
   0x4   :  { %s35_s22 = sshll.u32 %s8547_s21, 4  ;;  %s23_s24 = sshll.u32 %s8548_s23, 4  ;;  %s36_s22 = int_to_ptr.vmem [resolvable:$true] %s35_s22  ;;  %s8595_s24 = int_to_ptr.vmem [resolvable:$true] %s23_s24 }
   0x5   :  { %s8429_s27 = scalar_lea.hbm %s11254_s2, 3072 }
   0x6   :  { %p8430_p0 = scmp.ne.s32.totalorder %s11254_s2, %s8429_s27  ;;  %p8433_p1 = scmp.lt.u32.totalorder %s8429_s27, %s11254_s2 }
   0x8   :  { %p8435_p2 = pnand %p8433_p1, %p8430_p0 }
   0xa   :  { %8438 = shalt.err (!%p8435_p2)
}
   0xb   :  { %s8439_s8 = scalar_lea.vmem %s36_s22, 3072  ;;  %p8444_p4 = scmp.lt.s32.totalorder %s36_s22, %s36_s22 }
   0xc   :  { %p8440_p3 = scmp.ne.s32.totalorder %s36_s22, %s8439_s8  ;;  %p8445_p5 = scmp.lt.s32.totalorder %s8439_s8, %s8439_s8 }
   0xe   :  { %p8446_p6 = por %p8445_p5, %p8444_p4 }
  0x10   :  { %p8447_p7 = pnand %p8446_p6, %p8440_p3 }
  0x12   :  { %8450 = shalt.err (!%p8447_p7)
}
  0x13   :  { %s8549_s9 = smov 64   ;;  %s8550_s10 = smov 4  }
  0x14   :  { %41 = dma.hbm_to_vmem [thread:$0]  %s11254_s2, 3072, %s36_s22, [#allocation6], %s8549_s9, %s8549_s9, %s8550_s10  }
  0x15   :  { %s8451_s15 = scalar_lea.hbm %s11253_s1, 6144 }
  0x16   :  { %p8452_p8 = scmp.ne.s32.totalorder %s11253_s1, %s8451_s15  ;;  %p8455_p9 = scmp.lt.u32.totalorder %s8451_s15, %s11253_s1 }
  0x18   :  { %p8457_p10 = pnand %p8455_p9, %p8452_p8 }
  0x1a   :  { %8460 = shalt.err (!%p8457_p10)
}
  0x1b   :  { %s8461_s20 = scalar_lea.vmem %s8595_s24, 6144  ;;  %p8466_p12 = scmp.lt.s32.totalorder %s8595_s24, %s8595_s24 }
  0x1c   :  { %p8462_p11 = scmp.ne.s32.totalorder %s8595_s24, %s8461_s20  ;;  %p8467_p13 = scmp.lt.s32.totalorder %s8461_s20, %s8461_s20 }
  0x1e   :  { %p8468_p0 = por %p8467_p13, %p8466_p12 }
  0x20   :  { %p8469_p1 = pnand %p8468_p0, %p8462_p11 }
  0x22   :  { %8472 = shalt.err (!%p8469_p1)
}
  0x23   :  { %29 = dma.hbm_to_vmem [thread:$0]  %s11253_s1, 6144, %s8595_s24, [#allocation3], %s8549_s9, %s8549_s9, %s8550_s10  }
  0x24   :  { %s8551_s22 = smov [#allocation7]   ;;  %s8473_s27 = scalar_lea.hbm %s11255_s3, 6144 }
  0x25   :  { %s47_s23 = sshll.u32 %s8551_s22, 4  ;;  %p8474_p2 = scmp.ne.s32.totalorder %s11255_s3, %s8473_s27  ;;  %s48_s23 = int_to_ptr.vmem [resolvable:$true] %s47_s23 }
  0x26   :  { %p8477_p3 = scmp.lt.u32.totalorder %s8473_s27, %s11255_s3 }
  0x28   :  { %p8479_p4 = pnand %p8477_p3, %p8474_p2 }
  0x2a   :  { %8482 = shalt.err (!%p8479_p4)
}
  0x2b   :  { %s8483_s8 = scalar_lea.vmem %s48_s23, 6144  ;;  %p8488_p6 = scmp.lt.s32.totalorder %s48_s23, %s48_s23 }
  0x2c   :  { %p8484_p5 = scmp.ne.s32.totalorder %s48_s23, %s8483_s8  ;;  %p8489_p7 = scmp.lt.s32.totalorder %s8483_s8, %s8483_s8 }
  0x2e   :  { %p8490_p8 = por %p8489_p7, %p8488_p6 }
  0x30   :  { %p8491_p9 = pnand %p8490_p8, %p8484_p5 }
  0x32   :  { %8494 = shalt.err (!%p8491_p9)
}
  0x33   :  { %53 = dma.hbm_to_vmem [thread:$0]  %s11255_s3, 6144, %s48_s23, [#allocation6], %s8549_s9, %s8549_s9, %s8550_s10  }
  0x34   :  { %8539 = dma.done.wait [#allocation3], 6144  }
  0x35   :  { %8540 = vsyncadd [#allocation3], 4294961152 }
  0x36   :  { %8541 = dma.done.wait [#allocation6], 9216  }
  0x37   :  { %8542 = vsyncadd [#allocation6], 4294958080  ;;  %v8552_v0 = vmov 1966171168   ;;  %v73_v2 = vlaneseq  ;;  %v8095_v3 = vld [vmem:[#allocation2] sm:$0xff]   ;;  %v8096_v4 = vld [vmem:[#allocation2 + $0x8] sm:$0xff]  }
  0x38   :  { %v71_v1 = vunpack.c.l.s4 %v8552_v0  ;;  %7868 = vmatprep.subr.bf16.mxu0 %v8095_v3  ;;  %v8097_v7 = vld [vmem:[#allocation2 + $0x10] sm:$0xff]   ;;  %v8098_v9 = vld [vmem:[#allocation2 + $0x18] sm:$0xff]   ;;  %v8659_v11 = vld [vmem:[%s11252_s0] sm:$0xf] }
  0x39   :  { %v8648_v6 = vshrl.u32 %v73_v2, 7  ;;  %7869 = vmatpush3.bf16.msra.mxu0 %v8095_v3  ;;  %v8664_v12 = vld [vmem:[%s11252_s0 + $0x4] sm:$0xf]  ;;  %v8100_v24 = vld [vmem:[#allocation2 + $0x28] sm:$0xff]   ;;  %v8101_v41 = vld [vmem:[#allocation2 + $0x30] sm:$0xff]  }
  0x3a   :  { %v72_v5 = vunpack.c.0.s8 %v71_v1  ;;  %7870 = vmatprep.subr.bf16.mxu0 %v8096_v4  ;;  %v8099_v15 = vld [vmem:[#allocation2 + $0x20] sm:$0xff]   ;;  %v8102_v58 = vld [vmem:[#allocation2 + $0x38] sm:$0xff]  }
  0x3b   :  { %v8654_v10 = vsub.s32 0, %v8648_v6 }
  0x3c   :  { %v8651_v8 = vsub.s32 %v72_v5, %v8648_v6 }
  0x3d   :  { %7871 = vmatpush3.bf16.msra.mxu0 %v8096_v4 }
  0x3e   :  { %7872 = vmatprep.subr.bf16.mxu0 %v8097_v7  ;;  %v76_v13 = vrot.slane %v8659_v11, %v8651_v8  ;;  %v100_v14 = vrot.slane %v8664_v12, %v8651_v8 }
  0x40   :  { %v77_v16 = vcombine.high %v76_v13, %v76_v13  ;;  %v84_v17 = vrot.slane %v76_v13, %v8651_v8  ;;  %v8672_v18 = vrot.slane %v100_v14, %v8651_v8  ;;  %v101_v19 = vcombine.high %v100_v14, %v100_v14 }
  0x41   :  { %7873 = vmatpush3.bf16.msra.mxu0 %v8097_v7 }
  0x42   :  { %7874 = vmatprep.subr.bf16.mxu0 %v8098_v9  ;;  %v119_v20 = vunpack.i.h.s16 %v84_v17  ;;  %v7367_v21 = vpack.i.b16 %v84_v17, %v84_v17  ;;  %v91_v22 = vrot.slane %v77_v16, %v8651_v8  ;;  %v92_v23 = vcombine.high %v84_v17, %v84_v17 }
  0x43   :  { %v127_v25 = vunpack.i.h.s16 %v8672_v18  ;;  %v7371_v26 = vpack.i.b16 %v8672_v18, %v8672_v18  ;;  %v8679_v27 = vrot.slane %v101_v19, %v8651_v8  ;;  %v8683_v28 = vcombine.high %v8672_v18, %v8672_v18 }
  0x44   :  { %v135_v29 = vpack.i.b16 %v119_v20, %v119_v20  ;;  %v153_v30 = vrot.slane %v7367_v21, %v8654_v10  ;;  %v121_v31 = vunpack.i.h.s16 %v91_v22  ;;  %v7368_v32 = vpack.i.b16 %v91_v22, %v91_v22 }
  0x45   :  { %7875 = vmatpush3.bf16.msra.mxu0 %v8098_v9  ;;  %v123_v33 = vunpack.i.h.s16 %v92_v23  ;;  %v7369_v34 = vpack.i.b16 %v92_v23, %v92_v23  ;;  %v93_v35 = vcombine.high %v91_v22, %v91_v22  ;;  %v143_v36 = vpack.i.b16 %v127_v25, %v127_v25 }
  0x46   :  { %7876 = vmatprep.subr.bf16.mxu0 %v8099_v15  ;;  %v157_v37 = vrot.slane %v135_v29, %v8654_v10  ;;  %v215_v38 = vpack.i.b16 %v153_v30, %v153_v30  ;;  %v137_v39 = vpack.i.b16 %v121_v31, %v121_v31  ;;  %v161_v40 = vrot.slane %v7368_v32, %v8654_v10 }
  0x47   :  { %v139_v42 = vpack.i.b16 %v123_v33, %v123_v33  ;;  %v169_v43 = vrot.slane %v7369_v34, %v8654_v10  ;;  %v125_v44 = vunpack.i.h.s16 %v93_v35  ;;  %v7370_v45 = vpack.i.b16 %v93_v35, %v93_v35 }
  0x48   :  { %v220_v46 = vrot.slane %v215_v38, %v8654_v10  ;;  %v222_v47 = vpack.i.b16 %v157_v37, %v157_v37  ;;  %v165_v48 = vrot.slane %v137_v39, %v8654_v10  ;;  %v229_v49 = vpack.i.b16 %v161_v40, %v161_v40 }
  0x49   :  { %7877 = vmatpush3.bf16.msra.mxu0 %v8099_v15  ;;  %v173_v50 = vrot.slane %v139_v42, %v8654_v10  ;;  %v243_v51 = vpack.i.b16 %v169_v43, %v169_v43  ;;  %v141_v52 = vpack.i.b16 %v125_v44, %v125_v44  ;;  %v177_v53 = vrot.slane %v7370_v45, %v8654_v10 }
  0x4a   :  { %7878 = vmatprep.subr.bf16.mxu0 %v8100_v24  ;;  %v227_v54 = vrot.slane %v222_v47, %v8654_v10  ;;  %v326_v55 = vsub.bf16 %v220_v46, %v8659_v11  ;;  %v234_v56 = vrot.slane %v229_v49, %v8654_v10  ;;  %v236_v57 = vpack.i.b16 %v165_v48, %v165_v48 }
  0x4b   :  { %v248_v59 = vrot.slane %v243_v51, %v8654_v10  ;;  %v250_v60 = vpack.i.b16 %v173_v50, %v173_v50  ;;  %v181_v61 = vrot.slane %v141_v52, %v8654_v10  ;;  %v257_v62 = vpack.i.b16 %v177_v53, %v177_v53 }
  0x4c   :  { %v327_v63 = vsub.bf16 %v227_v54, %v8659_v11  ;;  %v342_v0 = vand.u32 2147450879, %v326_v55  ;;  %v241_v1 = vrot.slane %v236_v57, %v8654_v10  ;;  %v328_v3 = vsub.bf16 %v234_v56, %v8659_v11 }
  0x4d   :  { %7879 = vmatpush3.bf16.msra.mxu0 %v8100_v24  ;;  %v255_v4 = vrot.slane %v250_v60, %v8654_v10  ;;  %v330_v5 = vsub.bf16 %v248_v59, %v8659_v11  ;;  %v262_v7 = vrot.slane %v257_v62, %v8654_v10  ;;  %v264_v9 = vpack.i.b16 %v181_v61, %v181_v61 }
  0x4e   :  { %7880 = vmatprep.subr.bf16.mxu0 %v8101_v41  ;;  %v343_v13 = vand.u32 2147450879, %v327_v63  ;;  %v329_v14 = vsub.bf16 %v241_v1, %v8659_v11  ;;  %v344_v15 = vand.u32 2147450879, %v328_v3  ;;  %v185_v16 = vrot.slane %v7371_v26, %v8654_v10 }
  0x4f   :  { %v331_v17 = vsub.bf16 %v255_v4, %v8659_v11  ;;  %v346_v18 = vand.u32 2147450879, %v330_v5  ;;  %v269_v19 = vrot.slane %v264_v9, %v8654_v10  ;;  %v332_v20 = vsub.bf16 %v262_v7, %v8659_v11 }
  0x50   :  { %v7375_v21 = vcombine.low %v342_v0, %v343_v13  ;;  %v345_v22 = vand.u32 2147450879, %v329_v14  ;;  %v189_v23 = vrot.slane %v143_v36, %v8654_v10  ;;  %v271_v24 = vpack.i.b16 %v185_v16, %v185_v16 }
  0x51   :  { %7881 = vmatpush3.bf16.msra.mxu0 %v8101_v41  ;;  %v347_v25 = vand.u32 2147450879, %v331_v17  ;;  %v333_v29 = vsub.bf16 %v269_v19, %v8659_v11  ;;  %v348_v30 = vand.u32 2147450879, %v332_v20  ;;  %v129_v26 = vunpack.i.h.s16 %v8679_v27 }
  0x52   :  { %7882 = vmatprep.subr.bf16.mxu0 %v8102_v58  ;;  %7884 = vmatprep.mubr.bf16.mxu0 %v7375_v21  ;;  %v7376_v31 = vcombine.low %v344_v15, %v345_v22  ;;  %v276_v32 = vrot.slane %v271_v24, %v8654_v10  ;;  %v278_v33 = vpack.i.b16 %v189_v23, %v189_v23  ;;  %v131_v36 = vunpack.i.h.s16 %v8683_v28  ;;  %v8103_v24 = vld [vmem:[#allocation5] sm:$0xff]  }
  0x53   :  { %v7372_v34 = vpack.i.b16 %v8679_v27, %v8679_v27  ;;  %v7377_v35 = vcombine.low %v346_v18, %v347_v25  ;;  %v349_v37 = vand.u32 2147450879, %v333_v29  ;;  %v145_v38 = vpack.i.b16 %v129_v26, %v129_v26  ;;  %7900 = vmatprep.subr.bf16.mxu1 %v8103_v24  ;;  %v8104_v25 = vld [vmem:[#allocation5 + $0x8] sm:$0xff]   ;;  %v8105_v29 = vld [vmem:[#allocation5 + $0x10] sm:$0xff]  }
  0x54   :  { %v283_v39 = vrot.slane %v278_v33, %v8654_v10  ;;  %v334_v11 = vsub.bf16 %v276_v32, %v8664_v12  ;;  %v7373_v41 = vpack.i.b16 %v8683_v28, %v8683_v28  ;;  %v147_v43 = vpack.i.b16 %v131_v36, %v131_v36  ;;  %7901 = vmatpush3.bf16.msra.mxu1 %v8103_v24  ;;  %v8108_v26 = vld [vmem:[#allocation5 + $0x28] sm:$0xff]   ;;  %v8110_v32 = vld [vmem:[#allocation5 + $0x38] sm:$0xff]  }
  0x55   :  { %7883 = vmatpush3.bf16.msra.mxu0 %v8102_v58  ;;  %v193_v40 = vrot.slane %v7372_v34, %v8654_v10  ;;  %v197_v42 = vrot.slane %v145_v38, %v8654_v10  ;;  %v117_v44 = vcombine.high %v8679_v27, %v8679_v27  ;;  %v7378_v58 = vcombine.low %v348_v30, %v349_v37  ;;  %v8106_v30 = vld [vmem:[#allocation5 + $0x18] sm:$0xff]  }
  0x56   :  { %v335_v45 = vsub.bf16 %v283_v39, %v8664_v12  ;;  %v350_v46 = vand.u32 2147450879, %v334_v11  ;;  %v201_v48 = vrot.slane %v7373_v41, %v8654_v10  ;;  %v205_v50 = vrot.slane %v147_v43, %v8654_v10  ;;  %7902 = vmatprep.subr.bf16.mxu1 %v8104_v25 }
  0x57   :  { %v285_v47 = vpack.i.b16 %v193_v40, %v193_v40  ;;  %v292_v49 = vpack.i.b16 %v197_v42, %v197_v42  ;;  %v133_v51 = vunpack.i.h.s16 %v117_v44  ;;  %v7374_v52 = vpack.i.b16 %v117_v44, %v117_v44 }
  0x58   :  { %7885 = vmatmul.mubr.bf16.vlgmr.msra.gmra.mrb[0].mxu0 %v7376_v31  ;;  %v351_v28 = vand.u32 2147450879, %v335_v45  ;;  %v299_v54 = vpack.i.b16 %v201_v48, %v201_v48  ;;  %v306_v27 = vpack.i.b16 %v205_v50, %v205_v50  ;;  %7903 = vmatpush3.bf16.msra.mxu1 %v8104_v25  ;;  %v8109_v31 = vld [vmem:[#allocation5 + $0x30] sm:$0xff]  }
  0x59   :  { %7888 = vmatprep.mubr.bf16.mxu0 %v7377_v35  ;;  %v290_v53 = vrot.slane %v285_v47, %v8654_v10  ;;  %v297_v55 = vrot.slane %v292_v49, %v8654_v10  ;;  %v149_v56 = vpack.i.b16 %v133_v51, %v133_v51  ;;  %v209_v57 = vrot.slane %v7374_v52, %v8654_v10 }
  0x5a   :  { %v304_v60 = vrot.slane %v299_v54, %v8654_v10  ;;  %v311_v62 = vrot.slane %v306_v27, %v8654_v10  ;;  %v7379_v1 = vcombine.low %v350_v46, %v351_v28  ;;  %7904 = vmatprep.subr.bf16.mxu1 %v8105_v29 }
  0x5b   :  { %v336_v59 = vsub.bf16 %v290_v53, %v8664_v12  ;;  %v337_v61 = vsub.bf16 %v297_v55, %v8664_v12  ;;  %v213_v63 = vrot.slane %v149_v56, %v8654_v10  ;;  %v313_v0 = vpack.i.b16 %v209_v57, %v209_v57 }
  0x5c   :  { %v338_v4 = vsub.bf16 %v304_v60, %v8664_v12  ;;  %v339_v7 = vsub.bf16 %v311_v62, %v8664_v12  ;;  %7905 = vmatpush3.bf16.msra.mxu1 %v8105_v29 }
  0x5d   :  { %v352_v3 = vand.u32 2147450879, %v336_v59  ;;  %v353_v5 = vand.u32 2147450879, %v337_v61  ;;  %v318_v9 = vrot.slane %v313_v0, %v8654_v10  ;;  %v320_v13 = vpack.i.b16 %v213_v63, %v213_v63  ;;  %7906 = vmatprep.subr.bf16.mxu1 %v8106_v30 }
  0x5e   :  { %v354_v14 = vand.u32 2147450879, %v338_v4  ;;  %v355_v15 = vand.u32 2147450879, %v339_v7 }
  0x5f   :  { %v325_v16 = vrot.slane %v320_v13, %v8654_v10  ;;  %v340_v17 = vsub.bf16 %v318_v9, %v8664_v12  ;;  %v7380_v20 = vcombine.low %v352_v3, %v353_v5 }
  0x60   :  { %7889 = vmatmul.mubr.bf16.gmra.mrb[4].mxu0 %v7378_v58  ;;  %v7381_v22 = vcombine.low %v354_v14, %v355_v15  ;;  %7907 = vmatpush3.bf16.msra.mxu1 %v8106_v30 }
  0x61   :  { %7892 = vmatprep.mubr.bf16.mxu0 %v7379_v1  ;;  %v341_v18 = vsub.bf16 %v325_v16, %v8664_v12  ;;  %v356_v19 = vand.u32 2147450879, %v340_v17  ;;  %v8107_v12 = vld [vmem:[#allocation5 + $0x20] sm:$0xff]  }
  0x62   :  { %7908 = vmatprep.subr.bf16.mxu1 %v8107_v12 }
  0x63   :  { %v357_v21 = vand.u32 2147450879, %v341_v18 }
  0x64   :  { %7909 = vmatpush3.bf16.msra.mxu1 %v8107_v12 }
  0x65   :  { %v7382_v23 = vcombine.low %v356_v19, %v357_v21  ;;  %7910 = vmatprep.subr.bf16.mxu1 %v8108_v26 }
  0x68   :  { %7893 = vmatmul.mubr.bf16.gmra.mrb[8].mxu0 %v7380_v20  ;;  %7911 = vmatpush3.bf16.msra.mxu1 %v8108_v26 }
  0x69   :  { %7896 = vmatprep.mubr.bf16.mxu0 %v7381_v22  ;;  %7912 = vmatprep.subr.bf16.mxu1 %v8109_v31 }
  0x6c   :  { %7913 = vmatpush3.bf16.msra.mxu1 %v8109_v31 }
  0x6d   :  { %7914 = vmatprep.subr.bf16.mxu1 %v8110_v32 }
  0x70   :  { %7897 = vmatmul.mubr.bf16.gmra.mrb[12].mxu0 %v7382_v23  ;;  %7915 = vmatpush3.bf16.msra.mxu1 %v8110_v32 }
 0x12b   :  { %v8741_v33 = vpop.f32.mrb[0].mxu0 }
 0x12c   :  { %v8743_v34 = vpop.f32.mrb[1].mxu0  ;;  %v592_v11 = vmul.f32 %v8741_v33, %v8741_v33 }
 0x12d   :  { %v8745_v35 = vpop.f32.mrb[2].mxu0  ;;  %v590_v38 = vmul.f32 %v8743_v34, %v8743_v34 }
 0x12e   :  { %v8747_v37 = vpop.f32.mrb[3].mxu0  ;;  %v593_v42 = vmul.f32 %v8745_v35, %v8745_v35 }
 0x12f   :  { %v569_v36 = vadd.f32 %v8747_v37, %v8743_v34  ;;  %v591_v39 = vmul.f32 %v8747_v37, %v8747_v37 }
 0x131   :  { %v570_v40 = vadd.f32 %v8741_v33, %v569_v36  ;;  %v606_v41 = vadd.f32 %v591_v39, %v590_v38 }
 0x133   :  { %v607_v43 = vadd.f32 %v606_v41, %v592_v11  ;;  %v8760_v44 = vpop.f32.mrb[4].mxu0  ;;  %v571_v45 = vadd.f32 %v8745_v35, %v570_v40 }
 0x134   :  { %v8763_v46 = vpop.f32.mrb[5].mxu0  ;;  %v596_v54 = vmul.f32 %v8760_v44, %v8760_v44 }
 0x135   :  { %v572_v47 = vadd.f32 %v571_v45, %v8763_v46  ;;  %v594_v48 = vmul.f32 %v8763_v46, %v8763_v46  ;;  %v608_v49 = vadd.f32 %v607_v43, %v593_v42  ;;  %v8768_v50 = vpop.f32.mrb[6].mxu0 }
 0x136   :  { %v8770_v51 = vpop.f32.mrb[7].mxu0  ;;  %v597_v56 = vmul.f32 %v8768_v50, %v8768_v50 }
 0x137   :  { %v609_v52 = vadd.f32 %v608_v49, %v594_v48  ;;  %v573_v28 = vadd.f32 %v572_v47, %v8770_v51  ;;  %v595_v53 = vmul.f32 %v8770_v51, %v8770_v51 }
 0x139   :  { %v574_v55 = vadd.f32 %v8760_v44, %v573_v28  ;;  %v610_v27 = vadd.f32 %v609_v52, %v595_v53 }
 0x13b   :  { %v611_v57 = vadd.f32 %v610_v27, %v596_v54  ;;  %v8780_v58 = vpop.f32.mrb[8].mxu0  ;;  %v575_v59 = vadd.f32 %v8768_v50, %v574_v55 }
 0x13c   :  { %v8783_v60 = vpop.f32.mrb[9].mxu0  ;;  %v600_v7 = vmul.f32 %v8780_v58, %v8780_v58 }
 0x13d   :  { %v576_v61 = vadd.f32 %v575_v59, %v8783_v60  ;;  %v598_v62 = vmul.f32 %v8783_v60, %v8783_v60  ;;  %v612_v63 = vadd.f32 %v611_v57, %v597_v56  ;;  %v8788_v0 = vpop.f32.mrb[10].mxu0 }
 0x13e   :  { %v8790_v1 = vpop.f32.mrb[11].mxu0  ;;  %v601_v14 = vmul.f32 %v8788_v0, %v8788_v0 }
 0x13f   :  { %v613_v3 = vadd.f32 %v612_v63, %v598_v62  ;;  %v577_v4 = vadd.f32 %v576_v61, %v8790_v1  ;;  %v599_v5 = vmul.f32 %v8790_v1, %v8790_v1 }
 0x141   :  { %v578_v9 = vadd.f32 %v8780_v58, %v577_v4  ;;  %v614_v13 = vadd.f32 %v613_v3, %v599_v5 }
 0x143   :  { %v615_v15 = vadd.f32 %v614_v13, %v600_v7  ;;  %v8800_v16 = vpop.f32.mrb[12].mxu0  ;;  %v579_v17 = vadd.f32 %v8788_v0, %v578_v9 }
 0x144   :  { %v8803_v18 = vpop.f32.mrb[13].mxu0  ;;  %v604_v30 = vmul.f32 %v8800_v16, %v8800_v16 }
 0x145   :  { %v580_v19 = vadd.f32 %v579_v17, %v8803_v18  ;;  %v602_v20 = vmul.f32 %v8803_v18, %v8803_v18  ;;  %v616_v21 = vadd.f32 %v615_v15, %v601_v14  ;;  %v8808_v22 = vpop.f32.mrb[14].mxu0  ;;  %v8865_v15 = vld [vmem:[%s11256_s4 + $0x1] ss:$0 sm:$0xff] }
 0x146   :  { %v555_v23 = vpop.f32.mrb[15].mxu0  ;;  %v605_v31 = vmul.f32 %v8808_v22, %v8808_v22 }
 0x147   :  { %v617_v24 = vadd.f32 %v616_v21, %v602_v20  ;;  %v581_v25 = vadd.f32 %v580_v19, %v555_v23  ;;  %v603_v29 = vmul.f32 %v555_v23, %v555_v23 }
 0x149   :  { %v582_v12 = vadd.f32 %v8800_v16, %v581_v25  ;;  %v618_v26 = vadd.f32 %v617_v24, %v603_v29 }
 0x14b   :  { %v583_v32 = vadd.f32 %v8808_v22, %v582_v12  ;;  %v619_v38 = vadd.f32 %v618_v26, %v604_v30 }
 0x14d   :  { %v584_v36 = vrot.slane %v583_v32, 4  ;;  %v620_v39 = vadd.f32 %v619_v38, %v605_v31 }
 0x14f   :  { %v585_v11 = vadd.f32 %v584_v36, %v583_v32  ;;  %v621_v40 = vrot.slane %v620_v39, 4 }
 0x151   :  { %v586_v41 = vrot.slane %v585_v11, 2  ;;  %v622_v42 = vadd.f32 %v621_v40, %v620_v39 }
 0x153   :  { %v587_v43 = vadd.f32 %v586_v41, %v585_v11  ;;  %v623_v45 = vrot.slane %v622_v42, 2 }
 0x155   :  { %v588_v47 = vrot.slane %v587_v43, 1  ;;  %v624_v48 = vadd.f32 %v623_v45, %v622_v42 }
 0x157   :  { %v589_v49 = vadd.f32 %v588_v47, %v587_v43  ;;  %v625_v52 = vrot.slane %v624_v48, 1 }
 0x159   :  { %v626_v28 = vadd.f32 %v625_v52, %v624_v48  ;;  %v8816_v53 = vmul.f32 0.0078125, %v589_v49 }
 0x15b   :  { %v628_v54 = vmul.f32 0.0078125, %v626_v28  ;;  %v629_v55 = vmul.f32 %v8816_v53, %v8816_v53  ;;  %v645_v27 = vsub.f32 %v555_v23, %v8816_v53  ;;  %v632_v56 = vsub.f32 %v8743_v34, %v8816_v53 }
 0x15c   :  { %v633_v57 = vsub.f32 %v8747_v37, %v8816_v53  ;;  %v634_v59 = vsub.f32 %v8741_v33, %v8816_v53  ;;  %v635_v61 = vsub.f32 %v8745_v35, %v8816_v53  ;;  %v636_v62 = vsub.f32 %v8763_v46, %v8816_v53 }
 0x15d   :  { %v630_v63 = vsub.f32 %v628_v54, %v629_v55  ;;  %v637_v3 = vsub.f32 %v8770_v51, %v8816_v53  ;;  %v638_v4 = vsub.f32 %v8760_v44, %v8816_v53  ;;  %v639_v34 = vsub.f32 %v8768_v50, %v8816_v53 }
 0x15e   :  { %v640_v37 = vsub.f32 %v8783_v60, %v8816_v53  ;;  %v641_v33 = vsub.f32 %v8790_v1, %v8816_v53  ;;  %v642_v35 = vsub.f32 %v8780_v58, %v8816_v53  ;;  %v643_v46 = vsub.f32 %v8788_v0, %v8816_v53  ;;  %v8856_v58 = vld [vmem:[%s11256_s4] ss:$0 sm:$0xff] }
 0x15f   :  { %v631_v5 = vmax.f32 %v630_v63, 0.0  ;;  %v644_v51 = vsub.f32 %v8803_v18, %v8816_v53  ;;  %v646_v44 = vsub.f32 %v8800_v16, %v8816_v53  ;;  %v647_v50 = vsub.f32 %v8808_v22, %v8816_v53 }
 0x161   :  { %v648_v60 = vadd.f32 1e-05, %v631_v5 }
 0x163   :  { %8215 = vrsqrt.f32 %v648_v60 }
 0x16d   :  { %v8851_v7 = vpop.eup %8215 }
 0x16e   :  { %v663_v1 = vmul.f32 %v8851_v7, %v645_v27  ;;  %v650_v9 = vmul.f32 %v8851_v7, %v632_v56  ;;  %v651_v13 = vmul.f32 %v8851_v7, %v633_v57  ;;  %v652_v14 = vmul.f32 %v8851_v7, %v634_v59 }
 0x16f   :  { %v653_v17 = vmul.f32 %v8851_v7, %v635_v61  ;;  %v654_v19 = vmul.f32 %v8851_v7, %v636_v62  ;;  %v655_v20 = vmul.f32 %v8851_v7, %v637_v3  ;;  %v656_v21 = vmul.f32 %v8851_v7, %v638_v4 }
 0x170   :  { %v683_v23 = vmul.f32 %v8856_v58, %v663_v1  ;;  %v670_v24 = vmul.f32 %v8856_v58, %v650_v9  ;;  %v671_v25 = vmul.f32 %v8856_v58, %v651_v13  ;;  %v672_v29 = vmul.f32 %v8856_v58, %v652_v14 }
 0x171   :  { %v673_v30 = vmul.f32 %v8856_v58, %v653_v17  ;;  %v674_v12 = vmul.f32 %v8856_v58, %v654_v19  ;;  %v675_v26 = vmul.f32 %v8856_v58, %v655_v20  ;;  %v657_v31 = vmul.f32 %v8851_v7, %v639_v34 }
 0x172   :  { %v690_v32 = vadd.f32 %v8865_v15, %v670_v24  ;;  %v691_v38 = vadd.f32 %v8865_v15, %v671_v25  ;;  %v692_v36 = vadd.f32 %v8865_v15, %v672_v29  ;;  %v676_v39 = vmul.f32 %v8856_v58, %v656_v21 }
 0x173   :  { %v693_v11 = vadd.f32 %v8865_v15, %v673_v30  ;;  %v694_v40 = vadd.f32 %v8865_v15, %v674_v12  ;;  %v695_v41 = vadd.f32 %v8865_v15, %v675_v26  ;;  %v677_v42 = vmul.f32 %v8856_v58, %v657_v31 }
 0x174   :  { %vm706_vm0 = vcmp.ge.f32.partialorder %v690_v32, 0.0  ;;  %vm707_vm1 = vcmp.ge.f32.partialorder %v691_v38, 0.0  ;;  %v722_v43 = vmul.f32 0.01, %v690_v32  ;;  %v723_v45 = vmul.f32 0.01, %v691_v38 }
 0x175   :  { %vm708_vm2 = vcmp.ge.f32.partialorder %v692_v36, 0.0  ;;  %vm709_vm3 = vcmp.ge.f32.partialorder %v693_v11, 0.0  ;;  %v724_v47 = vmul.f32 0.01, %v692_v36  ;;  %v725_v48 = vmul.f32 0.01, %v693_v11 }
 0x176   :  { %v738_v49 = vsel %vm706_vm0, %v690_v32, %v722_v43  ;;  %v739_v52 = vsel %vm707_vm1, %v691_v38, %v723_v45  ;;  %vm710_vm4 = vcmp.ge.f32.partialorder %v694_v40, 0.0  ;;  %vm711_vm5 = vcmp.ge.f32.partialorder %v695_v41, 0.0 }
 0x177   :  { %v754_v28 = vpack.c.bf16 %v739_v52, %v738_v49  ;;  %v740_v54 = vsel %vm708_vm2, %v692_v36, %v724_v47  ;;  %v741_v55 = vsel %vm709_vm3, %v693_v11, %v725_v48  ;;  %v726_v27 = vmul.f32 0.01, %v694_v40 }
 0x178   :  { %v755_v56 = vpack.c.bf16 %v741_v55, %v740_v54  ;;  %v727_v57 = vmul.f32 0.01, %v695_v41  ;;  %v696_v59 = vadd.f32 %v8865_v15, %v676_v39  ;;  %v697_v61 = vadd.f32 %v8865_v15, %v677_v42 }
 0x179   :  { %7916 = vmatprep.mubr.bf16.mxu1 %v754_v28  ;;  %v742_v62 = vsel %vm710_vm4, %v694_v40, %v726_v27  ;;  %v658_v63 = vmul.f32 %v8851_v7, %v640_v37  ;;  %v659_v3 = vmul.f32 %v8851_v7, %v641_v33  ;;  %v660_v4 = vmul.f32 %v8851_v7, %v642_v35 }
 0x17a   :  { %7917 = vmatmul.mubr.bf16.vlgmr.msra.gmra.mrb[0].mxu1 %v755_v56  ;;  %v743_v34 = vsel %vm711_vm5, %v695_v41, %v727_v57  ;;  %vm712_vm6 = vcmp.ge.f32.partialorder %v696_v59, 0.0  ;;  %vm713_vm7 = vcmp.ge.f32.partialorder %v697_v61, 0.0  ;;  %v728_v5 = vmul.f32 0.01, %v696_v59 }
 0x17b   :  { %v756_v60 = vpack.c.bf16 %v743_v34, %v742_v62  ;;  %v729_v1 = vmul.f32 0.01, %v697_v61  ;;  %v678_v9 = vmul.f32 %v8856_v58, %v658_v63  ;;  %v679_v13 = vmul.f32 %v8856_v58, %v659_v3 }
 0x17c   :  { %v744_v14 = vsel %vm712_vm6, %v696_v59, %v728_v5  ;;  %v661_v37 = vmul.f32 %v8851_v7, %v643_v46  ;;  %v680_v33 = vmul.f32 %v8856_v58, %v660_v4  ;;  %v662_v35 = vmul.f32 %v8851_v7, %v644_v51 }
 0x17d   :  { %7920 = vmatprep.mubr.bf16.mxu1 %v756_v60  ;;  %v745_v17 = vsel %vm713_vm7, %v697_v61, %v729_v1  ;;  %v698_v19 = vadd.f32 %v8865_v15, %v678_v9  ;;  %v699_v20 = vadd.f32 %v8865_v15, %v679_v13  ;;  %v703_v21 = vadd.f32 %v8865_v15, %v683_v23 }
 0x17e   :  { %v757_v24 = vpack.c.bf16 %v745_v17, %v744_v14  ;;  %v681_v0 = vmul.f32 %v8856_v58, %v661_v37  ;;  %v700_v46 = vadd.f32 %v8865_v15, %v680_v33  ;;  %v682_v25 = vmul.f32 %v8856_v58, %v662_v35 }
 0x17f   :  { %vm714_vm8 = vcmp.ge.f32.partialorder %v698_v19, 0.0  ;;  %vm715_vm9 = vcmp.ge.f32.partialorder %v699_v20, 0.0  ;;  %v730_v18 = vmul.f32 0.01, %v698_v19  ;;  %v731_v29 = vmul.f32 0.01, %v699_v20 }
 0x180   :  { %v701_v51 = vadd.f32 %v8865_v15, %v681_v0  ;;  %vm716_vm10 = vcmp.ge.f32.partialorder %v700_v46, 0.0  ;;  %v732_v30 = vmul.f32 0.01, %v700_v46  ;;  %v702_v12 = vadd.f32 %v8865_v15, %v682_v25 }
 0x181   :  { %v746_v26 = vsel %vm714_vm8, %v698_v19, %v730_v18  ;;  %v747_v31 = vsel %vm715_vm9, %v699_v20, %v731_v29  ;;  %vm719_vm11 = vcmp.ge.f32.partialorder %v703_v21, 0.0  ;;  %v735_v23 = vmul.f32 0.01, %v703_v21 }
 0x182   :  { %7921 = vmatmul.mubr.bf16.gmra.mrb[4].mxu1 %v757_v24  ;;  %v758_v32 = vpack.c.bf16 %v747_v31, %v746_v26  ;;  %vm717_vm12 = vcmp.ge.f32.partialorder %v701_v51, 0.0  ;;  %v733_v38 = vmul.f32 0.01, %v701_v51  ;;  %v748_v36 = vsel %vm716_vm10, %v700_v46, %v732_v30 }
 0x183   :  { %vm718_vm13 = vcmp.ge.f32.partialorder %v702_v12, 0.0  ;;  %v734_v39 = vmul.f32 0.01, %v702_v12  ;;  %v751_v11 = vsel %vm719_vm11, %v703_v21, %v735_v23  ;;  %v664_v40 = vmul.f32 %v8851_v7, %v646_v44 }
 0x184   :  { %7924 = vmatprep.mubr.bf16.mxu1 %v758_v32  ;;  %v749_v41 = vsel %vm717_vm12, %v701_v51, %v733_v38  ;;  %v665_v42 = vmul.f32 %v8851_v7, %v647_v50 }
 0x185   :  { %v759_v43 = vpack.c.bf16 %v749_v41, %v748_v36  ;;  %v750_v45 = vsel %vm718_vm13, %v702_v12, %v734_v39  ;;  %v684_v47 = vmul.f32 %v8856_v58, %v664_v40 }
 0x186   :  { %v760_v48 = vpack.c.bf16 %v751_v11, %v750_v45  ;;  %v685_v49 = vmul.f32 %v8856_v58, %v665_v42 }
 0x187   :  { %v704_v52 = vadd.f32 %v8865_v15, %v684_v47 }
 0x188   :  { %v705_v16 = vadd.f32 %v8865_v15, %v685_v49 }
 0x189   :  { %vm720_vm14 = vcmp.ge.f32.partialorder %v704_v52, 0.0  ;;  %v736_v44 = vmul.f32 0.01, %v704_v52 }
 0x18a   :  { %7925 = vmatmul.mubr.bf16.gmra.mrb[8].mxu1 %v759_v43  ;;  %vm721_vm15 = vcmp.ge.f32.partialorder %v705_v16, 0.0  ;;  %v737_v28 = vmul.f32 0.01, %v705_v16 }
 0x18b   :  { %7928 = vmatprep.mubr.bf16.mxu1 %v760_v48  ;;  %v752_v22 = vsel %vm720_vm14, %v704_v52, %v736_v44 }
 0x18c   :  { %v753_v53 = vsel %vm721_vm15, %v705_v16, %v737_v28 }
 0x18d   :  { %v761_v50 = vpack.c.bf16 %v753_v53, %v752_v22 }
 0x192   :  { %7929 = vmatmul.mubr.bf16.gmra.mrb[12].mxu1 %v761_v50 }
 0x24d   :  { %v8923_v7 = vpop.f32.mrb[0].mxu1 }
 0x24e   :  { %v8925_v54 = vpop.f32.mrb[1].mxu1  ;;  %v948_v57 = vmul.f32 %v8923_v7, %v8923_v7 }
 0x24f   :  { %v8927_v55 = vpop.f32.mrb[2].mxu1  ;;  %v946_v15 = vmul.f32 %v8925_v54, %v8925_v54 }
 0x250   :  { %v8929_v58 = vpop.f32.mrb[3].mxu1  ;;  %v949_v62 = vmul.f32 %v8927_v55, %v8927_v55 }
 0x251   :  { %v925_v27 = vadd.f32 %v8929_v58, %v8925_v54  ;;  %v947_v56 = vmul.f32 %v8929_v58, %v8929_v58 }
 0x253   :  { %v926_v59 = vadd.f32 %v8923_v7, %v925_v27  ;;  %v962_v61 = vadd.f32 %v947_v56, %v946_v15 }
 0x255   :  { %v963_v63 = vadd.f32 %v962_v61, %v948_v57  ;;  %v8942_v3 = vpop.f32.mrb[4].mxu1  ;;  %v927_v4 = vadd.f32 %v8927_v55, %v926_v59 }
 0x256   :  { %v8945_v34 = vpop.f32.mrb[5].mxu1  ;;  %v952_v35 = vmul.f32 %v8942_v3, %v8942_v3 }
 0x257   :  { %v928_v5 = vadd.f32 %v927_v4, %v8945_v34  ;;  %v950_v60 = vmul.f32 %v8945_v34, %v8945_v34  ;;  %v964_v1 = vadd.f32 %v963_v63, %v949_v62  ;;  %v8950_v9 = vpop.f32.mrb[6].mxu1 }
 0x258   :  { %v8952_v13 = vpop.f32.mrb[7].mxu1  ;;  %v953_v20 = vmul.f32 %v8950_v9, %v8950_v9 }
 0x259   :  { %v965_v14 = vadd.f32 %v964_v1, %v950_v60  ;;  %v929_v37 = vadd.f32 %v928_v5, %v8952_v13  ;;  %v951_v33 = vmul.f32 %v8952_v13, %v8952_v13 }
 0x25b   :  { %v930_v17 = vadd.f32 %v8942_v3, %v929_v37  ;;  %v966_v19 = vadd.f32 %v965_v14, %v951_v33 }
 0x25d   :  { %v967_v21 = vadd.f32 %v966_v19, %v952_v35  ;;  %v8962_v24 = vpop.f32.mrb[8].mxu1  ;;  %v931_v0 = vadd.f32 %v8950_v9, %v930_v17 }
 0x25e   :  { %v8965_v46 = vpop.f32.mrb[9].mxu1  ;;  %v956_v23 = vmul.f32 %v8962_v24, %v8962_v24 }
 0x25f   :  { %v932_v25 = vadd.f32 %v931_v0, %v8965_v46  ;;  %v954_v18 = vmul.f32 %v8965_v46, %v8965_v46  ;;  %v968_v29 = vadd.f32 %v967_v21, %v953_v20  ;;  %v8970_v51 = vpop.f32.mrb[10].mxu1 }
 0x260   :  { %v8972_v30 = vpop.f32.mrb[11].mxu1  ;;  %v957_v36 = vmul.f32 %v8970_v51, %v8970_v51 }
 0x261   :  { %v969_v12 = vadd.f32 %v968_v29, %v954_v18  ;;  %v933_v26 = vadd.f32 %v932_v25, %v8972_v30  ;;  %v955_v31 = vmul.f32 %v8972_v30, %v8972_v30 }
 0x263   :  { %v934_v32 = vadd.f32 %v8962_v24, %v933_v26  ;;  %v970_v38 = vadd.f32 %v969_v12, %v955_v31 }
 0x265   :  { %v971_v39 = vadd.f32 %v970_v38, %v956_v23  ;;  %v8982_v11 = vpop.f32.mrb[12].mxu1  ;;  %v935_v40 = vadd.f32 %v8970_v51, %v934_v32 }
 0x266   :  { %v8985_v41 = vpop.f32.mrb[13].mxu1  ;;  %v960_v44 = vmul.f32 %v8982_v11, %v8982_v11 }
 0x267   :  { %v936_v42 = vadd.f32 %v935_v40, %v8985_v41  ;;  %v958_v43 = vmul.f32 %v8985_v41, %v8985_v41  ;;  %v972_v45 = vadd.f32 %v971_v39, %v957_v36  ;;  %v8990_v47 = vpop.f32.mrb[14].mxu1  ;;  %v9047_v39 = vld [vmem:[%s11256_s4 + $0x3] ss:$0 sm:$0xff] }
 0x268   :  { %v911_v48 = vpop.f32.mrb[15].mxu1  ;;  %v961_v53 = vmul.f32 %v8990_v47, %v8990_v47 }
 0x269   :  { %v973_v49 = vadd.f32 %v972_v45, %v958_v43  ;;  %v937_v52 = vadd.f32 %v936_v42, %v911_v48  ;;  %v959_v16 = vmul.f32 %v911_v48, %v911_v48 }
 0x26b   :  { %v938_v28 = vadd.f32 %v8982_v11, %v937_v52  ;;  %v974_v22 = vadd.f32 %v973_v49, %v959_v16 }
 0x26d   :  { %v939_v50 = vadd.f32 %v8990_v47, %v938_v28  ;;  %v975_v15 = vadd.f32 %v974_v22, %v960_v44 }
 0x26f   :  { %v940_v27 = vrot.slane %v939_v50, 4  ;;  %v976_v56 = vadd.f32 %v975_v15, %v961_v53 }
 0x271   :  { %v941_v57 = vadd.f32 %v940_v27, %v939_v50  ;;  %v977_v59 = vrot.slane %v976_v56, 4 }
 0x273   :  { %v942_v61 = vrot.slane %v941_v57, 2  ;;  %v978_v62 = vadd.f32 %v977_v59, %v976_v56  ;;  %v9067_v56 = vld [vmem:[%s11256_s4 + $0x4] ss:$0 sm:$0xff] }
 0x275   :  { %v943_v63 = vadd.f32 %v942_v61, %v941_v57  ;;  %v979_v4 = vrot.slane %v978_v62, 2 }
 0x277   :  { %v944_v5 = vrot.slane %v943_v63, 1  ;;  %v980_v60 = vadd.f32 %v979_v4, %v978_v62 }
 0x279   :  { %v945_v1 = vadd.f32 %v944_v5, %v943_v63  ;;  %v981_v14 = vrot.slane %v980_v60, 1 }
 0x27b   :  { %v982_v37 = vadd.f32 %v981_v14, %v980_v60  ;;  %v8998_v33 = vmul.f32 0.0078125, %v945_v1 }
 0x27d   :  { %v984_v35 = vmul.f32 0.0078125, %v982_v37  ;;  %v985_v17 = vmul.f32 %v8998_v33, %v8998_v33  ;;  %v1001_v19 = vsub.f32 %v911_v48, %v8998_v33  ;;  %v990_v20 = vsub.f32 %v8923_v7, %v8998_v33 }
 0x27e   :  { %v988_v21 = vsub.f32 %v8925_v54, %v8998_v33  ;;  %v991_v0 = vsub.f32 %v8927_v55, %v8998_v33  ;;  %v989_v25 = vsub.f32 %v8929_v58, %v8998_v33  ;;  %v993_v18 = vsub.f32 %v8952_v13, %v8998_v33 }
 0x27f   :  { %v986_v29 = vsub.f32 %v984_v35, %v985_v17  ;;  %v992_v12 = vsub.f32 %v8945_v34, %v8998_v33  ;;  %v995_v26 = vsub.f32 %v8950_v9, %v8998_v33  ;;  %v994_v7 = vsub.f32 %v8942_v3, %v8998_v33 }
 0x280   :  { %v997_v54 = vsub.f32 %v8972_v30, %v8998_v33  ;;  %v996_v55 = vsub.f32 %v8965_v46, %v8998_v33  ;;  %v999_v58 = vsub.f32 %v8970_v51, %v8998_v33  ;;  %v998_v13 = vsub.f32 %v8962_v24, %v8998_v33  ;;  %v9038_v46 = vld [vmem:[%s11256_s4 + $0x2] ss:$0 sm:$0xff] }
 0x281   :  { %v987_v31 = vmax.f32 %v986_v29, 0.0  ;;  %v1000_v34 = vsub.f32 %v8985_v41, %v8998_v33  ;;  %v1003_v9 = vsub.f32 %v8990_v47, %v8998_v33  ;;  %v1002_v3 = vsub.f32 %v8982_v11, %v8998_v33 }
 0x283   :  { %v1004_v30 = vadd.f32 1e-05, %v987_v31 }
 0x285   :  { %8217 = vrsqrt.f32 %v1004_v30 }
 0x28f   :  { %v9033_v23 = vpop.eup %8217 }
 0x290   :  { %v1019_v51 = vmul.f32 %v9033_v23, %v1001_v19  ;;  %v1008_v32 = vmul.f32 %v9033_v23, %v990_v20  ;;  %v1006_v38 = vmul.f32 %v9033_v23, %v988_v21  ;;  %v1009_v36 = vmul.f32 %v9033_v23, %v991_v0 }
 0x291   :  { %v1007_v40 = vmul.f32 %v9033_v23, %v989_v25  ;;  %v1011_v42 = vmul.f32 %v9033_v23, %v993_v18  ;;  %v1010_v43 = vmul.f32 %v9033_v23, %v992_v12  ;;  %v1013_v45 = vmul.f32 %v9033_v23, %v995_v26 }
 0x292   :  { %v1028_v48 = vmul.f32 %v9038_v46, %v1008_v32  ;;  %v1026_v49 = vmul.f32 %v9038_v46, %v1006_v38  ;;  %v1029_v52 = vmul.f32 %v9038_v46, %v1009_v36  ;;  %v1012_v27 = vmul.f32 %v9033_v23, %v994_v7 }
 0x293   :  { %v1027_v16 = vmul.f32 %v9038_v46, %v1007_v40  ;;  %v1031_v44 = vmul.f32 %v9038_v46, %v1011_v42  ;;  %v1030_v28 = vmul.f32 %v9038_v46, %v1010_v43  ;;  %v1033_v22 = vmul.f32 %v9038_v46, %v1013_v45 }
 0x294   :  { %v1048_v53 = vadd.f32 %v9047_v39, %v1028_v48  ;;  %v1046_v50 = vadd.f32 %v9047_v39, %v1026_v49  ;;  %v1049_v15 = vadd.f32 %v9047_v39, %v1029_v52  ;;  %v1039_v19 = vmul.f32 %v9038_v46, %v1019_v51 }
 0x295   :  { %v1047_v57 = vadd.f32 %v9047_v39, %v1027_v16  ;;  %v1051_v59 = vadd.f32 %v9047_v39, %v1031_v44  ;;  %v1050_v61 = vadd.f32 %v9047_v39, %v1030_v28  ;;  %v1053_v62 = vadd.f32 %v9047_v39, %v1033_v22 }
 0x296   :  { %vm1064_vm0 = vcmp.ge.f32.partialorder %v1048_v53, 0.0  ;;  %v1080_v63 = vmul.f32 0.01, %v1048_v53  ;;  %vm1062_vm1 = vcmp.ge.f32.partialorder %v1046_v50, 0.0  ;;  %v1078_v4 = vmul.f32 0.01, %v1046_v50 }
 0x297   :  { %vm1065_vm2 = vcmp.ge.f32.partialorder %v1049_v15, 0.0  ;;  %v1081_v5 = vmul.f32 0.01, %v1049_v15  ;;  %vm1063_vm3 = vcmp.ge.f32.partialorder %v1047_v57, 0.0  ;;  %v1079_v60 = vmul.f32 0.01, %v1047_v57 }
 0x298   :  { %v1096_v1 = vsel %vm1064_vm0, %v1048_v53, %v1080_v63  ;;  %v1094_v14 = vsel %vm1062_vm1, %v1046_v50, %v1078_v4  ;;  %vm1067_vm4 = vcmp.ge.f32.partialorder %v1051_v59, 0.0  ;;  %v1083_v37 = vmul.f32 0.01, %v1051_v59 }
 0x299   :  { %v1117_v35 = vmul.f32 %v9067_v56, %v1096_v1  ;;  %v1115_v17 = vmul.f32 %v9067_v56, %v1094_v14  ;;  %v1097_v20 = vsel %vm1065_vm2, %v1049_v15, %v1081_v5  ;;  %v1095_v21 = vsel %vm1063_vm3, %v1047_v57, %v1079_v60 }
 0x29a   :  { %v1099_v0 = vsel %vm1067_vm4, %v1051_v59, %v1083_v37  ;;  %vm1066_vm5 = vcmp.ge.f32.partialorder %v1050_v61, 0.0  ;;  %v1082_v25 = vmul.f32 0.01, %v1050_v61  ;;  %v1085_v18 = vmul.f32 0.01, %v1053_v62 }
 0x29b   :  { %1135 = vadd.xlane.f32.xlu1 %v1117_v35  ;;  %1131 = vadd.xlane.f32.xlu0 %v1115_v17  ;;  %v1032_v29 = vmul.f32 %v9038_v46, %v1012_v27  ;;  %v1015_v12 = vmul.f32 %v9033_v23, %v997_v54  ;;  %v1014_v26 = vmul.f32 %v9033_v23, %v996_v55  ;;  %vm1069_vm6 = vcmp.ge.f32.partialorder %v1053_v62, 0.0 }
 0x29c   :  { %v1017_v7 = vmul.f32 %v9033_v23, %v999_v58  ;;  %v1118_v31 = vmul.f32 %v9067_v56, %v1097_v20  ;;  %v1116_v30 = vmul.f32 %v9067_v56, %v1095_v21  ;;  %v1016_v51 = vmul.f32 %v9033_v23, %v998_v13 }
 0x29d   :  { %v1120_v32 = vmul.f32 %v9067_v56, %v1099_v0  ;;  %v1098_v38 = vsel %vm1066_vm5, %v1050_v61, %v1082_v25  ;;  %v1052_v36 = vadd.f32 %v9047_v39, %v1032_v29  ;;  %v1035_v54 = vmul.f32 %v9038_v46, %v1015_v12 }
 0x29e   :  { %v1034_v55 = vmul.f32 %v9038_v46, %v1014_v26  ;;  %v1037_v58 = vmul.f32 %v9038_v46, %v1017_v7  ;;  %v1036_v40 = vmul.f32 %v9038_v46, %v1016_v51  ;;  %v1101_v42 = vsel %vm1069_vm6, %v1053_v62, %v1085_v18 }
 0x29f   :  { %1137 = vadd.xlane.f32.xlu1 %v1118_v31  ;;  %1133 = vadd.xlane.f32.xlu0 %v1116_v30  ;;  %vm1068_vm7 = vcmp.ge.f32.partialorder %v1052_v36, 0.0  ;;  %v1084_v24 = vmul.f32 0.01, %v1052_v36  ;;  %v1055_v13 = vadd.f32 %v9047_v39, %v1035_v54  ;;  %v1119_v43 = vmul.f32 %v9067_v56, %v1098_v38 }
 0x2a0   :  { %v1054_v45 = vadd.f32 %v9047_v39, %v1034_v55  ;;  %v1057_v48 = vadd.f32 %v9047_v39, %v1037_v58  ;;  %v1018_v49 = vmul.f32 %v9033_v23, %v1000_v34  ;;  %v1056_v44 = vadd.f32 %v9047_v39, %v1036_v40 }
 0x2a1   :  { %v1100_v52 = vsel %vm1068_vm7, %v1052_v36, %v1084_v24  ;;  %v1087_v16 = vmul.f32 0.01, %v1055_v13  ;;  %vm1071_vm8 = vcmp.ge.f32.partialorder %v1055_v13, 0.0  ;;  %v1122_v22 = vmul.f32 %v9067_v56, %v1101_v42 }
 0x2a2   :  { %vm1070_vm9 = vcmp.ge.f32.partialorder %v1054_v45, 0.0  ;;  %v1086_v28 = vmul.f32 0.01, %v1054_v45  ;;  %v1059_v53 = vadd.f32 %v9047_v39, %v1039_v19  ;;  %v1121_v50 = vmul.f32 %v9067_v56, %v1100_v52 }
 0x2a3   :  { %1141 = vadd.xlane.f32.xlu1 %v1120_v32  ;;  %1139 = vadd.xlane.f32.xlu0 %v1119_v43  ;;  %vm1073_vm10 = vcmp.ge.f32.partialorder %v1057_v48, 0.0  ;;  %v1089_v15 = vmul.f32 0.01, %v1057_v48  ;;  %v1038_v41 = vmul.f32 %v9038_v46, %v1018_v49  ;;  %v1103_v34 = vsel %vm1071_vm8, %v1055_v13, %v1087_v16 }
 0x2a4   :  { %v1102_v27 = vsel %vm1070_vm9, %v1054_v45, %v1086_v28  ;;  %v1088_v57 = vmul.f32 0.01, %v1056_v44  ;;  %v1021_v59 = vmul.f32 %v9033_v23, %v1003_v9  ;;  %vm1072_vm11 = vcmp.ge.f32.partialorder %v1056_v44, 0.0 }
 0x2a5   :  { %v1058_v61 = vadd.f32 %v9047_v39, %v1038_v41  ;;  %v1020_v63 = vmul.f32 %v9033_v23, %v1002_v3  ;;  %v1124_v4 = vmul.f32 %v9067_v56, %v1103_v34  ;;  %v1123_v5 = vmul.f32 %v9067_v56, %v1102_v27 }
 0x2a6   :  { %v1041_v62 = vmul.f32 %v9038_v46, %v1021_v59  ;;  %v1105_v60 = vsel %vm1073_vm10, %v1057_v48, %v1089_v15  ;;  %v1091_v47 = vmul.f32 0.01, %v1059_v53  ;;  %v1104_v1 = vsel %vm1072_vm11, %v1056_v44, %v1088_v57 }
 0x2a7   :  { %1145 = vadd.xlane.f32.xlu1 %v1122_v22  ;;  %1143 = vadd.xlane.f32.xlu0 %v1121_v50  ;;  %v1090_v9 = vmul.f32 0.01, %v1058_v61  ;;  %v1040_v37 = vmul.f32 %v9038_v46, %v1020_v63  ;;  %vm1075_vm12 = vcmp.ge.f32.partialorder %v1059_v53, 0.0  ;;  %vm1074_vm13 = vcmp.ge.f32.partialorder %v1058_v61, 0.0 }
 0x2a8   :  { %v1061_v14 = vadd.f32 %v9047_v39, %v1041_v62  ;;  %v1126_v33 = vmul.f32 %v9067_v56, %v1105_v60  ;;  %v1125_v3 = vmul.f32 %v9067_v56, %v1104_v1  ;;  %v1107_v23 = vsel %vm1075_vm12, %v1059_v53, %v1091_v47 }
 0x2a9   :  { %v1060_v11 = vadd.f32 %v9047_v39, %v1040_v37  ;;  %v1106_v35 = vsel %vm1074_vm13, %v1058_v61, %v1090_v9  ;;  %v1128_v46 = vmul.f32 %v9067_v56, %v1107_v23  ;;  %v1180_v18 = vand.u32 127, %v73_v2 }
 0x2aa   :  { %v1093_v17 = vmul.f32 0.01, %v1061_v14  ;;  %vm1077_vm14 = vcmp.ge.f32.partialorder %v1061_v14, 0.0  ;;  %v1127_v20 = vmul.f32 %v9067_v56, %v1106_v35  ;;  %vm1245_vm0 = vcmask 1041409  }
 0x2ab   :  { %1149 = vadd.xlane.f32.xlu1 %v1124_v4  ;;  %1147 = vadd.xlane.f32.xlu0 %v1123_v5  ;;  %v1092_v19 = vmul.f32 0.01, %v1060_v11  ;;  %vm1076_vm15 = vcmp.ge.f32.partialorder %v1060_v11, 0.0  ;;  %v9132_v26 = vsub.s32 %v1180_v18, %v8648_v6  ;;  %vm1247_vm1 = vcmask 1042434  }
 0x2ac   :  { %v1109_v21 = vsel %vm1077_vm14, %v1061_v14, %v1093_v17  ;;  %vm1249_vm2 = vcmask 1043459   ;;  %vm1251_vm3 = vcmask 1044484   ;;  %vm1253_vm4 = vcmask 1045509  }
 0x2ad   :  { %v1108_v0 = vsel %vm1076_vm15, %v1060_v11, %v1092_v19  ;;  %v1130_v39 = vmul.f32 %v9067_v56, %v1109_v21  ;;  %vm1255_vm5 = vcmask 1046534   ;;  %vm1257_vm6 = vcmask 1047559  }
 0x2ae   :  { %v1129_v25 = vmul.f32 %v9067_v56, %v1108_v0  ;;  %vm1268_vm7 = vcmask 64512   ;;  %v9213_v23 = vsub.s32 1, %v8648_v6  ;;  %v9216_v35 = vsub.s32 2, %v8648_v6 }
 0x2af   :  { %1153 = vadd.xlane.f32.xlu1 %v1126_v33  ;;  %1151 = vadd.xlane.f32.xlu0 %v1125_v3  ;;  %v8553_v3 = vmov 0   ;;  %v9219_v17 = vsub.s32 3, %v8648_v6  ;;  %v9225_v0 = vsub.s32 4, %v8648_v6  ;;  %vm1768_vm8 = vcmask 1043456  }
 0x2b0   :  { %8094 = vset.pattern.permute.xlu1 %v8553_v3  ;;  %8093 = vset.pattern.permute.xlu0 %v8553_v3  ;;  %vm8555_vm9 = vmmov 0  }
 0x2b3   :  { %1157 = vadd.xlane.f32.xlu1 %v1128_v46  ;;  %1155 = vadd.xlane.f32.xlu0 %v1127_v20 }
 0x2b7   :  { %1161 = vadd.xlane.f32.xlu1 %v1130_v39  ;;  %1159 = vadd.xlane.f32.xlu0 %v1129_v25 }
 0x328   :  { %v9127_v29 = vpop.xlane.xlu1 %1135  ;;  %v9129_v12 = vpop.xlane.xlu0 %1131 }
 0x329   :  { %v1184_v30 = vrot.slane %v9129_v12, %v9132_v26  ;;  %v1192_v2 = vrot.slane %v9127_v29, %v9132_v26 }
 0x32c   :  { %v9134_v7 = vpop.xlane.xlu1 %1137  ;;  %v9136_v31 = vpop.xlane.xlu0 %1133 }
 0x32d   :  { %v1188_v56 = vrot.slane %v9136_v31, %v9132_v26  ;;  %v1196_v51 = vrot.slane %v9134_v7, %v9132_v26 }
 0x32f   :  { %v1246_v32 = vsel %vm1245_vm0, %v1188_v56, %v1184_v30 }
 0x330   :  { %v1248_v38 = vsel %vm1247_vm1, %v1192_v2, %v1246_v32  ;;  %v9148_v36 = vpop.xlane.xlu1 %1141  ;;  %v9150_v54 = vpop.xlane.xlu0 %1139 }
 0x331   :  { %v1250_v55 = vsel %vm1249_vm2, %v1196_v51, %v1248_v38  ;;  %v1200_v58 = vrot.slane %v9150_v54, %v9132_v26  ;;  %v1204_v40 = vrot.slane %v9148_v36, %v9132_v26  ;;  %v9232_v51 = vsub.s32 5, %v8648_v6 }
 0x333   :  { %v1252_v42 = vsel %vm1251_vm3, %v1200_v58, %v1250_v55  ;;  %v9237_v58 = vsub.s32 6, %v8648_v6 }
 0x334   :  { %v9158_v24 = vpop.xlane.xlu1 %1145  ;;  %v9160_v13 = vpop.xlane.xlu0 %1143  ;;  %v1254_v48 = vsel %vm1253_vm4, %v1204_v40, %v1252_v42  ;;  %v9242_v40 = vsub.s32 7, %v8648_v6 }
 0x335   :  { %v1212_v43 = vrot.slane %v9158_v24, %v9132_v26  ;;  %v1208_v45 = vrot.slane %v9160_v13, %v9132_v26 }
 0x337   :  { %v1256_v49 = vsel %vm1255_vm5, %v1208_v45, %v1254_v48 }
 0x338   :  { %v9168_v52 = vpop.xlane.xlu1 %1149  ;;  %v9170_v16 = vpop.xlane.xlu0 %1147  ;;  %v1258_v44 = vsel %vm1257_vm6, %v1212_v43, %v1256_v49 }
 0x339   :  { %v1269_v28 = vsel %vm1268_vm7, %v1258_v44, -inf  ;;  %v1220_v22 = vrot.slane %v9168_v52, %v9132_v26  ;;  %v1216_v53 = vrot.slane %v9170_v16, %v9132_v26 }
 0x33a   :  { %1270 = vmax.xlane.f32.xlu0 %v1269_v28 }
 0x33b   :  { %v1259_v34 = vsel %vm1245_vm0, %v1220_v22, %v1216_v53 }
 0x33c   :  { %v9178_v50 = vpop.xlane.xlu1 %1153  ;;  %v9180_v15 = vpop.xlane.xlu0 %1151 }
 0x33d   :  { %v1224_v41 = vrot.slane %v9180_v15, %v9132_v26  ;;  %v1228_v27 = vrot.slane %v9178_v50, %v9132_v26 }
 0x33f   :  { %v1260_v57 = vsel %vm1247_vm1, %v1224_v41, %v1259_v34 }
 0x340   :  { %v9188_v59 = vpop.xlane.xlu1 %1157  ;;  %v9190_v61 = vpop.xlane.xlu0 %1155  ;;  %v1261_v4 = vsel %vm1249_vm2, %v1228_v27, %v1260_v57 }
 0x341   :  { %v1232_v62 = vrot.slane %v9190_v61, %v9132_v26  ;;  %v1236_v63 = vrot.slane %v9188_v59, %v9132_v26 }
 0x343   :  { %v1262_v5 = vsel %vm1251_vm3, %v1232_v62, %v1261_v4 }
 0x344   :  { %v9198_v60 = vpop.xlane.xlu1 %1161  ;;  %v9200_v47 = vpop.xlane.xlu0 %1159  ;;  %v1263_v14 = vsel %vm1253_vm4, %v1236_v63, %v1262_v5 }
 0x345   :  { %v1244_v1 = vrot.slane %v9198_v60, %v9132_v26  ;;  %v1240_v9 = vrot.slane %v9200_v47, %v9132_v26 }
 0x347   :  { %v1264_v37 = vsel %vm1255_vm5, %v1240_v9, %v1263_v14 }
 0x348   :  { %v1265_v11 = vsel %vm1257_vm6, %v1244_v1, %v1264_v37 }
 0x349   :  { %v1272_v33 = vsel %vm1268_vm7, %v1265_v11, -inf }
 0x34a   :  { %1273 = vmax.xlane.f32.xlu1 %v1272_v33 }
 0x3c7   :  { %v1271_v19 = vpop.xlane.xlu0 %1270 }
 0x3c8   :  { %v1280_v46 = vrot.slane %v1271_v19, %v8654_v10  ;;  %v1284_v20 = vrot.slane %v1271_v19, %v9213_v23  ;;  %v1288_v21 = vrot.slane %v1271_v19, %v9216_v35  ;;  %v1292_v39 = vrot.slane %v1271_v19, %v9219_v17 }
 0x3c9   :  { %v1296_v32 = vrot.slane %v1271_v19, %v9225_v0  ;;  %v1304_v42 = vrot.slane %v1271_v19, %v9237_v58 }
 0x3ca   :  { %v1358_v25 = vsub.f32 %v9136_v31, %v1284_v20  ;;  %v1357_v18 = vsub.f32 %v9129_v12, %v1280_v46  ;;  %v1359_v30 = vsub.f32 %v9127_v29, %v1288_v21  ;;  %v1360_v55 = vsub.f32 %v9134_v7, %v1292_v39 }
 0x3cb   :  { %v1300_v31 = vrot.slane %v1271_v19, %v9232_v51  ;;  %v1361_v29 = vsub.f32 %v9150_v54, %v1296_v32  ;;  %v1308_v54 = vrot.slane %v1271_v19, %v9242_v40  ;;  %v1363_v22 = vsub.f32 %v9160_v13, %v1304_v42 }
 0x3cc   :  { %v1375_v56 = vmul.f32 1.442695, %v1358_v25  ;;  %v1373_v2 = vmul.f32 1.442695, %v1357_v18  ;;  %v1377_v38 = vmul.f32 1.442695, %v1359_v30 }
 0x3cd   :  { %v1379_v12 = vmul.f32 1.442695, %v1360_v55  ;;  %v1362_v43 = vsub.f32 %v9148_v36, %v1300_v31  ;;  %v1381_v45 = vmul.f32 1.442695, %v1361_v29  ;;  %v1385_v62 = vmul.f32 1.442695, %v1363_v22 }
 0x3ce   :  { %8219 = vpow2.f32 %v1375_v56  ;;  %v1364_v13 = vsub.f32 %v9158_v24, %v1308_v54 }
 0x3cf   :  { %8221 = vpow2.f32 %v1373_v2  ;;  %v1383_v6 = vmul.f32 1.442695, %v1362_v43 }
 0x3d0   :  { %8223 = vpow2.f32 %v1377_v38 }
 0x3d1   :  { %8225 = vpow2.f32 %v1379_v12 }
 0x3d2   :  { %8227 = vpow2.f32 %v1381_v45 }
 0x3d3   :  { %8229 = vpow2.f32 %v1383_v6 }
 0x3d7   :  { %v1274_v7 = vpop.xlane.xlu1 %1273 }
 0x3d8   :  { %v9246_v48 = vpop.eup %8219  ;;  %v1316_v49 = vrot.slane %v1274_v7, %v9213_v23  ;;  %v1324_v44 = vrot.slane %v1274_v7, %v9219_v17  ;;  %v1332_v36 = vrot.slane %v1274_v7, %v9232_v51  ;;  %v1312_v57 = vrot.slane %v1274_v7, %v8654_v10 }
 0x3d9   :  { %v9250_v28 = vpop.eup %8221  ;;  %1425 = vperm.xlu1 %8094, %v9246_v48   ;;  %v1340_v63 = vrot.slane %v1274_v7, %v9242_v40  ;;  %v1320_v9 = vrot.slane %v1274_v7, %v9216_v35  ;;  %v1328_v11 = vrot.slane %v1274_v7, %v9225_v0 }
 0x3da   :  { %1422 = vperm.xlu0 %8093, %v9250_v28   ;;  %v1366_v53 = vsub.f32 %v9168_v52, %v1316_v49  ;;  %v1368_v41 = vsub.f32 %v9178_v50, %v1324_v44  ;;  %v9259_v34 = vpop.eup %8223  ;;  %v1370_v5 = vsub.f32 %v9188_v59, %v1332_v36  ;;  %v1387_v50 = vmul.f32 1.442695, %v1364_v13 }
 0x3db   :  { %v9266_v52 = vpop.eup %8225  ;;  %v1365_v1 = vsub.f32 %v9170_v16, %v1312_v57  ;;  %v1372_v24 = vsub.f32 %v9198_v60, %v1340_v63  ;;  %v1367_v19 = vsub.f32 %v9180_v15, %v1320_v9  ;;  %v1336_v60 = vrot.slane %v1274_v7, %v9237_v58 }
 0x3dc   :  { %v1391_v27 = vmul.f32 1.442695, %v1366_v53  ;;  %v1395_v4 = vmul.f32 1.442695, %v1368_v41  ;;  %v1399_v14 = vmul.f32 1.442695, %v1370_v5  ;;  %v9272_v37 = vpop.eup %8227  ;;  %v1369_v21 = vsub.f32 %v9190_v61, %v1328_v11 }
 0x3dd   :  { %1428 = vperm.xlu1 %8094, %v9259_v34   ;;  %v1389_v59 = vmul.f32 1.442695, %v1365_v1  ;;  %v1403_v33 = vmul.f32 1.442695, %v1372_v24  ;;  %v9277_v46 = vpop.eup %8229  ;;  %v1393_v20 = vmul.f32 1.442695, %v1367_v19  ;;  %v1371_v18 = vsub.f32 %v9200_v47, %v1336_v60 }
 0x3de   :  { %8231 = vpow2.f32 %v1391_v27  ;;  %v1397_v15 = vmul.f32 1.442695, %v1369_v21 }
 0x3df   :  { %8233 = vpow2.f32 %v1385_v62  ;;  %v1401_v61 = vmul.f32 1.442695, %v1371_v18 }
 0x3e0   :  { %8235 = vpow2.f32 %v1395_v4 }
 0x3e1   :  { %1431 = vperm.xlu1 %8094, %v9266_v52   ;;  %8237 = vpow2.f32 %v1387_v50 }
 0x3e2   :  { %8239 = vpow2.f32 %v1399_v14 }
 0x3e3   :  { %8241 = vpow2.f32 %v1389_v59 }
 0x3e4   :  { %8243 = vpow2.f32 %v1403_v33 }
 0x3e5   :  { %1434 = vperm.xlu1 %8094, %v9272_v37   ;;  %8245 = vpow2.f32 %v1393_v20 }
 0x3e6   :  { %8247 = vpow2.f32 %v1397_v15 }
 0x3e7   :  { %8249 = vpow2.f32 %v1401_v61 }
 0x3e8   :  { %v9279_v16 = vpop.eup %8231 }
 0x3e9   :  { %1437 = vperm.xlu1 %8094, %v9277_v46   ;;  %1449 = vperm.xlu0 %8093, %v9279_v16   ;;  %v9285_v39 = vpop.eup %8233 }
 0x3ea   :  { %v9287_v25 = vpop.eup %8235 }
 0x3eb   :  { %v9292_v30 = vpop.eup %8237 }
 0x3ec   :  { %v9294_v56 = vpop.eup %8239 }
 0x3ed   :  { %1440 = vperm.xlu1 %8094, %v9285_v39   ;;  %1455 = vperm.xlu0 %8093, %v9287_v25   ;;  %v9298_v2 = vpop.eup %8241 }
 0x3ee   :  { %v9300_v32 = vpop.eup %8243 }
 0x3ef   :  { %v9304_v47 = vpop.eup %8245 }
 0x3f0   :  { %v9307_v38 = vpop.eup %8247 }
 0x3f1   :  { %1443 = vperm.xlu1 %8094, %v9292_v30   ;;  %1461 = vperm.xlu0 %8093, %v9294_v56   ;;  %v9310_v55 = vpop.eup %8249 }
 0x3f5   :  { %1446 = vperm.xlu1 %8094, %v9298_v2   ;;  %1467 = vperm.xlu0 %8093, %v9300_v32  }
 0x3f9   :  { %1452 = vperm.xlu1 %8094, %v9304_v47  }
 0x3fd   :  { %1458 = vperm.xlu1 %8094, %v9307_v38  }
 0x401   :  { %1464 = vperm.xlu1 %8094, %v9310_v55  }
 0x458   :  { %v1426_v31 = vpop.permute.xlu1 %1425 }
 0x459   :  { %v1423_v43 = vpop.permute.xlu0 %1422  ;;  %v1476_v7 = vrot.slane %v1426_v31, %v9132_v26 }
 0x45a   :  { %v1472_v49 = vrot.slane %v1423_v43, %v9132_v26 }
 0x45c   :  { %v1429_v12 = vpop.permute.xlu1 %1428  ;;  %v1533_v36 = vsel %vm1245_vm0, %v1476_v7, %v1472_v49 }
 0x45d   :  { %v1480_v44 = vrot.slane %v1429_v12, %v9132_v26 }
 0x45f   :  { %v1534_v27 = vsel %vm1247_vm1, %v1480_v44, %v1533_v36  ;;  %v9349_v36 = vld [vmem:[%s11252_s0] sm:$0xf] }
 0x460   :  { %v1432_v29 = vpop.permute.xlu1 %1431 }
 0x461   :  { %v1484_v54 = vrot.slane %v1432_v29, %v9132_v26 }
 0x463   :  { %v1535_v62 = vsel %vm1249_vm2, %v1484_v54, %v1534_v27 }
 0x464   :  { %v1435_v42 = vpop.permute.xlu1 %1434 }
 0x465   :  { %v1488_v6 = vrot.slane %v1435_v42, %v9132_v26 }
 0x467   :  { %v1536_v13 = vsel %vm1251_vm3, %v1488_v6, %v1535_v62 }
 0x468   :  { %v1438_v45 = vpop.permute.xlu1 %1437  ;;  %v1450_v41 = vpop.permute.xlu0 %1449 }
 0x469   :  { %v1492_v53 = vrot.slane %v1438_v45, %v9132_v26  ;;  %v1508_v11 = vrot.slane %v1450_v41, %v9132_v26 }
 0x46b   :  { %v1537_v5 = vsel %vm1253_vm4, %v1492_v53, %v1536_v13  ;;  %v9353_v53 = vsel %vm1768_vm8, %v9349_v36, 0 }
 0x46c   :  { %v1441_v22 = vpop.permute.xlu1 %1440  ;;  %v1456_v1 = vpop.permute.xlu0 %1455 }
 0x46d   :  { %v1496_v57 = vrot.slane %v1441_v22, %v9132_v26  ;;  %v1516_v15 = vrot.slane %v1456_v1, %v9132_v26  ;;  %v8554_v22 = vmov 0.0  }
 0x46e   :  { %7932 = vmatprep.subr.bf16.mxu1 %v8554_v22  ;;  %7944 = vmatprep.subr.bf16.mxu0 %v8554_v22 }
 0x46f   :  { %v1538_v50 = vsel %vm1255_vm5, %v1496_v57, %v1537_v5  ;;  %7933 = vmatpush3.bf16.msra.mxu1 %v9353_v53  ;;  %7934 = vmatprep.mubr.msk.bf16.mxu1 %vm8555_vm9, %v8554_v22 }
 0x470   :  { %v1444_v63 = vpop.permute.xlu1 %1443  ;;  %v1462_v19 = vpop.permute.xlu0 %1461  ;;  %7938 = vmatprep.subr.bf16.mxu1 %v8554_v22  ;;  %7960 = vmatprep.mubr.msk.bf16.mxu0 %vm8555_vm9, %v8554_v22 }
 0x471   :  { %v1500_v4 = vrot.slane %v1444_v63, %v9132_v26  ;;  %v1524_v42 = vrot.slane %v1462_v19, %v9132_v26 }
 0x473   :  { %v1539_v9 = vsel %vm1257_vm6, %v1500_v4, %v1538_v50 }
 0x474   :  { %v1447_v14 = vpop.permute.xlu1 %1446  ;;  %v1549_v24 = vsel %vm1268_vm7, %v1539_v9, 0.0  ;;  %v1468_v12 = vpop.permute.xlu0 %1467 }
 0x475   :  { %1550 = vadd.xlane.f32.xlu1 %v1549_v24  ;;  %v1504_v59 = vrot.slane %v1447_v14, %v9132_v26  ;;  %v1532_v7 = vrot.slane %v1468_v12, %v9132_v26 }
 0x477   :  { %v1540_v20 = vsel %vm1245_vm0, %v1508_v11, %v1504_v59 }
 0x478   :  { %v1453_v33 = vpop.permute.xlu1 %1452 }
 0x479   :  { %v1512_v60 = vrot.slane %v1453_v33, %v9132_v26 }
 0x47b   :  { %v1541_v21 = vsel %vm1247_vm1, %v1512_v60, %v1540_v20 }
 0x47c   :  { %v1459_v18 = vpop.permute.xlu1 %1458  ;;  %v1542_v31 = vsel %vm1249_vm2, %v1516_v15, %v1541_v21 }
 0x47d   :  { %v1520_v61 = vrot.slane %v1459_v18, %v9132_v26 }
 0x47f   :  { %v1543_v29 = vsel %vm1251_vm3, %v1520_v61, %v1542_v31 }
 0x480   :  { %v1465_v43 = vpop.permute.xlu1 %1464  ;;  %v1544_v49 = vsel %vm1253_vm4, %v1524_v42, %v1543_v29 }
 0x481   :  { %v1528_v45 = vrot.slane %v1465_v43, %v9132_v26 }
 0x483   :  { %v1545_v44 = vsel %vm1255_vm5, %v1528_v45, %v1544_v49 }
 0x484   :  { %v1546_v54 = vsel %vm1257_vm6, %v1532_v7, %v1545_v44 }
 0x485   :  { %v1552_v6 = vsel %vm1268_vm7, %v1546_v54, 0.0 }
 0x486   :  { %1553 = vadd.xlane.f32.xlu0 %v1552_v6 }
 0x502   :  { %v1551_v41 = vpop.xlane.xlu1 %1550 }
 0x503   :  { %v1564_v27 = vrot.slane %v1551_v41, %v9213_v23  ;;  %v1560_v57 = vrot.slane %v1551_v41, %v8654_v10  ;;  %v1568_v62 = vrot.slane %v1551_v41, %v9216_v35  ;;  %v1572_v13 = vrot.slane %v1551_v41, %v9219_v17 }
 0x504   :  { %v1576_v63 = vrot.slane %v1551_v41, %v9225_v0  ;;  %v1580_v4 = vrot.slane %v1551_v41, %v9232_v51  ;;  %v1584_v5 = vrot.slane %v1551_v41, %v9237_v58  ;;  %v1588_v50 = vrot.slane %v1551_v41, %v9242_v40 }
 0x505   :  { %8251 = vrcp.f32 %v1564_v27 }
 0x506   :  { %8253 = vrcp.f32 %v1560_v57 }
 0x507   :  { %8255 = vrcp.f32 %v1568_v62 }
 0x508   :  { %8257 = vrcp.f32 %v1572_v13 }
 0x509   :  { %8259 = vrcp.f32 %v1576_v63 }
 0x50a   :  { %8261 = vrcp.f32 %v1580_v4 }
 0x50b   :  { %8263 = vrcp.f32 %v1584_v5 }
 0x50c   :  { %8265 = vrcp.f32 %v1588_v50 }
 0x50f   :  { %v8252_v1 = vpop.eup %8251 }
 0x510   :  { %v8254_v9 = vpop.eup %8253  ;;  %v1640_v14 = vmul.f32 %v8252_v1, %v9246_v48 }
 0x511   :  { %v8256_v24 = vpop.eup %8255  ;;  %v1638_v59 = vmul.f32 %v8254_v9, %v9250_v28 }
 0x512   :  { %v8258_v11 = vpop.eup %8257  ;;  %v1670_v33 = vpack.c.bf16 %v1640_v14, %v1640_v14  ;;  %v1642_v19 = vmul.f32 %v8256_v24, %v9259_v34 }
 0x513   :  { %v8260_v60 = vpop.eup %8259  ;;  %v1554_v20 = vpop.xlane.xlu0 %1553  ;;  %v1669_v21 = vpack.c.bf16 %v1638_v59, %v1638_v59  ;;  %v1644_v15 = vmul.f32 %v8258_v11, %v9266_v52 }
 0x514   :  { %v8262_v18 = vpop.eup %8261  ;;  %v1694_v61 = vunpack.c.l.b16 %v1670_v33  ;;  %v1671_v31 = vpack.c.bf16 %v1642_v19, %v1642_v19  ;;  %v1646_v12 = vmul.f32 %v8260_v60, %v9272_v37  ;;  %v1596_v29 = vrot.slane %v1554_v20, %v9213_v23 }
 0x515   :  { %v8264_v48 = vpop.eup %8263  ;;  %v1693_v42 = vunpack.c.l.b16 %v1669_v21  ;;  %v1672_v43 = vpack.c.bf16 %v1644_v15, %v1644_v15  ;;  %v1648_v28 = vmul.f32 %v8262_v18, %v9277_v46  ;;  %v1592_v45 = vrot.slane %v1554_v20, %v8654_v10 }
 0x516   :  { %v8266_v34 = vpop.eup %8265  ;;  %1705 = vperm.xlu1 %8094, %v1694_v61   ;;  %8267 = vrcp.f32 %v1596_v29  ;;  %v1695_v7 = vunpack.c.l.b16 %v1671_v31  ;;  %v1673_v52 = vpack.c.bf16 %v1646_v12, %v1646_v12  ;;  %v1650_v44 = vmul.f32 %v8264_v48, %v9285_v39 }
 0x517   :  { %1702 = vperm.xlu0 %8093, %v1693_v42   ;;  %8269 = vrcp.f32 %v1592_v45  ;;  %v1696_v49 = vunpack.c.l.b16 %v1672_v43  ;;  %v1604_v37 = vrot.slane %v1554_v20, %v9219_v17  ;;  %v1600_v54 = vrot.slane %v1554_v20, %v9216_v35 }
 0x518   :  { %v1674_v6 = vpack.c.bf16 %v1648_v28, %v1648_v28  ;;  %v1652_v41 = vmul.f32 %v8266_v34, %v9292_v30  ;;  %v1612_v46 = vrot.slane %v1554_v20, %v9232_v51  ;;  %v1608_v27 = vrot.slane %v1554_v20, %v9225_v0 }
 0x519   :  { %8271 = vrcp.f32 %v1604_v37  ;;  %v1620_v57 = vrot.slane %v1554_v20, %v9242_v40  ;;  %v1616_v62 = vrot.slane %v1554_v20, %v9237_v58  ;;  %v1697_v39 = vunpack.c.l.b16 %v1673_v52  ;;  %v8112_v52 = vld [vmem:[#allocation7 + $0x8] sm:$0xff]  }
 0x51a   :  { %1708 = vperm.xlu1 %8094, %v1695_v7   ;;  %8273 = vrcp.f32 %v1600_v54  ;;  %v1675_v13 = vpack.c.bf16 %v1650_v44, %v1650_v44  ;;  %v1698_v63 = vunpack.c.l.b16 %v1674_v6  ;;  %v1676_v4 = vpack.c.bf16 %v1652_v41, %v1652_v41 }
 0x51b   :  { %1711 = vperm.xlu0 %8093, %v1696_v49   ;;  %8275 = vrcp.f32 %v1612_v46  ;;  %v8113_v49 = vld [vmem:[#allocation7 + $0x10] sm:$0xff]  }
 0x51c   :  { %8277 = vrcp.f32 %v1608_v27  ;;  %v1699_v5 = vunpack.c.l.b16 %v1675_v13  ;;  %v1700_v1 = vunpack.c.l.b16 %v1676_v4 }
 0x51d   :  { %8279 = vrcp.f32 %v1620_v57 }
 0x51e   :  { %1714 = vperm.xlu1 %8094, %v1697_v39   ;;  %8281 = vrcp.f32 %v1616_v62 }
 0x51f   :  { %1717 = vperm.xlu0 %8093, %v1698_v63  }
 0x520   :  { %v8268_v30 = vpop.eup %8267 }
 0x521   :  { %v8270_v50 = vpop.eup %8269  ;;  %v1656_v9 = vmul.f32 %v8268_v30, %v9279_v16 }
 0x522   :  { %1720 = vperm.xlu1 %8094, %v1699_v5   ;;  %v1654_v14 = vmul.f32 %v8270_v50, %v9298_v2 }
 0x523   :  { %1723 = vperm.xlu0 %8093, %v1700_v1   ;;  %v1678_v24 = vpack.c.bf16 %v1656_v9, %v1656_v9  ;;  %v8272_v59 = vpop.eup %8271 }
 0x524   :  { %v1677_v11 = vpack.c.bf16 %v1654_v14, %v1654_v14  ;;  %v8274_v33 = vpop.eup %8273  ;;  %v1660_v60 = vmul.f32 %v8272_v59, %v9287_v25 }
 0x525   :  { %v1821_v19 = vunpack.c.l.b16 %v1678_v24  ;;  %v8276_v20 = vpop.eup %8275  ;;  %v1658_v15 = vmul.f32 %v8274_v33, %v9304_v47 }
 0x526   :  { %v1820_v21 = vunpack.c.l.b16 %v1677_v11  ;;  %v8278_v18 = vpop.eup %8277  ;;  %v1680_v61 = vpack.c.bf16 %v1660_v60, %v1660_v60  ;;  %v1664_v16 = vmul.f32 %v8276_v20, %v9294_v56  ;;  %v9415_v20 = vld [vmem:[%s11252_s0 + $0x4] sm:$0xf] }
 0x527   :  { %1832 = vperm.xlu0 %8093, %v1821_v19   ;;  %v8280_v31 = vpop.eup %8279  ;;  %v1679_v2 = vpack.c.bf16 %v1658_v15, %v1658_v15  ;;  %v1662_v12 = vmul.f32 %v8278_v18, %v9307_v38 }
 0x528   :  { %1829 = vperm.xlu1 %8094, %v1820_v21   ;;  %v8282_v29 = vpop.eup %8281  ;;  %v1823_v48 = vunpack.c.l.b16 %v1680_v61  ;;  %v1682_v42 = vpack.c.bf16 %v1664_v16, %v1664_v16  ;;  %v1668_v43 = vmul.f32 %v8280_v31, %v9300_v32  ;;  %v9419_v21 = vsel %vm1768_vm8, %v9415_v20, 0 }
 0x529   :  { %v1822_v25 = vunpack.c.l.b16 %v1679_v2  ;;  %v1681_v28 = vpack.c.bf16 %v1662_v12, %v1662_v12  ;;  %v1666_v45 = vmul.f32 %v8282_v29, %v9310_v55  ;;  %v8111_v55 = vld [vmem:[#allocation7] sm:$0xff]  }
 0x52a   :  { %v1825_v56 = vunpack.c.l.b16 %v1682_v42  ;;  %v1684_v47 = vpack.c.bf16 %v1668_v43, %v1668_v43  ;;  %7945 = vmatpush3.bf16.msra.mxu0 %v8111_v55 }
 0x52b   :  { %1838 = vperm.xlu0 %8093, %v1823_v48   ;;  %v1824_v38 = vunpack.c.l.b16 %v1681_v28  ;;  %v1683_v34 = vpack.c.bf16 %v1666_v45, %v1666_v45  ;;  %7946 = vmatprep.subr.bf16.mxu0 %v8554_v22 }
 0x52c   :  { %1835 = vperm.xlu1 %8094, %v1822_v25   ;;  %v1827_v32 = vunpack.c.l.b16 %v1684_v47 }
 0x52d   :  { %v1826_v7 = vunpack.c.l.b16 %v1683_v34 }
 0x52e   :  { %7947 = vmatpush3.bf16.msra.mxu0 %v8112_v52 }
 0x52f   :  { %1844 = vperm.xlu0 %8093, %v1825_v56   ;;  %7948 = vmatprep.subr.bf16.mxu0 %v8554_v22 }
 0x530   :  { %1841 = vperm.xlu1 %8094, %v1824_v38  }
 0x532   :  { %7949 = vmatpush3.bf16.msra.mxu0 %v8113_v49 }
 0x533   :  { %1850 = vperm.xlu0 %8093, %v1827_v32   ;;  %7950 = vmatprep.subr.bf16.mxu0 %v8554_v22 }
 0x534   :  { %1847 = vperm.xlu1 %8094, %v1826_v7  }
 0x595   :  { %v1706_v44 = vpop.permute.xlu1 %1705 }
 0x596   :  { %v1703_v37 = vpop.permute.xlu0 %1702  ;;  %v1732_v54 = vrot.slane %v1706_v44, %v9132_v26  ;;  %v8114_v44 = vld [vmem:[#allocation7 + $0x18] sm:$0xff]  }
 0x597   :  { %v1728_v6 = vrot.slane %v1703_v37, %v9132_v26  ;;  %7951 = vmatpush3.bf16.msra.mxu0 %v8114_v44  ;;  %v8115_v37 = vld [vmem:[#allocation7 + $0x20] sm:$0xff]  }
 0x598   :  { %7952 = vmatprep.subr.bf16.mxu0 %v8554_v22 }
 0x599   :  { %v1709_v41 = vpop.permute.xlu1 %1708  ;;  %v1757_v57 = vsel %vm1245_vm0, %v1732_v54, %v1728_v6  ;;  %v8116_v54 = vld [vmem:[#allocation7 + $0x28] sm:$0xff]   ;;  %v8117_v6 = vld [vmem:[#allocation7 + $0x30] sm:$0xff]  }
 0x59a   :  { %v1736_v46 = vrot.slane %v1709_v41, %v9132_v26  ;;  %v1712_v27 = vpop.permute.xlu0 %1711  ;;  %v8118_v41 = vld [vmem:[#allocation7 + $0x38] sm:$0xff]  }
 0x59b   :  { %v1740_v62 = vrot.slane %v1712_v27, %v9132_v26  ;;  %7953 = vmatpush3.bf16.msra.mxu0 %v8115_v37 }
 0x59c   :  { %v1758_v39 = vsel %vm1247_vm1, %v1736_v46, %v1757_v57  ;;  %7954 = vmatprep.subr.bf16.mxu0 %v8554_v22 }
 0x59d   :  { %v1715_v13 = vpop.permute.xlu1 %1714  ;;  %v1759_v30 = vsel %vm1249_vm2, %v1740_v62, %v1758_v39 }
 0x59e   :  { %v1744_v63 = vrot.slane %v1715_v13, %v9132_v26  ;;  %v1718_v4 = vpop.permute.xlu0 %1717 }
 0x59f   :  { %v1748_v5 = vrot.slane %v1718_v4, %v9132_v26  ;;  %7955 = vmatpush3.bf16.msra.mxu0 %v8116_v54 }
 0x5a0   :  { %v1760_v50 = vsel %vm1251_vm3, %v1744_v63, %v1759_v30  ;;  %7956 = vmatprep.subr.bf16.mxu0 %v8554_v22 }
 0x5a1   :  { %v1721_v1 = vpop.permute.xlu1 %1720  ;;  %v1761_v24 = vsel %vm1253_vm4, %v1748_v5, %v1760_v50  ;;  %v8119_v5 = vld [vmem:[#allocation2 + $0x80] sm:$0xff]  }
 0x5a2   :  { %v1752_v9 = vrot.slane %v1721_v1, %v9132_v26  ;;  %v1724_v14 = vpop.permute.xlu0 %1723  ;;  %v8120_v50 = vld [vmem:[#allocation5 + $0x40] sm:$0xff]  }
 0x5a3   :  { %v1756_v59 = vrot.slane %v1724_v14, %v9132_v26  ;;  %7957 = vmatpush3.bf16.msra.mxu0 %v8117_v6  ;;  %v8121_v1 = vld [vmem:[#allocation2 + $0x40] sm:$0xff]   ;;  %v8123_v14 = vld [vmem:[#allocation5 + $0x48] sm:$0xff]  }
 0x5a4   :  { %v1762_v11 = vsel %vm1255_vm5, %v1752_v9, %v1761_v24  ;;  %7958 = vmatprep.subr.bf16.mxu0 %v8554_v22  ;;  %v8122_v9 = vld [vmem:[#allocation2 + $0x88] sm:$0xff]  }
 0x5a5   :  { %v1763_v33 = vsel %vm1257_vm6, %v1756_v59, %v1762_v11  ;;  %v8124_v24 = vld [vmem:[#allocation2 + $0x48] sm:$0xff]   ;;  %v8125_v59 = vld [vmem:[#allocation2 + $0x90] sm:$0xff]  }
 0x5a6   :  { %v1764_v19 = vpack.c.b16 %v1763_v33, %v1763_v33  ;;  %v1833_v60 = vpop.permute.xlu0 %1832  ;;  %v8126_v11 = vld [vmem:[#allocation5 + $0x50] sm:$0xff]  }
 0x5a7   :  { %v1830_v15 = vpop.permute.xlu1 %1829  ;;  %v1859_v61 = vrot.slane %v1833_v60, %v9132_v26  ;;  %7959 = vmatpush3.bf16.msra.mxu0 %v8118_v41  ;;  %v8127_v33 = vld [vmem:[#allocation2 + $0x50] sm:$0xff]   ;;  %v8129_v60 = vld [vmem:[#allocation5 + $0x58] sm:$0xff]  }
 0x5a8   :  { %7935 = vmatmul.mubr.msk.bf16.vlgmr.msra.gmra.mrb[16].mxu1 %vm1268_vm7, %v1764_v19  ;;  %v1855_v18 = vrot.slane %v1830_v15, %v9132_v26  ;;  %7964 = vmatprep.subr.bf16.mxu0 %v8120_v50  ;;  %v8128_v19 = vld [vmem:[#allocation2 + $0x98] sm:$0xff]  }
 0x5a9   :  { %7939 = vmatpush3.bf16.msra.mxu1 %v9419_v21  ;;  %7940 = vmatprep.mubr.msk.bf16.mxu1 %vm8555_vm9, %v8554_v22  ;;  %v8130_v15 = vld [vmem:[#allocation2 + $0x58] sm:$0xff]  }
 0x5aa   :  { %v1839_v16 = vpop.permute.xlu0 %1838  ;;  %v1884_v12 = vsel %vm1245_vm0, %v1859_v61, %v1855_v18  ;;  %7639 = vmatprep.subr.bf16.mxu1 %v8119_v5  ;;  %v8131_v18 = vld [vmem:[#allocation2 + $0xa0] sm:$0xff]  }
 0x5ab   :  { %v1836_v31 = vpop.permute.xlu1 %1835  ;;  %v1867_v29 = vrot.slane %v1839_v16, %v9132_v26  ;;  %v8132_v61 = vld [vmem:[#allocation5 + $0x60] sm:$0xff]  }
 0x5ac   :  { %v1863_v2 = vrot.slane %v1836_v31, %v9132_v26  ;;  %v8133_v16 = vld [vmem:[#allocation2 + $0x60] sm:$0xff]   ;;  %v8134_v31 = vld [vmem:[#allocation2 + $0xa8] sm:$0xff]  }
 0x5ae   :  { %v1885_v48 = vsel %vm1247_vm1, %v1863_v2, %v1884_v12  ;;  %v1845_v42 = vpop.permute.xlu0 %1844  ;;  %v8135_v2 = vld [vmem:[#allocation5 + $0x68] sm:$0xff]  }
 0x5af   :  { %v1842_v43 = vpop.permute.xlu1 %1841  ;;  %v1886_v28 = vsel %vm1249_vm2, %v1867_v29, %v1885_v48  ;;  %v1875_v45 = vrot.slane %v1845_v42, %v9132_v26  ;;  %v8136_v12 = vld [vmem:[#allocation2 + $0x68] sm:$0xff]   ;;  %v8137_v29 = vld [vmem:[#allocation2 + $0xb0] sm:$0xff]  }
 0x5b0   :  { %v1871_v25 = vrot.slane %v1842_v43, %v9132_v26  ;;  %v8138_v48 = vld [vmem:[#allocation5 + $0x70] sm:$0xff]   ;;  %v8140_v43 = vld [vmem:[#allocation2 + $0xb8] sm:$0xff]  }
 0x5b1   :  { %v8139_v42 = vld [vmem:[#allocation2 + $0x70] sm:$0xff]  }
 0x5b2   :  { %v1887_v56 = vsel %vm1251_vm3, %v1871_v25, %v1886_v28  ;;  %v1851_v47 = vpop.permute.xlu0 %1850  ;;  %v8141_v25 = vld [vmem:[#allocation5 + $0x78] sm:$0xff]  }
 0x5b3   :  { %v1848_v38 = vpop.permute.xlu1 %1847  ;;  %v1883_v34 = vrot.slane %v1851_v47, %v9132_v26  ;;  %v1888_v7 = vsel %vm1253_vm4, %v1875_v45, %v1887_v56  ;;  %v8142_v28 = vld [vmem:[#allocation2 + $0x78] sm:$0xff]  }
 0x5b4   :  { %v1879_v32 = vrot.slane %v1848_v38, %v9132_v26 }
 0x5b6   :  { %v1889_v55 = vsel %vm1255_vm5, %v1879_v32, %v1888_v7 }
 0x5b7   :  { %v1890_v52 = vsel %vm1257_vm6, %v1883_v34, %v1889_v55 }
 0x5b8   :  { %v1891_v49 = vpack.c.b16 %v1890_v52, %v1890_v52 }
 0x5ba   :  { %7941 = vmatmul.mubr.msk.bf16.vlgmr.msra.gmra.mrb[20].mxu1 %vm1268_vm7, %v1891_v49 }
 0x5bb   :  { %7640 = vmatpush3.bf16.msra.mxu1 %v8121_v1 }
 0x5bc   :  { %7641 = vmatprep.subr.bf16.mxu1 %v8122_v9 }
 0x5bf   :  { %7642 = vmatpush3.bf16.msra.mxu1 %v8124_v24  ;;  %v7414_v24 = vld [vmem:[%s11256_s4 + $0xf] ss:$0 sm:$0xff] }
 0x5c0   :  { %7643 = vmatprep.subr.bf16.mxu1 %v8125_v59 }
 0x5c3   :  { %7644 = vmatpush3.bf16.msra.mxu1 %v8127_v33  ;;  %v7415_v33 = vld [vmem:[%s11256_s4 + $0x10] ss:$0 sm:$0xff] }
 0x5c4   :  { %7645 = vmatprep.subr.bf16.mxu1 %v8128_v19 }
 0x5c7   :  { %7646 = vmatpush3.bf16.msra.mxu1 %v8130_v15 }
 0x5c8   :  { %7647 = vmatprep.subr.bf16.mxu1 %v8131_v18 }
 0x5cb   :  { %7648 = vmatpush3.bf16.msra.mxu1 %v8133_v16 }
 0x5cc   :  { %7649 = vmatprep.subr.bf16.mxu1 %v8134_v31 }
 0x5cf   :  { %7650 = vmatpush3.bf16.msra.mxu1 %v8136_v12 }
 0x5d0   :  { %7651 = vmatprep.subr.bf16.mxu1 %v8137_v29 }
 0x5d3   :  { %7652 = vmatpush3.bf16.msra.mxu1 %v8139_v42 }
 0x5d4   :  { %7653 = vmatprep.subr.bf16.mxu1 %v8140_v43 }
 0x5d7   :  { %7654 = vmatpush3.bf16.msra.mxu1 %v8142_v28 }
 0x67b   :  { %v1806_v46 = vpop.f32.mrb[16].mxu1 }
 0x67c   :  { %v7936_v27 = vpop.f32.mrb[17].mxu1 }
 0x67d   :  { %v1809_v57 = vpop.f32.mrb[18].mxu1 }
 0x67e   :  { %v7937_v62 = vpop.f32.mrb[19].mxu1 }
 0x68d   :  { %v1932_v39 = vpop.f32.mrb[20].mxu1 }
 0x68e   :  { %v1938_v13 = vpack.c.bf16 %v1932_v39, %v1806_v46  ;;  %v7942_v63 = vpop.f32.mrb[21].mxu1 }
 0x68f   :  { %v1935_v4 = vpop.f32.mrb[22].mxu1 }
 0x690   :  { %v7943_v30 = vpop.f32.mrb[23].mxu1  ;;  %7961 = vmatmul.mubr.bf16.vlgmr.msra.gmra.mrb[16].mxu0 %v1938_v13 }
 0x691   :  { %7965 = vmatpush3.bf16.msra.mxu0 %v8120_v50 }
 0x692   :  { %7966 = vmatprep.subr.bf16.mxu0 %v8123_v14 }
 0x695   :  { %7967 = vmatpush3.bf16.msra.mxu0 %v8123_v14 }
 0x696   :  { %7968 = vmatprep.subr.bf16.mxu0 %v8126_v11 }
 0x699   :  { %7969 = vmatpush3.bf16.msra.mxu0 %v8126_v11 }
 0x69a   :  { %7970 = vmatprep.subr.bf16.mxu0 %v8129_v60 }
 0x69d   :  { %7971 = vmatpush3.bf16.msra.mxu0 %v8129_v60 }
 0x69e   :  { %7972 = vmatprep.subr.bf16.mxu0 %v8132_v61 }
 0x6a1   :  { %7973 = vmatpush3.bf16.msra.mxu0 %v8132_v61 }
 0x6a2   :  { %7974 = vmatprep.subr.bf16.mxu0 %v8135_v2 }
 0x6a5   :  { %7975 = vmatpush3.bf16.msra.mxu0 %v8135_v2 }
 0x6a6   :  { %7976 = vmatprep.subr.bf16.mxu0 %v8138_v48 }
 0x6a9   :  { %7977 = vmatpush3.bf16.msra.mxu0 %v8138_v48 }
 0x6aa   :  { %7978 = vmatprep.subr.bf16.mxu0 %v8141_v25 }
 0x6ad   :  { %7979 = vmatpush3.bf16.msra.mxu0 %v8141_v25 }
 0x763   :  { %v2037_v45 = vpop.f32.mrb[16].mxu0 }
 0x764   :  { %v7962_v56 = vpop.f32.mrb[17].mxu0  ;;  %v2053_v38 = vmul.f32 %v2037_v45, %v2037_v45 }
 0x765   :  { %v2040_v47 = vpop.f32.mrb[18].mxu0 }
 0x766   :  { %v2046_v34 = vadd.f32 %v2040_v47, %v2037_v45  ;;  %v2054_v32 = vmul.f32 %v2040_v47, %v2040_v47  ;;  %v7963_v7 = vpop.f32.mrb[19].mxu0 }
 0x768   :  { %v2047_v55 = vrot.slane %v2046_v34, 4  ;;  %v2055_v52 = vadd.f32 %v2054_v32, %v2053_v38 }
 0x76a   :  { %v2048_v49 = vadd.f32 %v2047_v55, %v2046_v34  ;;  %v2056_v44 = vrot.slane %v2055_v52, 4 }
 0x76c   :  { %v2049_v37 = vrot.slane %v2048_v49, 2  ;;  %v2057_v54 = vadd.f32 %v2056_v44, %v2055_v52 }
 0x76e   :  { %v2050_v6 = vadd.f32 %v2049_v37, %v2048_v49  ;;  %v2058_v41 = vrot.slane %v2057_v54, 2 }
 0x770   :  { %v2051_v46 = vrot.slane %v2050_v6, 1  ;;  %v2059_v27 = vadd.f32 %v2058_v41, %v2057_v54 }
 0x772   :  { %v2052_v57 = vadd.f32 %v2051_v46, %v2050_v6  ;;  %v2060_v62 = vrot.slane %v2059_v27, 1 }
 0x774   :  { %v2061_v39 = vadd.f32 %v2060_v62, %v2059_v27  ;;  %v2062_v13 = vmul.f32 0.0625, %v2052_v57 }
 0x776   :  { %v2063_v63 = vmul.f32 0.0625, %v2061_v39  ;;  %v2064_v4 = vmul.f32 %v2062_v13, %v2062_v13  ;;  %v2067_v30 = vsub.f32 %v2037_v45, %v2062_v13  ;;  %v2068_v5 = vsub.f32 %v2040_v47, %v2062_v13 }
 0x778   :  { %v2065_v50 = vsub.f32 %v2063_v63, %v2064_v4 }
 0x77a   :  { %v2066_v1 = vmax.f32 %v2065_v50, 0.0 }
 0x77c   :  { %v2069_v9 = vadd.f32 1e-05, %v2066_v1 }
 0x77e   :  { %8283 = vrsqrt.f32 %v2069_v9 }
 0x788   :  { %v8284_v14 = vpop.eup %8283 }
 0x789   :  { %v2071_v59 = vmul.f32 %v8284_v14, %v2067_v30  ;;  %v2072_v11 = vmul.f32 %v8284_v14, %v2068_v5 }
 0x78b   :  { %v2077_v19 = vmul.f32 %v7414_v24, %v2071_v59  ;;  %v2078_v60 = vmul.f32 %v7414_v24, %v2072_v11 }
 0x78d   :  { %v2083_v15 = vadd.f32 %v7415_v33, %v2077_v19  ;;  %v2084_v18 = vadd.f32 %v7415_v33, %v2078_v60 }
 0x78f   :  { %vm2085_vm10 = vcmp.ge.f32.partialorder %v2083_v15, 0.0  ;;  %vm2086_vm11 = vcmp.ge.f32.partialorder %v2084_v18, 0.0  ;;  %v2087_v61 = vmul.f32 0.1, %v2083_v15  ;;  %v2088_v16 = vmul.f32 0.1, %v2084_v18 }
 0x791   :  { %v2089_v31 = vsel %vm2085_vm10, %v2083_v15, %v2087_v61  ;;  %v2090_v2 = vsel %vm2086_vm11, %v2084_v18, %v2088_v16 }
 0x792   :  { %v2091_v12 = vpack.c.bf16 %v2090_v2, %v2089_v31  ;;  %v9451_v29 = vpack.c.bf16 %v2089_v31, %v2089_v31  ;;  %v9453_v48 = vpack.c.bf16 %v2090_v2, %v2090_v2 }
 0x794   :  { %v7418_v42 = vcombine.low %v9349_v36, %v2091_v12  ;;  %7472 = vmatprep.subr.msk.bf16.mxu0 %vm1768_vm8, %v9451_v29  ;;  %7474 = vmatprep.subr.msk.bf16.mxu1 %vm1768_vm8, %v9453_v48  ;;  %v2124_v43 = vcombine.low %v9415_v20, %v9453_v48 }
 0x796   :  { %v9463_v25 = vrot.slane %v7418_v42, %v8651_v8  ;;  %v9466_v28 = vrot.slane %v2124_v43, %v8651_v8 }
 0x798   :  { %v2114_v45 = vrot.slane %v9463_v25, %v8651_v8  ;;  %v2107_v56 = vcombine.high %v9463_v25, %v9463_v25  ;;  %v9474_v47 = vrot.slane %v9466_v28, %v8651_v8 }
 0x79a   :  { %v2150_v38 = vunpack.i.h.s16 %v2114_v45  ;;  %v7419_v34 = vpack.i.b16 %v2114_v45, %v2114_v45  ;;  %v2121_v32 = vrot.slane %v2107_v56, %v8651_v8  ;;  %v2122_v7 = vcombine.high %v2114_v45, %v2114_v45 }
 0x79b   :  { %v2158_v6 = vunpack.i.h.s16 %v9474_v47 }
 0x79c   :  { %v2166_v55 = vpack.i.b16 %v2150_v38, %v2150_v38  ;;  %v2188_v52 = vrot.slane %v7419_v34, %v9213_v23  ;;  %v2184_v49 = vrot.slane %v7419_v34, %v8654_v10  ;;  %v2152_v44 = vunpack.i.h.s16 %v2121_v32 }
 0x79d   :  { %v7420_v37 = vpack.i.b16 %v2121_v32, %v2121_v32  ;;  %v2154_v54 = vunpack.i.h.s16 %v2122_v7  ;;  %v7421_v63 = vpack.i.b16 %v2122_v7, %v2122_v7  ;;  %v2123_v12 = vcombine.high %v2121_v32, %v2121_v32 }
 0x79e   :  { %v2196_v41 = vrot.slane %v2166_v55, %v9213_v23  ;;  %v2317_v46 = vpack.i.b16 %v2188_v52, %v2188_v52  ;;  %v2192_v27 = vrot.slane %v2166_v55, %v8654_v10  ;;  %v2310_v57 = vpack.i.b16 %v2184_v49, %v2184_v49 }
 0x79f   :  { %v2168_v62 = vpack.i.b16 %v2152_v44, %v2152_v44  ;;  %v2204_v39 = vrot.slane %v7420_v37, %v9213_v23  ;;  %v2200_v13 = vrot.slane %v7420_v37, %v8654_v10  ;;  %v2170_v24 = vpack.i.b16 %v2154_v54, %v2154_v54 }
 0x7a0   :  { %v2322_v4 = vrot.slane %v2317_v46, %v8654_v10  ;;  %v2331_v30 = vpack.i.b16 %v2196_v41, %v2196_v41  ;;  %v2315_v5 = vrot.slane %v2310_v57, %v8654_v10  ;;  %v2324_v50 = vpack.i.b16 %v2192_v27, %v2192_v27 }
 0x7a1   :  { %v2212_v1 = vrot.slane %v2168_v62, %v9213_v23  ;;  %v2345_v9 = vpack.i.b16 %v2204_v39, %v2204_v39  ;;  %v2208_v14 = vrot.slane %v2168_v62, %v8654_v10  ;;  %v2338_v18 = vpack.i.b16 %v2200_v13, %v2200_v13 }
 0x7a2   :  { %v2336_v59 = vrot.slane %v2331_v30, %v8654_v10  ;;  %v2534_v11 = vsub.bf16 %v2322_v4, %v9451_v29  ;;  %v2329_v33 = vrot.slane %v2324_v50, %v8654_v10  ;;  %v2533_v19 = vsub.bf16 %v2315_v5, %v9349_v36 }
 0x7a3   :  { %v2350_v60 = vrot.slane %v2345_v9, %v8654_v10  ;;  %v2359_v15 = vpack.i.b16 %v2212_v1, %v2212_v1  ;;  %v2352_v61 = vpack.i.b16 %v2208_v14, %v2208_v14  ;;  %v2220_v7 = vrot.slane %v7421_v63, %v9213_v23 }
 0x7a4   :  { %v2536_v16 = vsub.bf16 %v2336_v59, %v9451_v29  ;;  %v2566_v31 = vand.u32 2147450879, %v2534_v11  ;;  %v2535_v2 = vsub.bf16 %v2329_v33, %v9349_v36  ;;  %v2565_v42 = vand.u32 2147450879, %v2533_v19 }
 0x7a5   :  { %v2364_v43 = vrot.slane %v2359_v15, %v8654_v10  ;;  %v2538_v45 = vsub.bf16 %v2350_v60, %v9451_v29  ;;  %v2357_v56 = vrot.slane %v2352_v61, %v8654_v10  ;;  %v2228_v55 = vrot.slane %v2170_v24, %v9213_v23 }
 0x7a6   :  { %v2568_v38 = vand.u32 2147450879, %v2536_v16  ;;  %v2567_v34 = vand.u32 2147450879, %v2535_v2  ;;  %v2343_v44 = vrot.slane %v2338_v18, %v8654_v10  ;;  %v9504_v32 = vpack.i.b16 %v9474_v47, %v9474_v47 }
 0x7a7   :  { %v2540_v52 = vsub.bf16 %v2364_v43, %v9451_v29  ;;  %v2570_v49 = vand.u32 2147450879, %v2538_v45  ;;  %v2373_v41 = vpack.i.b16 %v2220_v7, %v2220_v7  ;;  %v2387_v46 = vpack.i.b16 %v2228_v55, %v2228_v55 }
 0x7a8   :  { %v7428_v37 = vcombine.low %v2566_v31, %v2568_v38  ;;  %v7427_v54 = vcombine.low %v2565_v42, %v2567_v34  ;;  %v2539_v57 = vsub.bf16 %v2357_v56, %v9349_v36  ;;  %v2216_v62 = vrot.slane %v7421_v63, %v8654_v10 }
 0x7a9   :  { %v2572_v27 = vand.u32 2147450879, %v2540_v52  ;;  %v2224_v39 = vrot.slane %v2170_v24, %v8654_v10  ;;  %v2378_v13 = vrot.slane %v2373_v41, %v8654_v10  ;;  %v2392_v4 = vrot.slane %v2387_v46, %v8654_v10 }
 0x7aa   :  { %2853 = vmatprep.mubr.bf16.mxu1 %v7428_v37  ;;  %v2156_v30 = vunpack.i.h.s16 %v2123_v12  ;;  %v7422_v5 = vpack.i.b16 %v2123_v12, %v2123_v12  ;;  %v2537_v1 = vsub.bf16 %v2343_v44, %v9349_v36  ;;  %v2366_v9 = vpack.i.b16 %v2216_v62, %v2216_v62 }
 0x7ab   :  { %2854 = vmatmul.mubr.bf16.vlgmr.msra.gmra.mrb[24].mxu1 %v7427_v54  ;;  %v7430_v50 = vcombine.low %v2570_v49, %v2572_v27  ;;  %v2380_v14 = vpack.i.b16 %v2224_v39, %v2224_v39  ;;  %v2542_v59 = vsub.bf16 %v2378_v13, %v9451_v29  ;;  %v2544_v11 = vsub.bf16 %v2392_v4, %v9451_v29 }
 0x7ac   :  { %v2172_v63 = vpack.i.b16 %v2156_v30, %v2156_v30  ;;  %v2236_v24 = vrot.slane %v7422_v5, %v9213_v23  ;;  %4240 = vmatpush1.bf16.msra.mxu1 %v9419_v21  ;;  %v2571_v33 = vand.u32 2147450879, %v2539_v57  ;;  %v2232_v60 = vrot.slane %v7422_v5, %v8654_v10 }
 0x7ad   :  { %2861 = vmatprep.mubr.bf16.mxu1 %v7430_v50  ;;  %v2385_v19 = vrot.slane %v2380_v14, %v8654_v10  ;;  %v2132_v15 = vcombine.high %v9466_v28, %v9466_v28  ;;  %v2576_v18 = vand.u32 2147450879, %v2544_v11  ;;  %v2174_v31 = vpack.i.b16 %v2158_v6, %v2158_v6 }
 0x7ae   :  { %v2244_v61 = vrot.slane %v2172_v63, %v9213_v23  ;;  %v2401_v16 = vpack.i.b16 %v2236_v24, %v2236_v24  ;;  %v2569_v2 = vand.u32 2147450879, %v2537_v1  ;;  %v2371_v21 = vrot.slane %v2366_v9, %v8654_v10 }
 0x7af   :  { %v2240_v12 = vrot.slane %v2172_v63, %v8654_v10  ;;  %v2574_v42 = vand.u32 2147450879, %v2542_v59  ;;  %v2252_v56 = vrot.slane %v9504_v32, %v9213_v23  ;;  %v2543_v34 = vsub.bf16 %v2385_v19, %v9349_v36 }
 0x7b0   :  { %v2406_v43 = vrot.slane %v2401_v16, %v8654_v10  ;;  %v2415_v45 = vpack.i.b16 %v2244_v61, %v2244_v61  ;;  %v7429_v38 = vcombine.low %v2569_v2, %v2571_v33  ;;  %v2146_v55 = vrot.slane %v2132_v15, %v8651_v8 }
 0x7b1   :  { %v2408_v7 = vpack.i.b16 %v2240_v12, %v2240_v12  ;;  %v7432_v52 = vcombine.low %v2574_v42, %v2576_v18  ;;  %v2394_v49 = vpack.i.b16 %v2232_v60, %v2232_v60  ;;  %v2260_v44 = vrot.slane %v2174_v31, %v9213_v23 }
 0x7b2   :  { %v2420_v6 = vrot.slane %v2415_v45, %v8654_v10  ;;  %v2541_v37 = vsub.bf16 %v2371_v21, %v9349_v36  ;;  %v2546_v54 = vsub.bf16 %v2406_v43, %v9451_v29  ;;  %v2429_v27 = vpack.i.b16 %v2252_v56, %v2252_v56 }
 0x7b3   :  { %2862 = vmatmul.mubr.bf16.gmra.mrb[28].mxu1 %v7429_v38  ;;  %v2413_v46 = vrot.slane %v2408_v7, %v8654_v10  ;;  %v2443_v57 = vpack.i.b16 %v2260_v44, %v2260_v44  ;;  %v2575_v62 = vand.u32 2147450879, %v2543_v34  ;;  %v2256_v39 = vrot.slane %v2174_v31, %v8654_v10 }
 0x7b4   :  { %2869 = vmatprep.mubr.bf16.mxu1 %v7432_v52  ;;  %v2548_v41 = vsub.bf16 %v2420_v6, %v9451_v29  ;;  %v2399_v4 = vrot.slane %v2394_v49, %v8654_v10  ;;  %v2160_v5 = vunpack.i.h.s16 %v2146_v55  ;;  %v2573_v50 = vand.u32 2147450879, %v2541_v37 }
 0x7b5   :  { %v2448_v30 = vrot.slane %v2443_v57, %v8654_v10  ;;  %v2248_v1 = vrot.slane %v9504_v32, %v8654_v10  ;;  %v7424_v9 = vpack.i.b16 %v2146_v55, %v2146_v55  ;;  %v2147_v14 = vcombine.high %v9474_v47, %v9474_v47 }
 0x7b6   :  { %v2580_v13 = vand.u32 2147450879, %v2548_v41  ;;  %v2578_v59 = vand.u32 2147450879, %v2546_v54  ;;  %v2547_v11 = vsub.bf16 %v2413_v46, %v9349_v36  ;;  %v2434_v63 = vrot.slane %v2429_v27, %v8654_v10 }
 0x7b7   :  { %v2176_v24 = vpack.i.b16 %v2160_v5, %v2160_v5  ;;  %v7431_v33 = vcombine.low %v2573_v50, %v2575_v62  ;;  %v2436_v19 = vpack.i.b16 %v2256_v39, %v2256_v39  ;;  %v2268_v60 = vrot.slane %v7424_v9, %v9213_v23 }
 0x7b8   :  { %v7434_v15 = vcombine.low %v2578_v59, %v2580_v13  ;;  %v2545_v18 = vsub.bf16 %v2399_v4, %v9349_v36  ;;  %v2552_v61 = vsub.bf16 %v2448_v30, %v9453_v48  ;;  %v2422_v16 = vpack.i.b16 %v2248_v1, %v2248_v1 }
 0x7b9   :  { %v2276_v32 = vrot.slane %v2176_v24, %v9213_v23  ;;  %v2162_v47 = vunpack.i.h.s16 %v2147_v14  ;;  %v2579_v31 = vand.u32 2147450879, %v2547_v11  ;;  %v2550_v2 = vsub.bf16 %v2434_v63, %v9453_v48 }
 0x7ba   :  { %v2457_v21 = vpack.i.b16 %v2268_v60, %v2268_v60  ;;  %v2441_v42 = vrot.slane %v2436_v19, %v8654_v10  ;;  %v2272_v43 = vrot.slane %v2176_v24, %v8654_v10  ;;  %v7425_v45 = vpack.i.b16 %v2147_v14, %v2147_v14 }
 0x7bb   :  { %2870 = vmatmul.mubr.bf16.gmra.mrb[32].mxu1 %v7431_v33  ;;  %v2471_v12 = vpack.i.b16 %v2276_v32, %v2276_v32  ;;  %v2178_v56 = vpack.i.b16 %v2162_v47, %v2162_v47  ;;  %v2577_v36 = vand.u32 2147450879, %v2545_v18  ;;  %v2584_v38 = vand.u32 2147450879, %v2552_v61 }
 0x7bc   :  { %2877 = vmatprep.mubr.bf16.mxu1 %v7434_v15  ;;  %v2427_v7 = vrot.slane %v2422_v16, %v8654_v10  ;;  %v2264_v52 = vrot.slane %v7424_v9, %v8654_v10  ;;  %v2148_v49 = vcombine.high %v2146_v55, %v2146_v55  ;;  %v2582_v44 = vand.u32 2147450879, %v2550_v2 }
 0x7bd   :  { %v2476_v34 = vrot.slane %v2471_v12, %v8654_v10  ;;  %v2292_v6 = vrot.slane %v2178_v56, %v9213_v23  ;;  %v2462_v37 = vrot.slane %v2457_v21, %v8654_v10  ;;  %v2284_v54 = vrot.slane %v7425_v45, %v9213_v23 }
 0x7be   :  { %v7433_v41 = vcombine.low %v2577_v36, %v2579_v31  ;;  %v2551_v46 = vsub.bf16 %v2441_v42, %v9415_v20  ;;  %v2464_v27 = vpack.i.b16 %v2272_v43, %v2272_v43  ;;  %v7436_v57 = vcombine.low %v2582_v44, %v2584_v38 }
 0x7bf   :  { %v2556_v62 = vsub.bf16 %v2476_v34, %v9453_v48  ;;  %v2499_v39 = vpack.i.b16 %v2292_v6, %v2292_v6  ;;  %v2549_v13 = vsub.bf16 %v2427_v7, %v9415_v20  ;;  %v2450_v4 = vpack.i.b16 %v2264_v52, %v2264_v52 }
 0x7c0   :  { %v2164_v30 = vunpack.i.h.s16 %v2148_v49  ;;  %v2554_v55 = vsub.bf16 %v2462_v37, %v9453_v48  ;;  %v2485_v5 = vpack.i.b16 %v2284_v54, %v2284_v54  ;;  %v7426_v50 = vpack.i.b16 %v2148_v49, %v2148_v49 }
 0x7c1   :  { %v2583_v1 = vand.u32 2147450879, %v2551_v46  ;;  %v2469_v9 = vrot.slane %v2464_v27, %v8654_v10  ;;  %v2288_v14 = vrot.slane %v2178_v56, %v8654_v10  ;;  %v2588_v11 = vand.u32 2147450879, %v2556_v62 }
 0x7c2   :  { %v2180_v59 = vpack.i.b16 %v2164_v30, %v2164_v30  ;;  %v2504_v63 = vrot.slane %v2499_v39, %v8654_v10  ;;  %v2581_v24 = vand.u32 2147450879, %v2549_v13  ;;  %v2455_v33 = vrot.slane %v2450_v4, %v8654_v10 }
 0x7c3   :  { %2878 = vmatmul.mubr.bf16.gmra.mrb[36].mxu1 %v7433_v41  ;;  %v2280_v19 = vrot.slane %v7425_v45, %v8654_v10  ;;  %v2586_v15 = vand.u32 2147450879, %v2554_v55  ;;  %v2490_v18 = vrot.slane %v2485_v5, %v8654_v10  ;;  %v2300_v61 = vrot.slane %v7426_v50, %v9213_v23 }
 0x7c4   :  { %2885 = vmatprep.mubr.bf16.mxu1 %v7436_v57  ;;  %v2308_v60 = vrot.slane %v2180_v59, %v9213_v23  ;;  %v7435_v32 = vcombine.low %v2581_v24, %v2583_v1  ;;  %v2555_v16 = vsub.bf16 %v2469_v9, %v9415_v20  ;;  %v2492_v47 = vpack.i.b16 %v2288_v14, %v2288_v14 }
 0x7c5   :  { %v7438_v31 = vcombine.low %v2586_v15, %v2588_v11  ;;  %v2560_v2 = vsub.bf16 %v2504_v63, %v9453_v48  ;;  %v2553_v12 = vsub.bf16 %v2455_v33, %v9415_v20  ;;  %v2478_v42 = vpack.i.b16 %v2280_v19, %v2280_v19 }
 0x7c6   :  { %v2527_v21 = vpack.i.b16 %v2308_v60, %v2308_v60  ;;  %v2558_v43 = vsub.bf16 %v2490_v18, %v9453_v48  ;;  %v2513_v45 = vpack.i.b16 %v2300_v61, %v2300_v61  ;;  %v2587_v56 = vand.u32 2147450879, %v2555_v16 }
 0x7c7   :  { %v2497_v36 = vrot.slane %v2492_v47, %v8654_v10  ;;  %v2304_v38 = vrot.slane %v2180_v59, %v8654_v10  ;;  %v2592_v34 = vand.u32 2147450879, %v2560_v2  ;;  %v2585_v52 = vand.u32 2147450879, %v2553_v12 }
 0x7c8   :  { %v2532_v7 = vrot.slane %v2527_v21, %v8654_v10  ;;  %v2483_v6 = vrot.slane %v2478_v42, %v8654_v10  ;;  %v2296_v49 = vrot.slane %v7426_v50, %v8654_v10  ;;  %v2590_v44 = vand.u32 2147450879, %v2558_v43 }
 0x7c9   :  { %v2518_v37 = vrot.slane %v2513_v45, %v8654_v10  ;;  %v7437_v54 = vcombine.low %v2585_v52, %v2587_v56  ;;  %v2559_v41 = vsub.bf16 %v2497_v36, %v9415_v20  ;;  %v2520_v46 = vpack.i.b16 %v2304_v38, %v2304_v38 }
 0x7ca   :  { %v7440_v27 = vcombine.low %v2590_v44, %v2592_v34  ;;  %v2564_v57 = vsub.bf16 %v2532_v7, %v9453_v48  ;;  %v2557_v62 = vsub.bf16 %v2483_v6, %v9415_v20  ;;  %v2506_v39 = vpack.i.b16 %v2296_v49, %v2296_v49 }
 0x7cb   :  { %2886 = vmatmul.mubr.bf16.gmra.mrb[40].mxu1 %v7435_v32  ;;  %v2562_v13 = vsub.bf16 %v2518_v37, %v9453_v48  ;;  %v2591_v4 = vand.u32 2147450879, %v2559_v41  ;;  %v2525_v30 = vrot.slane %v2520_v46, %v8654_v10 }
 0x7cc   :  { %2893 = vmatprep.mubr.bf16.mxu1 %v7438_v31  ;;  %v2596_v55 = vand.u32 2147450879, %v2564_v57  ;;  %v2589_v5 = vand.u32 2147450879, %v2557_v62  ;;  %v2511_v50 = vrot.slane %v2506_v39, %v8654_v10 }
 0x7cd   :  { %v2594_v1 = vand.u32 2147450879, %v2562_v13  ;;  %v2563_v14 = vsub.bf16 %v2525_v30, %v9415_v20 }
 0x7ce   :  { %v7439_v9 = vcombine.low %v2589_v5, %v2591_v4  ;;  %v2561_v11 = vsub.bf16 %v2511_v50, %v9415_v20 }
 0x7cf   :  { %v7442_v59 = vcombine.low %v2594_v1, %v2596_v55  ;;  %v2595_v63 = vand.u32 2147450879, %v2563_v14 }
 0x7d0   :  { %v2593_v24 = vand.u32 2147450879, %v2561_v11 }
 0x7d2   :  { %v7441_v33 = vcombine.low %v2593_v24, %v2595_v63 }
 0x7d3   :  { %2894 = vmatmul.mubr.bf16.gmra.mrb[44].mxu1 %v7437_v54 }
 0x7d4   :  { %2901 = vmatprep.mubr.bf16.mxu1 %v7440_v27 }
 0x7db   :  { %2902 = vmatmul.mubr.bf16.gmra.mrb[48].mxu1 %v7439_v9 }
 0x7dc   :  { %2909 = vmatprep.mubr.bf16.mxu1 %v7442_v59 }
 0x7e3   :  { %2910 = vmatmul.mubr.bf16.gmra.mrb[52].mxu1 %v7441_v33 }
 0x7e4   :  { %4271 = vmatprep.mubr.bf16.mxu1 %v8553_v3 }
 0x87e   :  { %v7655_v19 = vpop.f32.mrb[24].mxu1 }
 0x87f   :  { %v7656_v60 = vpop.f32.mrb[25].mxu1 }
 0x880   :  { %v9590_v15 = vadd.f32 %v7656_v60, %v7655_v19  ;;  %v7658_v18 = vpop.f32.mrb[26].mxu1 }
 0x881   :  { %v7659_v61 = vpop.f32.mrb[27].mxu1 }
 0x882   :  { %v9592_v32 = vadd.f32 %v7659_v61, %v7658_v18  ;;  %v2941_v16 = vmul.f32 %v9590_v15, %v9590_v15 }
 0x884   :  { %v2920_v20 = vadd.f32 %v9592_v32, %v9590_v15  ;;  %v2942_v47 = vmul.f32 %v9592_v32, %v9592_v32 }
 0x886   :  { %v2957_v31 = vadd.f32 %v2942_v47, %v2941_v16  ;;  %v7661_v2 = vpop.f32.mrb[28].mxu1 }
 0x887   :  { %v7662_v21 = vpop.f32.mrb[29].mxu1 }
 0x888   :  { %v9600_v12 = vadd.f32 %v7662_v21, %v7661_v2  ;;  %v7664_v42 = vpop.f32.mrb[30].mxu1 }
 0x889   :  { %v7665_v43 = vpop.f32.mrb[31].mxu1 }
 0x88a   :  { %v2921_v45 = vadd.f32 %v9600_v12, %v2920_v20  ;;  %v2943_v56 = vmul.f32 %v9600_v12, %v9600_v12  ;;  %v9605_v36 = vadd.f32 %v7665_v43, %v7664_v42 }
 0x88c   :  { %v2958_v38 = vadd.f32 %v2957_v31, %v2943_v56  ;;  %v2922_v34 = vadd.f32 %v9605_v36, %v2921_v45  ;;  %v2944_v7 = vmul.f32 %v9605_v36, %v9605_v36 }
 0x88e   :  { %v2959_v52 = vadd.f32 %v2958_v38, %v2944_v7  ;;  %v7667_v6 = vpop.f32.mrb[32].mxu1 }
 0x88f   :  { %v7668_v49 = vpop.f32.mrb[33].mxu1 }
 0x890   :  { %v9610_v44 = vadd.f32 %v7668_v49, %v7667_v6  ;;  %v7670_v37 = vpop.f32.mrb[34].mxu1 }
 0x891   :  { %v7671_v54 = vpop.f32.mrb[35].mxu1 }
 0x892   :  { %v2923_v41 = vadd.f32 %v9610_v44, %v2922_v34  ;;  %v2945_v46 = vmul.f32 %v9610_v44, %v9610_v44  ;;  %v9615_v27 = vadd.f32 %v7671_v54, %v7670_v37 }
 0x894   :  { %v2960_v57 = vadd.f32 %v2959_v52, %v2945_v46  ;;  %v2924_v62 = vadd.f32 %v9615_v27, %v2923_v41  ;;  %v2946_v39 = vmul.f32 %v9615_v27, %v9615_v27 }
 0x896   :  { %v2961_v13 = vadd.f32 %v2960_v57, %v2946_v39  ;;  %v7673_v4 = vpop.f32.mrb[36].mxu1 }
 0x897   :  { %v7674_v30 = vpop.f32.mrb[37].mxu1 }
 0x898   :  { %v9620_v55 = vadd.f32 %v7674_v30, %v7673_v4  ;;  %v7676_v5 = vpop.f32.mrb[38].mxu1 }
 0x899   :  { %v7677_v50 = vpop.f32.mrb[39].mxu1 }
 0x89a   :  { %v2925_v1 = vadd.f32 %v9620_v55, %v2924_v62  ;;  %v2947_v9 = vmul.f32 %v9620_v55, %v9620_v55  ;;  %v9625_v14 = vadd.f32 %v7677_v50, %v7676_v5 }
 0x89c   :  { %v2962_v59 = vadd.f32 %v2961_v13, %v2947_v9  ;;  %v2926_v11 = vadd.f32 %v9625_v14, %v2925_v1  ;;  %v2948_v63 = vmul.f32 %v9625_v14, %v9625_v14 }
 0x89e   :  { %v2963_v24 = vadd.f32 %v2962_v59, %v2948_v63  ;;  %v7679_v33 = vpop.f32.mrb[40].mxu1 }
 0x89f   :  { %v7680_v19 = vpop.f32.mrb[41].mxu1 }
 0x8a0   :  { %v9630_v60 = vadd.f32 %v7680_v19, %v7679_v33  ;;  %v7682_v18 = vpop.f32.mrb[42].mxu1 }
 0x8a1   :  { %v7683_v61 = vpop.f32.mrb[43].mxu1 }
 0x8a2   :  { %v2927_v16 = vadd.f32 %v9630_v60, %v2926_v11  ;;  %v2949_v20 = vmul.f32 %v9630_v60, %v9630_v60  ;;  %v9635_v47 = vadd.f32 %v7683_v61, %v7682_v18 }
 0x8a4   :  { %v2964_v31 = vadd.f32 %v2963_v24, %v2949_v20  ;;  %v2928_v2 = vadd.f32 %v9635_v47, %v2927_v16  ;;  %v2950_v21 = vmul.f32 %v9635_v47, %v9635_v47 }
 0x8a6   :  { %v2965_v42 = vadd.f32 %v2964_v31, %v2950_v21  ;;  %v7685_v43 = vpop.f32.mrb[44].mxu1 }
 0x8a7   :  { %v7686_v45 = vpop.f32.mrb[45].mxu1 }
 0x8a8   :  { %v9640_v56 = vadd.f32 %v7686_v45, %v7685_v43  ;;  %v7688_v38 = vpop.f32.mrb[46].mxu1 }
 0x8a9   :  { %v7689_v34 = vpop.f32.mrb[47].mxu1 }
 0x8aa   :  { %v2929_v7 = vadd.f32 %v9640_v56, %v2928_v2  ;;  %v2951_v52 = vmul.f32 %v9640_v56, %v9640_v56  ;;  %v9645_v6 = vadd.f32 %v7689_v34, %v7688_v38 }
 0x8ac   :  { %v2966_v49 = vadd.f32 %v2965_v42, %v2951_v52  ;;  %v2930_v37 = vadd.f32 %v9645_v6, %v2929_v7  ;;  %v2952_v54 = vmul.f32 %v9645_v6, %v9645_v6 }
 0x8ae   :  { %v2967_v41 = vadd.f32 %v2966_v49, %v2952_v54  ;;  %v7691_v46 = vpop.f32.mrb[48].mxu1 }
 0x8af   :  { %v7692_v57 = vpop.f32.mrb[49].mxu1 }
 0x8b0   :  { %v9650_v62 = vadd.f32 %v7692_v57, %v7691_v46  ;;  %v7694_v39 = vpop.f32.mrb[50].mxu1 }
 0x8b1   :  { %v7695_v13 = vpop.f32.mrb[51].mxu1 }
 0x8b2   :  { %v2931_v4 = vadd.f32 %v9650_v62, %v2930_v37  ;;  %v2953_v30 = vmul.f32 %v9650_v62, %v9650_v62  ;;  %v9655_v5 = vadd.f32 %v7695_v13, %v7694_v39 }
 0x8b4   :  { %v2968_v50 = vadd.f32 %v2967_v41, %v2953_v30  ;;  %v2932_v1 = vadd.f32 %v9655_v5, %v2931_v4  ;;  %v2954_v9 = vmul.f32 %v9655_v5, %v9655_v5 }
 0x8b6   :  { %v2969_v59 = vadd.f32 %v2968_v50, %v2954_v9  ;;  %v7697_v11 = vpop.f32.mrb[52].mxu1 }
 0x8b7   :  { %v7698_v63 = vpop.f32.mrb[53].mxu1 }
 0x8b8   :  { %v9660_v24 = vadd.f32 %v7698_v63, %v7697_v11  ;;  %v7700_v33 = vpop.f32.mrb[54].mxu1 }
 0x8b9   :  { %v7701_v19 = vpop.f32.mrb[55].mxu1 }
 0x8ba   :  { %v2933_v18 = vadd.f32 %v9660_v24, %v2932_v1  ;;  %v2955_v61 = vmul.f32 %v9660_v24, %v9660_v24  ;;  %v7702_v16 = vadd.f32 %v7701_v19, %v7700_v33 }
 0x8bc   :  { %v2970_v20 = vadd.f32 %v2969_v59, %v2955_v61  ;;  %v2934_v31 = vadd.f32 %v7702_v16, %v2933_v18  ;;  %v2956_v2 = vmul.f32 %v7702_v16, %v7702_v16 }
 0x8be   :  { %v2935_v21 = vrot.slane %v2934_v31, 4  ;;  %v2971_v42 = vadd.f32 %v2970_v20, %v2956_v2 }
 0x8c0   :  { %v2936_v43 = vadd.f32 %v2935_v21, %v2934_v31  ;;  %v2972_v45 = vrot.slane %v2971_v42, 4  ;;  %v9714_v31 = vld [vmem:[%s11256_s4 + $0x6] ss:$0 sm:$0xff] }
 0x8c2   :  { %v2937_v38 = vrot.slane %v2936_v43, 2  ;;  %v2973_v34 = vadd.f32 %v2972_v45, %v2971_v42 }
 0x8c4   :  { %v2938_v7 = vadd.f32 %v2937_v38, %v2936_v43  ;;  %v2974_v52 = vrot.slane %v2973_v34, 2 }
 0x8c6   :  { %v2939_v49 = vrot.slane %v2938_v7, 1  ;;  %v2975_v37 = vadd.f32 %v2974_v52, %v2973_v34 }
 0x8c8   :  { %v2940_v54 = vadd.f32 %v2939_v49, %v2938_v7  ;;  %v2976_v41 = vrot.slane %v2975_v37, 1 }
 0x8ca   :  { %v2977_v46 = vadd.f32 %v2976_v41, %v2975_v37  ;;  %v9665_v57 = vmul.f32 0.0078125, %v2940_v54 }
 0x8cc   :  { %v2979_v39 = vmul.f32 0.0078125, %v2977_v46  ;;  %v2980_v13 = vmul.f32 %v9665_v57, %v9665_v57  ;;  %v2998_v4 = vsub.f32 %v7702_v16, %v9665_v57  ;;  %v2983_v30 = vsub.f32 %v9590_v15, %v9665_v57 }
 0x8cd   :  { %v2984_v50 = vsub.f32 %v9592_v32, %v9665_v57  ;;  %v2985_v1 = vsub.f32 %v9600_v12, %v9665_v57  ;;  %v2986_v9 = vsub.f32 %v9605_v36, %v9665_v57  ;;  %v2987_v59 = vsub.f32 %v9610_v44, %v9665_v57 }
 0x8ce   :  { %v2981_v11 = vsub.f32 %v2979_v39, %v2980_v13  ;;  %v2988_v63 = vsub.f32 %v9615_v27, %v9665_v57  ;;  %v2989_v33 = vsub.f32 %v9620_v55, %v9665_v57  ;;  %v2990_v15 = vsub.f32 %v9625_v14, %v9665_v57 }
 0x8cf   :  { %v2991_v32 = vsub.f32 %v9630_v60, %v9665_v57  ;;  %v2992_v12 = vsub.f32 %v9635_v47, %v9665_v57  ;;  %v2993_v36 = vsub.f32 %v9640_v56, %v9665_v57  ;;  %v2994_v44 = vsub.f32 %v9645_v6, %v9665_v57  ;;  %v9705_v47 = vld [vmem:[%s11256_s4 + $0x5] ss:$0 sm:$0xff] }
 0x8d0   :  { %v2982_v19 = vmax.f32 %v2981_v11, 0.0  ;;  %v2995_v27 = vsub.f32 %v9650_v62, %v9665_v57  ;;  %v2996_v55 = vsub.f32 %v9655_v5, %v9665_v57  ;;  %v2997_v14 = vsub.f32 %v9660_v24, %v9665_v57 }
 0x8d2   :  { %v2999_v60 = vadd.f32 1e-05, %v2982_v19 }
 0x8d4   :  { %8285 = vrsqrt.f32 %v2999_v60 }
 0x8de   :  { %v9700_v18 = vpop.eup %8285 }
 0x8df   :  { %v3016_v56 = vmul.f32 %v9700_v18, %v2998_v4  ;;  %v3001_v61 = vmul.f32 %v9700_v18, %v2983_v30  ;;  %v3002_v16 = vmul.f32 %v9700_v18, %v2984_v50  ;;  %v3003_v20 = vmul.f32 %v9700_v18, %v2985_v1 }
 0x8e0   :  { %v3004_v2 = vmul.f32 %v9700_v18, %v2986_v9  ;;  %v3005_v21 = vmul.f32 %v9700_v18, %v2987_v59  ;;  %v3006_v42 = vmul.f32 %v9700_v18, %v2988_v63  ;;  %v3007_v43 = vmul.f32 %v9700_v18, %v2989_v33 }
 0x8e1   :  { %v9721_v45 = vmul.f32 %v9705_v47, %v3016_v56  ;;  %v3021_v38 = vmul.f32 %v9705_v47, %v3001_v61  ;;  %v3022_v34 = vmul.f32 %v9705_v47, %v3002_v16  ;;  %v3023_v7 = vmul.f32 %v9705_v47, %v3003_v20 }
 0x8e2   :  { %v3024_v52 = vmul.f32 %v9705_v47, %v3004_v2  ;;  %v3025_v49 = vmul.f32 %v9705_v47, %v3005_v21  ;;  %v3026_v37 = vmul.f32 %v9705_v47, %v3006_v42  ;;  %v3008_v54 = vmul.f32 %v9700_v18, %v2990_v15 }
 0x8e3   :  { %v3041_v41 = vadd.f32 %v9714_v31, %v3021_v38  ;;  %v3042_v46 = vadd.f32 %v9714_v31, %v3022_v34  ;;  %v3043_v39 = vadd.f32 %v9714_v31, %v3023_v7  ;;  %v3027_v13 = vmul.f32 %v9705_v47, %v3007_v43 }
 0x8e4   :  { %v3044_v4 = vadd.f32 %v9714_v31, %v3024_v52  ;;  %v3045_v30 = vadd.f32 %v9714_v31, %v3025_v49  ;;  %v3046_v50 = vadd.f32 %v9714_v31, %v3026_v37  ;;  %v3028_v1 = vmul.f32 %v9705_v47, %v3008_v54 }
 0x8e5   :  { %vm3057_vm12 = vcmp.ge.f32.partialorder %v3041_v41, 0.0  ;;  %vm3058_vm13 = vcmp.ge.f32.partialorder %v3042_v46, 0.0  ;;  %v3073_v9 = vmul.f32 0.01, %v3041_v41  ;;  %v3074_v59 = vmul.f32 0.01, %v3042_v46 }
 0x8e6   :  { %vm3059_vm14 = vcmp.ge.f32.partialorder %v3043_v39, 0.0  ;;  %vm3060_vm15 = vcmp.ge.f32.partialorder %v3044_v4, 0.0  ;;  %v3075_v11 = vmul.f32 0.01, %v3043_v39  ;;  %v3076_v63 = vmul.f32 0.01, %v3044_v4 }
 0x8e7   :  { %v3089_v33 = vsel %vm3057_vm12, %v3041_v41, %v3073_v9  ;;  %v3090_v15 = vsel %vm3058_vm13, %v3042_v46, %v3074_v59  ;;  %vm3061_vm8 = vcmp.ge.f32.partialorder %v3045_v30, 0.0  ;;  %vm3062_vm10 = vcmp.ge.f32.partialorder %v3046_v50, 0.0 }
 0x8e8   :  { %v3105_v19 = vpack.c.bf16 %v3090_v15, %v3089_v33  ;;  %v3091_v60 = vsel %vm3059_vm14, %v3043_v39, %v3075_v11  ;;  %v3092_v56 = vsel %vm3060_vm15, %v3044_v4, %v3076_v63  ;;  %v3077_v61 = vmul.f32 0.01, %v3045_v30 }
 0x8e9   :  { %v3106_v16 = vpack.c.bf16 %v3092_v56, %v3091_v60  ;;  %v3078_v20 = vmul.f32 0.01, %v3046_v50  ;;  %v3047_v2 = vadd.f32 %v9714_v31, %v3027_v13  ;;  %v3048_v21 = vadd.f32 %v9714_v31, %v3028_v1 }
 0x8ea   :  { %7980 = vmatprep.mubr.bf16.mxu0 %v3105_v19  ;;  %v3093_v42 = vsel %vm3061_vm8, %v3045_v30, %v3077_v61  ;;  %v3009_v43 = vmul.f32 %v9700_v18, %v2991_v32  ;;  %v3010_v38 = vmul.f32 %v9700_v18, %v2992_v12  ;;  %v3011_v34 = vmul.f32 %v9700_v18, %v2993_v36 }
 0x8eb   :  { %7981 = vmatmul.mubr.bf16.vlgmr.msra.gmra.mrb[20].mxu0 %v3106_v16  ;;  %v3094_v7 = vsel %vm3062_vm10, %v3046_v50, %v3078_v20  ;;  %vm3063_vm11 = vcmp.ge.f32.partialorder %v3047_v2, 0.0  ;;  %vm3064_vm12 = vcmp.ge.f32.partialorder %v3048_v21, 0.0  ;;  %v3079_v52 = vmul.f32 0.01, %v3047_v2 }
 0x8ec   :  { %v3107_v49 = vpack.c.bf16 %v3094_v7, %v3093_v42  ;;  %v3080_v37 = vmul.f32 0.01, %v3048_v21  ;;  %v3029_v54 = vmul.f32 %v9705_v47, %v3009_v43  ;;  %v3030_v41 = vmul.f32 %v9705_v47, %v3010_v38  ;;  %4113 = vmatpush1.bf16.msra.mxu0 %v9353_v53 }
 0x8ed   :  { %v3095_v46 = vsel %vm3063_vm11, %v3047_v2, %v3079_v52  ;;  %v3012_v32 = vmul.f32 %v9700_v18, %v2994_v44  ;;  %v3031_v12 = vmul.f32 %v9705_v47, %v3011_v34  ;;  %v3013_v36 = vmul.f32 %v9700_v18, %v2995_v27 }
 0x8ee   :  { %7984 = vmatprep.mubr.bf16.mxu0 %v3107_v49  ;;  %v3096_v39 = vsel %vm3064_vm12, %v3048_v21, %v3080_v37  ;;  %v3049_v13 = vadd.f32 %v9714_v31, %v3029_v54  ;;  %v3050_v4 = vadd.f32 %v9714_v31, %v3030_v41  ;;  %v3014_v53 = vmul.f32 %v9700_v18, %v2996_v55 }
 0x8ef   :  { %v3108_v6 = vpack.c.bf16 %v3096_v39, %v3095_v46  ;;  %v3032_v44 = vmul.f32 %v9705_v47, %v3012_v32  ;;  %v3051_v30 = vadd.f32 %v9714_v31, %v3031_v12  ;;  %v3033_v62 = vmul.f32 %v9705_v47, %v3013_v36 }
 0x8f0   :  { %vm3065_vm13 = vcmp.ge.f32.partialorder %v3049_v13, 0.0  ;;  %vm3066_vm14 = vcmp.ge.f32.partialorder %v3050_v4, 0.0  ;;  %v3081_v27 = vmul.f32 0.01, %v3049_v13  ;;  %v3082_v50 = vmul.f32 0.01, %v3050_v4 }
 0x8f1   :  { %v3052_v1 = vadd.f32 %v9714_v31, %v3032_v44  ;;  %vm3067_vm15 = vcmp.ge.f32.partialorder %v3051_v30, 0.0  ;;  %v3083_v9 = vmul.f32 0.01, %v3051_v30  ;;  %v3034_v59 = vmul.f32 %v9705_v47, %v3014_v53 }
 0x8f2   :  { %v3097_v5 = vsel %vm3065_vm13, %v3049_v13, %v3081_v27  ;;  %v3098_v11 = vsel %vm3066_vm14, %v3050_v4, %v3082_v50  ;;  %v3053_v55 = vadd.f32 %v9714_v31, %v3033_v62  ;;  %v3015_v63 = vmul.f32 %v9700_v18, %v2997_v14 }
 0x8f3   :  { %7985 = vmatmul.mubr.bf16.gmra.mrb[24].mxu0 %v3108_v6  ;;  %v3109_v33 = vpack.c.bf16 %v3098_v11, %v3097_v5  ;;  %vm3068_vm8 = vcmp.ge.f32.partialorder %v3052_v1, 0.0  ;;  %v3084_v15 = vmul.f32 0.01, %v3052_v1  ;;  %v3099_v19 = vsel %vm3067_vm15, %v3051_v30, %v3083_v9 }
 0x8f4   :  { %v3054_v60 = vadd.f32 %v9714_v31, %v3034_v59  ;;  %vm3069_vm10 = vcmp.ge.f32.partialorder %v3053_v55, 0.0  ;;  %v3085_v56 = vmul.f32 0.01, %v3053_v55  ;;  %v3035_v61 = vmul.f32 %v9705_v47, %v3015_v63 }
 0x8f5   :  { %7988 = vmatprep.mubr.bf16.mxu0 %v3109_v33  ;;  %v3100_v16 = vsel %vm3068_vm8, %v3052_v1, %v3084_v15  ;;  %v3056_v20 = vadd.f32 %v9714_v31, %v9721_v45 }
 0x8f6   :  { %v3110_v2 = vpack.c.bf16 %v3100_v16, %v3099_v19  ;;  %vm3070_vm11 = vcmp.ge.f32.partialorder %v3054_v60, 0.0  ;;  %v3086_v24 = vmul.f32 0.01, %v3054_v60  ;;  %v3101_v57 = vsel %vm3069_vm10, %v3053_v55, %v3085_v56 }
 0x8f7   :  { %v3055_v14 = vadd.f32 %v9714_v31, %v3035_v61  ;;  %vm3072_vm12 = vcmp.ge.f32.partialorder %v3056_v20, 0.0  ;;  %v3088_v18 = vmul.f32 0.01, %v3056_v20 }
 0x8f8   :  { %v3102_v21 = vsel %vm3070_vm11, %v3054_v60, %v3086_v24 }
 0x8f9   :  { %v3111_v42 = vpack.c.bf16 %v3102_v21, %v3101_v57  ;;  %vm3071_vm13 = vcmp.ge.f32.partialorder %v3055_v14, 0.0  ;;  %v3087_v43 = vmul.f32 0.01, %v3055_v14  ;;  %v3104_v38 = vsel %vm3072_vm12, %v3056_v20, %v3088_v18 }
 0x8fb   :  { %7989 = vmatmul.mubr.bf16.gmra.mrb[28].mxu0 %v3110_v2  ;;  %v3103_v47 = vsel %vm3071_vm13, %v3055_v14, %v3087_v43 }
 0x8fc   :  { %7992 = vmatprep.mubr.bf16.mxu0 %v3111_v42  ;;  %v3112_v34 = vpack.c.bf16 %v3104_v38, %v3103_v47 }
 0x903   :  { %7993 = vmatmul.mubr.bf16.gmra.mrb[32].mxu0 %v3112_v34 }
 0x904   :  { %4144 = vmatprep.mubr.bf16.mxu0 %v8553_v3 }
 0x9be   :  { %v9777_v45 = vpop.f32.mrb[20].mxu0 }
 0x9bf   :  { %v9779_v7 = vpop.f32.mrb[21].mxu0  ;;  %v3299_v3 = vmul.f32 %v9777_v45, %v9777_v45 }
 0x9c0   :  { %v9781_v52 = vpop.f32.mrb[22].mxu0  ;;  %v3297_v49 = vmul.f32 %v9779_v7, %v9779_v7 }
 0x9c1   :  { %v9783_v31 = vpop.f32.mrb[23].mxu0  ;;  %v3300_v32 = vmul.f32 %v9781_v52, %v9781_v52 }
 0x9c2   :  { %v3276_v37 = vadd.f32 %v9783_v31, %v9779_v7  ;;  %v3298_v54 = vmul.f32 %v9783_v31, %v9783_v31 }
 0x9c4   :  { %v3277_v41 = vadd.f32 %v9777_v45, %v3276_v37  ;;  %v3313_v46 = vadd.f32 %v3298_v54, %v3297_v49 }
 0x9c6   :  { %v3314_v12 = vadd.f32 %v3313_v46, %v3299_v3  ;;  %v9796_v36 = vpop.f32.mrb[24].mxu0  ;;  %v3278_v39 = vadd.f32 %v9781_v52, %v3277_v41 }
 0x9c7   :  { %v9799_v13 = vpop.f32.mrb[25].mxu0  ;;  %v3303_v1 = vmul.f32 %v9796_v36, %v9796_v36 }
 0x9c8   :  { %v3279_v4 = vadd.f32 %v3278_v39, %v9799_v13  ;;  %v3301_v53 = vmul.f32 %v9799_v13, %v9799_v13  ;;  %v3315_v6 = vadd.f32 %v3314_v12, %v3300_v32  ;;  %v9804_v44 = vpop.f32.mrb[26].mxu0 }
 0x9c9   :  { %v9806_v30 = vpop.f32.mrb[27].mxu0  ;;  %v3304_v5 = vmul.f32 %v9804_v44, %v9804_v44 }
 0x9ca   :  { %v3316_v62 = vadd.f32 %v3315_v6, %v3301_v53  ;;  %v3280_v27 = vadd.f32 %v3279_v4, %v9806_v30  ;;  %v3302_v50 = vmul.f32 %v9806_v30, %v9806_v30 }
 0x9cc   :  { %v3281_v9 = vadd.f32 %v9796_v36, %v3280_v27  ;;  %v3317_v59 = vadd.f32 %v3316_v62, %v3302_v50 }
 0x9ce   :  { %v3318_v11 = vadd.f32 %v3317_v59, %v3303_v1  ;;  %v9816_v55 = vpop.f32.mrb[28].mxu0  ;;  %v3282_v63 = vadd.f32 %v9804_v44, %v3281_v9 }
 0x9cf   :  { %v9819_v33 = vpop.f32.mrb[29].mxu0  ;;  %v3307_v24 = vmul.f32 %v9816_v55, %v9816_v55 }
 0x9d0   :  { %v3283_v15 = vadd.f32 %v3282_v63, %v9819_v33  ;;  %v3305_v19 = vmul.f32 %v9819_v33, %v9819_v33  ;;  %v3319_v60 = vadd.f32 %v3318_v11, %v3304_v5  ;;  %v9824_v56 = vpop.f32.mrb[30].mxu0 }
 0x9d1   :  { %v9826_v61 = vpop.f32.mrb[31].mxu0  ;;  %v3308_v18 = vmul.f32 %v9824_v56, %v9824_v56 }
 0x9d2   :  { %v3320_v16 = vadd.f32 %v3319_v60, %v3305_v19  ;;  %v3284_v20 = vadd.f32 %v3283_v15, %v9826_v61  ;;  %v3306_v2 = vmul.f32 %v9826_v61, %v9826_v61 }
 0x9d4   :  { %v3285_v57 = vadd.f32 %v9816_v55, %v3284_v20  ;;  %v3321_v14 = vadd.f32 %v3320_v16, %v3306_v2 }
 0x9d6   :  { %v3322_v21 = vadd.f32 %v3321_v14, %v3307_v24  ;;  %v9836_v42 = vpop.f32.mrb[32].mxu0  ;;  %v3286_v43 = vadd.f32 %v9824_v56, %v3285_v57 }
 0x9d7   :  { %v9839_v38 = vpop.f32.mrb[33].mxu0  ;;  %v3311_v32 = vmul.f32 %v9836_v42, %v9836_v42 }
 0x9d8   :  { %v3287_v47 = vadd.f32 %v3286_v43, %v9839_v38  ;;  %v3309_v34 = vmul.f32 %v9839_v38, %v9839_v38  ;;  %v3323_v49 = vadd.f32 %v3322_v21, %v3308_v18  ;;  %v9844_v37 = vpop.f32.mrb[34].mxu0 }
 0x9d9   :  { %v3262_v54 = vpop.f32.mrb[35].mxu0  ;;  %v3312_v4 = vmul.f32 %v9844_v37, %v9844_v37 }
 0x9da   :  { %v3324_v3 = vadd.f32 %v3323_v49, %v3309_v34  ;;  %v3288_v41 = vadd.f32 %v3287_v47, %v3262_v54  ;;  %v3310_v46 = vmul.f32 %v3262_v54, %v3262_v54 }
 0x9dc   :  { %v3289_v12 = vadd.f32 %v9836_v42, %v3288_v41  ;;  %v3325_v39 = vadd.f32 %v3324_v3, %v3310_v46 }
 0x9de   :  { %v3290_v53 = vadd.f32 %v9844_v37, %v3289_v12  ;;  %v3326_v6 = vadd.f32 %v3325_v39, %v3311_v32  ;;  %v9901_v39 = vld [vmem:[%s11256_s4 + $0x8] ss:$0 sm:$0xff] }
 0x9e0   :  { %v3291_v62 = vrot.slane %v3290_v53, 4  ;;  %v3327_v27 = vadd.f32 %v3326_v6, %v3312_v4 }
 0x9e2   :  { %v3292_v50 = vadd.f32 %v3291_v62, %v3290_v53  ;;  %v3328_v1 = vrot.slane %v3327_v27, 4 }
 0x9e4   :  { %v3293_v9 = vrot.slane %v3292_v50, 2  ;;  %v3329_v59 = vadd.f32 %v3328_v1, %v3327_v27 }
 0x9e6   :  { %v3294_v5 = vadd.f32 %v3293_v9, %v3292_v50  ;;  %v3330_v11 = vrot.slane %v3329_v59, 2 }
 0x9e8   :  { %v3295_v63 = vrot.slane %v3294_v5, 1  ;;  %v3331_v15 = vadd.f32 %v3330_v11, %v3329_v59 }
 0x9ea   :  { %v3296_v19 = vadd.f32 %v3295_v63, %v3294_v5  ;;  %v3332_v60 = vrot.slane %v3331_v15, 1 }
 0x9ec   :  { %v3333_v16 = vadd.f32 %v3332_v60, %v3331_v15  ;;  %v9852_v20 = vmul.f32 0.0078125, %v3296_v19 }
 0x9ee   :  { %v3335_v2 = vmul.f32 0.0078125, %v3333_v16  ;;  %v3336_v24 = vmul.f32 %v9852_v20, %v9852_v20  ;;  %v3352_v57 = vsub.f32 %v3262_v54, %v9852_v20  ;;  %v3340_v14 = vsub.f32 %v9783_v31, %v9852_v20  ;;  %v9921_v16 = vld [vmem:[%s11256_s4 + $0x9] ss:$0 sm:$0xff] }
 0x9ef   :  { %v3339_v18 = vsub.f32 %v9779_v7, %v9852_v20  ;;  %v3347_v21 = vsub.f32 %v9819_v33, %v9852_v20  ;;  %v3348_v43 = vsub.f32 %v9826_v61, %v9852_v20  ;;  %v3341_v47 = vsub.f32 %v9777_v45, %v9852_v20 }
 0x9f0   :  { %v3337_v34 = vsub.f32 %v3335_v2, %v3336_v24  ;;  %v3349_v49 = vsub.f32 %v9816_v55, %v9852_v20  ;;  %v3342_v54 = vsub.f32 %v9781_v52, %v9852_v20  ;;  %v3350_v31 = vsub.f32 %v9824_v56, %v9852_v20 }
 0x9f1   :  { %v3343_v7 = vsub.f32 %v9799_v13, %v9852_v20  ;;  %v3351_v33 = vsub.f32 %v9839_v38, %v9852_v20  ;;  %v3344_v61 = vsub.f32 %v9806_v30, %v9852_v20  ;;  %v3345_v45 = vsub.f32 %v9796_v36, %v9852_v20  ;;  %v9892_v30 = vld [vmem:[%s11256_s4 + $0x7] ss:$0 sm:$0xff] }
 0x9f2   :  { %v3338_v3 = vmax.f32 %v3337_v34, 0.0  ;;  %v3353_v55 = vsub.f32 %v9836_v42, %v9852_v20  ;;  %v3346_v52 = vsub.f32 %v9804_v44, %v9852_v20  ;;  %v3354_v56 = vsub.f32 %v9844_v37, %v9852_v20 }
 0x9f4   :  { %v3355_v13 = vadd.f32 1e-05, %v3338_v3 }
 0x9f6   :  { %8287 = vrsqrt.f32 %v3355_v13 }
 0xa00   :  { %v9887_v41 = vpop.eup %8287 }
 0xa01   :  { %v3370_v38 = vmul.f32 %v9887_v41, %v3352_v57  ;;  %v3358_v46 = vmul.f32 %v9887_v41, %v3340_v14  ;;  %v3357_v32 = vmul.f32 %v9887_v41, %v3339_v18  ;;  %v3365_v12 = vmul.f32 %v9887_v41, %v3347_v21 }
 0xa02   :  { %v3366_v4 = vmul.f32 %v9887_v41, %v3348_v43  ;;  %v3359_v53 = vmul.f32 %v9887_v41, %v3341_v47  ;;  %v3367_v6 = vmul.f32 %v9887_v41, %v3349_v49  ;;  %v3360_v62 = vmul.f32 %v9887_v41, %v3342_v54 }
 0xa03   :  { %v3378_v27 = vmul.f32 %v9892_v30, %v3358_v46  ;;  %v3377_v50 = vmul.f32 %v9892_v30, %v3357_v32  ;;  %v3385_v1 = vmul.f32 %v9892_v30, %v3365_v12  ;;  %v3368_v60 = vmul.f32 %v9887_v41, %v3350_v31 }
 0xa04   :  { %v3386_v9 = vmul.f32 %v9892_v30, %v3366_v4  ;;  %v3379_v59 = vmul.f32 %v9892_v30, %v3359_v53  ;;  %v3387_v5 = vmul.f32 %v9892_v30, %v3367_v6  ;;  %v3380_v11 = vmul.f32 %v9892_v30, %v3360_v62 }
 0xa05   :  { %v3398_v63 = vadd.f32 %v9901_v39, %v3378_v27  ;;  %v3397_v15 = vadd.f32 %v9901_v39, %v3377_v50  ;;  %v3405_v19 = vadd.f32 %v9901_v39, %v3385_v1  ;;  %v3390_v13 = vmul.f32 %v9892_v30, %v3370_v38 }
 0xa06   :  { %v3406_v2 = vadd.f32 %v9901_v39, %v3386_v9  ;;  %v3399_v24 = vadd.f32 %v9901_v39, %v3379_v59  ;;  %v3407_v57 = vadd.f32 %v9901_v39, %v3387_v5  ;;  %v3400_v14 = vadd.f32 %v9901_v39, %v3380_v11 }
 0xa07   :  { %vm3414_vm14 = vcmp.ge.f32.partialorder %v3398_v63, 0.0  ;;  %v3430_v18 = vmul.f32 0.01, %v3398_v63  ;;  %vm3413_vm15 = vcmp.ge.f32.partialorder %v3397_v15, 0.0  ;;  %v3429_v21 = vmul.f32 0.01, %v3397_v15 }
 0xa08   :  { %vm3421_vm8 = vcmp.ge.f32.partialorder %v3405_v19, 0.0  ;;  %v3437_v43 = vmul.f32 0.01, %v3405_v19  ;;  %vm3422_vm10 = vcmp.ge.f32.partialorder %v3406_v2, 0.0  ;;  %v3438_v47 = vmul.f32 0.01, %v3406_v2 }
 0xa09   :  { %v3446_v34 = vsel %vm3414_vm14, %v3398_v63, %v3430_v18  ;;  %v3445_v49 = vsel %vm3413_vm15, %v3397_v15, %v3429_v21  ;;  %vm3415_vm11 = vcmp.ge.f32.partialorder %v3399_v24, 0.0  ;;  %v3431_v54 = vmul.f32 0.01, %v3399_v24 }
 0xa0a   :  { %v3467_v31 = vmul.f32 %v9921_v16, %v3446_v34  ;;  %v3466_v3 = vmul.f32 %v9921_v16, %v3445_v49  ;;  %v3453_v46 = vsel %vm3421_vm8, %v3405_v19, %v3437_v43  ;;  %v3454_v32 = vsel %vm3422_vm10, %v3406_v2, %v3438_v47 }
 0xa0b   :  { %v3447_v12 = vsel %vm3415_vm11, %v3399_v24, %v3431_v54  ;;  %vm3423_vm12 = vcmp.ge.f32.partialorder %v3407_v57, 0.0  ;;  %v3439_v4 = vmul.f32 0.01, %v3407_v57  ;;  %vm3416_vm13 = vcmp.ge.f32.partialorder %v3400_v14, 0.0 }
 0xa0c   :  { %3484 = vadd.xlane.f32.xlu0 %v3467_v31  ;;  %3482 = vadd.xlane.f32.xlu1 %v3466_v3  ;;  %v3432_v53 = vmul.f32 0.01, %v3400_v14  ;;  %v3388_v6 = vmul.f32 %v9892_v30, %v3368_v60  ;;  %v3361_v62 = vmul.f32 %v9887_v41, %v3343_v7  ;;  %v3369_v27 = vmul.f32 %v9887_v41, %v3351_v33 }
 0xa0d   :  { %v3362_v50 = vmul.f32 %v9887_v41, %v3344_v61  ;;  %v3474_v1 = vmul.f32 %v9921_v16, %v3453_v46  ;;  %v3475_v38 = vmul.f32 %v9921_v16, %v3454_v32  ;;  %v3363_v9 = vmul.f32 %v9887_v41, %v3345_v45 }
 0xa0e   :  { %v3468_v59 = vmul.f32 %v9921_v16, %v3447_v12  ;;  %v3455_v5 = vsel %vm3423_vm12, %v3407_v57, %v3439_v4  ;;  %v3408_v11 = vadd.f32 %v9901_v39, %v3388_v6  ;;  %v3381_v7 = vmul.f32 %v9892_v30, %v3361_v62 }
 0xa0f   :  { %v3448_v33 = vsel %vm3416_vm13, %v3400_v14, %v3432_v53  ;;  %v3389_v61 = vmul.f32 %v9892_v30, %v3369_v27  ;;  %v3382_v63 = vmul.f32 %v9892_v30, %v3362_v50  ;;  %v3410_v45 = vadd.f32 %v9901_v39, %v3390_v13 }
 0xa10   :  { %3498 = vadd.xlane.f32.xlu0 %v3474_v1  ;;  %3500 = vadd.xlane.f32.xlu1 %v3475_v38  ;;  %vm3424_vm14 = vcmp.ge.f32.partialorder %v3408_v11, 0.0  ;;  %v3440_v15 = vmul.f32 0.01, %v3408_v11  ;;  %v3401_v36 = vadd.f32 %v9901_v39, %v3381_v7  ;;  %v3476_v19 = vmul.f32 %v9921_v16, %v3455_v5 }
 0xa11   :  { %v3409_v60 = vadd.f32 %v9901_v39, %v3389_v61  ;;  %v3402_v2 = vadd.f32 %v9901_v39, %v3382_v63  ;;  %v3371_v24 = vmul.f32 %v9887_v41, %v3353_v55  ;;  %v3383_v18 = vmul.f32 %v9892_v30, %v3363_v9 }
 0xa12   :  { %v3456_v57 = vsel %vm3424_vm14, %v3408_v11, %v3440_v15  ;;  %v3433_v14 = vmul.f32 0.01, %v3401_v36  ;;  %vm3417_vm15 = vcmp.ge.f32.partialorder %v3401_v36, 0.0  ;;  %v3469_v43 = vmul.f32 %v9921_v16, %v3448_v33 }
 0xa13   :  { %vm3425_vm8 = vcmp.ge.f32.partialorder %v3409_v60, 0.0  ;;  %v3441_v21 = vmul.f32 0.01, %v3409_v60  ;;  %vm3426_vm10 = vcmp.ge.f32.partialorder %v3410_v45, 0.0  ;;  %v3442_v47 = vmul.f32 0.01, %v3410_v45 }
 0xa14   :  { %3486 = vadd.xlane.f32.xlu0 %v3468_v59  ;;  %3502 = vadd.xlane.f32.xlu1 %v3476_v19  ;;  %v3391_v34 = vmul.f32 %v9892_v30, %v3371_v24  ;;  %v3477_v49 = vmul.f32 %v9921_v16, %v3456_v57  ;;  %v3434_v42 = vmul.f32 0.01, %v3402_v2  ;;  %v3364_v55 = vmul.f32 %v9887_v41, %v3346_v52 }
 0xa15   :  { %v3372_v54 = vmul.f32 %v9887_v41, %v3354_v56  ;;  %v3449_v31 = vsel %vm3417_vm15, %v3401_v36, %v3433_v14  ;;  %v3457_v3 = vsel %vm3425_vm8, %v3409_v60, %v3441_v21  ;;  %vm3418_vm11 = vcmp.ge.f32.partialorder %v3402_v2, 0.0 }
 0xa16   :  { %v3403_v13 = vadd.f32 %v9901_v39, %v3383_v18  ;;  %v3411_v46 = vadd.f32 %v9901_v39, %v3391_v34  ;;  %v3384_v32 = vmul.f32 %v9892_v30, %v3364_v55  ;;  %v3470_v52 = vmul.f32 %v9921_v16, %v3449_v31 }
 0xa17   :  { %v3392_v44 = vmul.f32 %v9892_v30, %v3372_v54  ;;  %v3478_v12 = vmul.f32 %v9921_v16, %v3457_v3  ;;  %v3450_v37 = vsel %vm3418_vm11, %v3402_v2, %v3434_v42  ;;  %v3458_v20 = vsel %vm3426_vm10, %v3410_v45, %v3442_v47 }
 0xa18   :  { %3488 = vadd.xlane.f32.xlu0 %v3469_v43  ;;  %3504 = vadd.xlane.f32.xlu1 %v3477_v49  ;;  %v3435_v56 = vmul.f32 0.01, %v3403_v13  ;;  %v3443_v41 = vmul.f32 0.01, %v3411_v46  ;;  %v3404_v4 = vadd.f32 %v9901_v39, %v3384_v32  ;;  %vm3419_vm12 = vcmp.ge.f32.partialorder %v3403_v13, 0.0 }
 0xa19   :  { %v3412_v53 = vadd.f32 %v9901_v39, %v3392_v44  ;;  %vm3427_vm13 = vcmp.ge.f32.partialorder %v3411_v46, 0.0  ;;  %v3471_v6 = vmul.f32 %v9921_v16, %v3450_v37  ;;  %v3479_v30 = vmul.f32 %v9921_v16, %v3458_v20 }
 0xa1a   :  { %v3451_v62 = vsel %vm3419_vm12, %v3403_v13, %v3435_v56  ;;  %v3459_v27 = vsel %vm3427_vm13, %v3411_v46, %v3443_v41  ;;  %v3436_v50 = vmul.f32 0.01, %v3404_v4  ;;  %vm3420_vm14 = vcmp.ge.f32.partialorder %v3404_v4, 0.0 }
 0xa1b   :  { %v3444_v1 = vmul.f32 0.01, %v3412_v53  ;;  %vm3428_vm15 = vcmp.ge.f32.partialorder %v3412_v53, 0.0  ;;  %v3472_v38 = vmul.f32 %v9921_v16, %v3451_v62  ;;  %v3480_v39 = vmul.f32 %v9921_v16, %v3459_v27 }
 0xa1c   :  { %3490 = vadd.xlane.f32.xlu0 %v3470_v52  ;;  %3506 = vadd.xlane.f32.xlu1 %v3478_v12  ;;  %v3452_v9 = vsel %vm3420_vm14, %v3404_v4, %v3436_v50 }
 0xa1d   :  { %v3460_v59 = vsel %vm3428_vm15, %v3412_v53, %v3444_v1  ;;  %v3473_v5 = vmul.f32 %v9921_v16, %v3452_v9 }
 0xa1e   :  { %v3481_v11 = vmul.f32 %v9921_v16, %v3460_v59 }
 0xa20   :  { %3492 = vadd.xlane.f32.xlu0 %v3471_v6  ;;  %3508 = vadd.xlane.f32.xlu1 %v3479_v30 }
 0xa24   :  { %3494 = vadd.xlane.f32.xlu0 %v3472_v38  ;;  %3510 = vadd.xlane.f32.xlu1 %v3480_v39 }
 0xa28   :  { %3496 = vadd.xlane.f32.xlu0 %v3473_v5  ;;  %3512 = vadd.xlane.f32.xlu1 %v3481_v11 }
 0xa99   :  { %v3485_v7 = vpop.xlane.xlu0 %3484  ;;  %v3483_v33 = vpop.xlane.xlu1 %3482 }
 0xa9a   :  { %v3537_v57 = vrot.slane %v3485_v7, %v9132_v26  ;;  %v3533_v14 = vrot.slane %v3483_v33, %v9132_v26 }
 0xa9c   :  { %v3594_v3 = vsel %vm1245_vm0, %v3537_v57, %v3533_v14 }
 0xa9d   :  { %v3499_v61 = vpop.xlane.xlu0 %3498  ;;  %v3501_v63 = vpop.xlane.xlu1 %3500 }
 0xa9e   :  { %v3565_v18 = vrot.slane %v3499_v61, %v9132_v26  ;;  %v3569_v21 = vrot.slane %v3501_v63, %v9132_v26 }
 0xaa0   :  { %v3601_v13 = vsel %vm1245_vm0, %v3569_v21, %v3565_v18 }
 0xaa1   :  { %v9981_v15 = vpop.xlane.xlu0 %3486  ;;  %v9983_v36 = vpop.xlane.xlu1 %3502 }
 0xaa2   :  { %v3541_v43 = vrot.slane %v9981_v15, %v9132_v26  ;;  %v3573_v47 = vrot.slane %v9983_v36, %v9132_v26 }
 0xaa4   :  { %v3595_v44 = vsel %vm1247_vm1, %v3541_v43, %v3594_v3  ;;  %v3602_v52 = vsel %vm1247_vm1, %v3573_v47, %v3601_v13 }
 0xaa5   :  { %v9985_v45 = vpop.xlane.xlu0 %3488  ;;  %v9987_v19 = vpop.xlane.xlu1 %3504 }
 0xaa6   :  { %v3545_v34 = vrot.slane %v9985_v45, %v9132_v26  ;;  %v3577_v49 = vrot.slane %v9987_v19, %v9132_v26 }
 0xaa8   :  { %v3596_v20 = vsel %vm1249_vm2, %v3545_v34, %v3595_v44  ;;  %v3603_v56 = vsel %vm1249_vm2, %v3577_v49, %v3602_v52 }
 0xaa9   :  { %v9989_v60 = vpop.xlane.xlu0 %3490  ;;  %v9991_v2 = vpop.xlane.xlu1 %3506 }
 0xaaa   :  { %v3549_v42 = vrot.slane %v9989_v60, %v9132_v26  ;;  %v3581_v55 = vrot.slane %v9991_v2, %v9132_v26 }
 0xaac   :  { %v3597_v41 = vsel %vm1251_vm3, %v3549_v42, %v3596_v20  ;;  %v3604_v4 = vsel %vm1251_vm3, %v3581_v55, %v3603_v56 }
 0xaad   :  { %v9993_v24 = vpop.xlane.xlu0 %3492  ;;  %v9995_v16 = vpop.xlane.xlu1 %3508 }
 0xaae   :  { %v3553_v46 = vrot.slane %v9993_v24, %v9132_v26  ;;  %v3585_v32 = vrot.slane %v9995_v16, %v9132_v26 }
 0xab0   :  { %v3598_v27 = vsel %vm1253_vm4, %v3553_v46, %v3597_v41  ;;  %v3605_v50 = vsel %vm1253_vm4, %v3585_v32, %v3604_v4 }
 0xab1   :  { %v10013_v54 = vpop.xlane.xlu0 %3494  ;;  %v10015_v31 = vpop.xlane.xlu1 %3510 }
 0xab2   :  { %v3557_v12 = vrot.slane %v10013_v54, %v9132_v26  ;;  %v3589_v37 = vrot.slane %v10015_v31, %v9132_v26 }
 0xab4   :  { %v3599_v1 = vsel %vm1255_vm5, %v3557_v12, %v3598_v27  ;;  %v3606_v38 = vsel %vm1255_vm5, %v3589_v37, %v3605_v50 }
 0xab5   :  { %v10033_v53 = vpop.xlane.xlu0 %3496  ;;  %v10035_v6 = vpop.xlane.xlu1 %3512 }
 0xab6   :  { %v3561_v30 = vrot.slane %v10033_v53, %v9132_v26  ;;  %v3593_v62 = vrot.slane %v10035_v6, %v9132_v26 }
 0xab8   :  { %v3600_v39 = vsel %vm1257_vm6, %v3561_v30, %v3599_v1  ;;  %v3607_v9 = vsel %vm1257_vm6, %v3593_v62, %v3606_v38 }
 0xab9   :  { %v3610_v59 = vsel %vm1268_vm7, %v3600_v39, -inf  ;;  %v3613_v5 = vsel %vm1268_vm7, %v3607_v9, -inf }
 0xaba   :  { %3611 = vmax.xlane.f32.xlu0 %v3610_v59  ;;  %3614 = vmax.xlane.f32.xlu1 %v3613_v5 }
 0xb47   :  { %v10049_v11 = vpop.xlane.xlu0 %3611  ;;  %v10055_v18 = vpop.xlane.xlu1 %3614 }
 0xb48   :  { %v3621_v57 = vrot.slane %v10049_v11, %v8654_v10  ;;  %v3625_v14 = vrot.slane %v10049_v11, %v9213_v23  ;;  %v3653_v49 = vrot.slane %v10055_v18, %v8654_v10  ;;  %v3657_v42 = vrot.slane %v10055_v18, %v9213_v23 }
 0xb49   :  { %v3629_v55 = vrot.slane %v10049_v11, %v9216_v35  ;;  %v3661_v3 = vrot.slane %v10055_v18, %v9216_v35  ;;  %v3665_v32 = vrot.slane %v10055_v18, %v9219_v17  ;;  %v3637_v37 = vrot.slane %v10049_v11, %v9225_v0 }
 0xb4a   :  { %v3698_v21 = vsub.f32 %v3483_v33, %v3621_v57  ;;  %v3699_v43 = vsub.f32 %v3485_v7, %v3625_v14  ;;  %v3706_v13 = vsub.f32 %v3499_v61, %v3653_v49  ;;  %v3707_v46 = vsub.f32 %v3501_v63, %v3657_v42 }
 0xb4b   :  { %v3633_v7 = vrot.slane %v10049_v11, %v9219_v17  ;;  %v3700_v33 = vsub.f32 %v9981_v15, %v3629_v55  ;;  %v3708_v44 = vsub.f32 %v9983_v36, %v3661_v3  ;;  %v3669_v61 = vrot.slane %v10055_v18, %v9225_v0 }
 0xb4c   :  { %v3714_v47 = vmul.f32 1.442695, %v3698_v21  ;;  %v3716_v34 = vmul.f32 1.442695, %v3699_v43  ;;  %v3730_v52 = vmul.f32 1.442695, %v3706_v13  ;;  %v3709_v63 = vsub.f32 %v9987_v19, %v3665_v32 }
 0xb4d   :  { %v3732_v12 = vmul.f32 1.442695, %v3707_v46  ;;  %v3701_v20 = vsub.f32 %v9985_v45, %v3633_v7  ;;  %v3718_v56 = vmul.f32 1.442695, %v3700_v33  ;;  %v3734_v15 = vmul.f32 1.442695, %v3708_v44 }
 0xb4e   :  { %8289 = vpow2.f32 %v3714_v47  ;;  %v3641_v36 = vrot.slane %v10049_v11, %v9232_v51  ;;  %v3702_v45 = vsub.f32 %v9989_v60, %v3637_v37  ;;  %v3673_v19 = vrot.slane %v10055_v18, %v9232_v51 }
 0xb4f   :  { %8291 = vpow2.f32 %v3716_v34  ;;  %v3720_v30 = vmul.f32 1.442695, %v3701_v20  ;;  %v3710_v62 = vsub.f32 %v9991_v2, %v3669_v61  ;;  %v3736_v27 = vmul.f32 1.442695, %v3709_v63 }
 0xb50   :  { %8293 = vpow2.f32 %v3730_v52  ;;  %v3645_v50 = vrot.slane %v10049_v11, %v9237_v58  ;;  %v3703_v1 = vsub.f32 %v9993_v24, %v3641_v36  ;;  %v3722_v38 = vmul.f32 1.442695, %v3702_v45 }
 0xb51   :  { %8295 = vpow2.f32 %v3732_v12  ;;  %v3677_v60 = vrot.slane %v10055_v18, %v9237_v58  ;;  %v3711_v39 = vsub.f32 %v9995_v16, %v3673_v19  ;;  %v3738_v9 = vmul.f32 1.442695, %v3710_v62 }
 0xb52   :  { %8297 = vpow2.f32 %v3718_v56  ;;  %v3649_v2 = vrot.slane %v10049_v11, %v9242_v40  ;;  %v3704_v24 = vsub.f32 %v10013_v54, %v3645_v50  ;;  %v3724_v57 = vmul.f32 1.442695, %v3703_v1 }
 0xb53   :  { %8299 = vpow2.f32 %v3734_v15  ;;  %v3681_v16 = vrot.slane %v10055_v18, %v9242_v40  ;;  %v3712_v14 = vsub.f32 %v10015_v31, %v3677_v60  ;;  %v3740_v21 = vmul.f32 1.442695, %v3711_v39 }
 0xb54   :  { %8301 = vpow2.f32 %v3720_v30  ;;  %v3705_v11 = vsub.f32 %v10033_v53, %v3649_v2  ;;  %v3726_v54 = vmul.f32 1.442695, %v3704_v24 }
 0xb55   :  { %8303 = vpow2.f32 %v3736_v27  ;;  %v3713_v34 = vsub.f32 %v10035_v6, %v3681_v16  ;;  %v3742_v18 = vmul.f32 1.442695, %v3712_v14 }
 0xb56   :  { %8305 = vpow2.f32 %v3722_v38  ;;  %v3728_v42 = vmul.f32 1.442695, %v3705_v11 }
 0xb57   :  { %8307 = vpow2.f32 %v3738_v9  ;;  %v3744_v53 = vmul.f32 1.442695, %v3713_v34 }
 0xb58   :  { %v10077_v41 = vpop.eup %8289  ;;  %8309 = vpow2.f32 %v3724_v57 }
 0xb59   :  { %v10079_v4 = vpop.eup %8291  ;;  %3763 = vperm.xlu0 %8093, %v10077_v41   ;;  %8311 = vpow2.f32 %v3740_v21 }
 0xb5a   :  { %3766 = vperm.xlu1 %8094, %v10079_v4   ;;  %v10095_v59 = vpop.eup %8293  ;;  %8313 = vpow2.f32 %v3726_v54 }
 0xb5b   :  { %v10097_v5 = vpop.eup %8295  ;;  %8315 = vpow2.f32 %v3742_v18 }
 0xb5c   :  { %v10107_v43 = vpop.eup %8297  ;;  %8317 = vpow2.f32 %v3728_v42 }
 0xb5d   :  { %3790 = vperm.xlu0 %8093, %v10097_v5   ;;  %v10109_v47 = vpop.eup %8299  ;;  %8319 = vpow2.f32 %v3744_v53 }
 0xb5e   :  { %3787 = vperm.xlu1 %8094, %v10095_v59   ;;  %v10115_v49 = vpop.eup %8301 }
 0xb5f   :  { %v10117_v31 = vpop.eup %8303 }
 0xb60   :  { %v10121_v55 = vpop.eup %8305 }
 0xb61   :  { %3793 = vperm.xlu0 %8093, %v10109_v47   ;;  %v10123_v3 = vpop.eup %8307 }
 0xb62   :  { %3769 = vperm.xlu1 %8094, %v10107_v43   ;;  %v10127_v6 = vpop.eup %8309 }
 0xb63   :  { %v10129_v13 = vpop.eup %8311 }
 0xb64   :  { %v10133_v46 = vpop.eup %8313 }
 0xb65   :  { %3796 = vperm.xlu0 %8093, %v10117_v31   ;;  %v10135_v7 = vpop.eup %8315 }
 0xb66   :  { %3772 = vperm.xlu1 %8094, %v10115_v49   ;;  %v10139_v33 = vpop.eup %8317 }
 0xb67   :  { %v10141_v32 = vpop.eup %8319 }
 0xb69   :  { %3799 = vperm.xlu0 %8093, %v10123_v3  }
 0xb6a   :  { %3775 = vperm.xlu1 %8094, %v10121_v55  }
 0xb6d   :  { %3802 = vperm.xlu0 %8093, %v10129_v13  }
 0xb6e   :  { %3778 = vperm.xlu1 %8094, %v10127_v6  }
 0xb71   :  { %3805 = vperm.xlu0 %8093, %v10135_v7  }
 0xb72   :  { %3781 = vperm.xlu1 %8094, %v10133_v46  }
 0xb75   :  { %3808 = vperm.xlu0 %8093, %v10141_v32  }
 0xb76   :  { %3784 = vperm.xlu1 %8094, %v10139_v33  }
 0xbd8   :  { %v3764_v52 = vpop.permute.xlu0 %3763 }
 0xbd9   :  { %v3767_v44 = vpop.permute.xlu1 %3766  ;;  %v3813_v30 = vrot.slane %v3764_v52, %v9132_v26 }
 0xbda   :  { %v3817_v19 = vrot.slane %v3767_v44, %v9132_v26 }
 0xbdc   :  { %v3791_v37 = vpop.permute.xlu0 %3790  ;;  %v3874_v24 = vsel %vm1245_vm0, %v3817_v19, %v3813_v30 }
 0xbdd   :  { %v3788_v12 = vpop.permute.xlu1 %3787  ;;  %v3849_v27 = vrot.slane %v3791_v37, %v9132_v26 }
 0xbde   :  { %v3845_v50 = vrot.slane %v3788_v12, %v9132_v26 }
 0xbe0   :  { %v3794_v56 = vpop.permute.xlu0 %3793  ;;  %v3881_v21 = vsel %vm1245_vm0, %v3849_v27, %v3845_v50 }
 0xbe1   :  { %v3770_v20 = vpop.permute.xlu1 %3769  ;;  %v3853_v38 = vrot.slane %v3794_v56, %v9132_v26 }
 0xbe2   :  { %v3821_v1 = vrot.slane %v3770_v20, %v9132_v26 }
 0xbe3   :  { %v3882_v18 = vsel %vm1247_vm1, %v3853_v38, %v3881_v21 }
 0xbe4   :  { %v3797_v63 = vpop.permute.xlu0 %3796  ;;  %v3875_v11 = vsel %vm1247_vm1, %v3821_v1, %v3874_v24 }
 0xbe5   :  { %v3773_v61 = vpop.permute.xlu1 %3772  ;;  %v3857_v39 = vrot.slane %v3797_v63, %v9132_v26 }
 0xbe6   :  { %v3825_v60 = vrot.slane %v3773_v61, %v9132_v26 }
 0xbe7   :  { %v3883_v44 = vsel %vm1249_vm2, %v3857_v39, %v3882_v18 }
 0xbe8   :  { %v3800_v36 = vpop.permute.xlu0 %3799  ;;  %v3876_v42 = vsel %vm1249_vm2, %v3825_v60, %v3875_v11 }
 0xbe9   :  { %v3776_v15 = vpop.permute.xlu1 %3775  ;;  %v3861_v57 = vrot.slane %v3800_v36, %v9132_v26 }
 0xbea   :  { %v3829_v9 = vrot.slane %v3776_v15, %v9132_v26 }
 0xbeb   :  { %v3884_v37 = vsel %vm1251_vm3, %v3861_v57, %v3883_v44 }
 0xbec   :  { %v3803_v62 = vpop.permute.xlu0 %3802  ;;  %v3877_v52 = vsel %vm1251_vm3, %v3829_v9, %v3876_v42 }
 0xbed   :  { %v3779_v45 = vpop.permute.xlu1 %3778  ;;  %v3865_v54 = vrot.slane %v3803_v62, %v9132_v26 }
 0xbee   :  { %v3833_v16 = vrot.slane %v3779_v45, %v9132_v26 }
 0xbef   :  { %v3885_v63 = vsel %vm1253_vm4, %v3865_v54, %v3884_v37 }
 0xbf0   :  { %v3806_v14 = vpop.permute.xlu0 %3805  ;;  %v3878_v20 = vsel %vm1253_vm4, %v3833_v16, %v3877_v52 }
 0xbf1   :  { %v3782_v2 = vpop.permute.xlu1 %3781  ;;  %v3869_v53 = vrot.slane %v3806_v14, %v9132_v26 }
 0xbf2   :  { %v3837_v34 = vrot.slane %v3782_v2, %v9132_v26 }
 0xbf3   :  { %v3886_v45 = vsel %vm1255_vm5, %v3869_v53, %v3885_v63 }
 0xbf4   :  { %v3809_v56 = vpop.permute.xlu0 %3808  ;;  %v3879_v36 = vsel %vm1255_vm5, %v3837_v34, %v3878_v20 }
 0xbf5   :  { %v3785_v12 = vpop.permute.xlu1 %3784  ;;  %v3873_v15 = vrot.slane %v3809_v56, %v9132_v26 }
 0xbf6   :  { %v3841_v61 = vrot.slane %v3785_v12, %v9132_v26 }
 0xbf7   :  { %v3887_v19 = vsel %vm1257_vm6, %v3873_v15, %v3886_v45 }
 0xbf8   :  { %v3880_v30 = vsel %vm1257_vm6, %v3841_v61, %v3879_v36  ;;  %v3893_v27 = vsel %vm1268_vm7, %v3887_v19, 0.0 }
 0xbf9   :  { %v3890_v62 = vsel %vm1268_vm7, %v3880_v30, 0.0  ;;  %3894 = vadd.xlane.f32.xlu0 %v3893_v27 }
 0xbfa   :  { %3891 = vadd.xlane.f32.xlu1 %v3890_v62 }
 0xc86   :  { %v10179_v1 = vpop.xlane.xlu0 %3894 }
 0xc87   :  { %v10177_v50 = vpop.xlane.xlu1 %3891  ;;  %v3933_v9 = vrot.slane %v10179_v1, %v8654_v10  ;;  %v3937_v2 = vrot.slane %v10179_v1, %v9213_v23  ;;  %v3941_v24 = vrot.slane %v10179_v1, %v9216_v35  ;;  %v3945_v16 = vrot.slane %v10179_v1, %v9219_v17 }
 0xc88   :  { %v3909_v38 = vrot.slane %v10177_v50, %v9216_v35  ;;  %v3905_v60 = vrot.slane %v10177_v50, %v9213_v23  ;;  %v3901_v39 = vrot.slane %v10177_v50, %v8654_v10  ;;  %v3913_v57 = vrot.slane %v10177_v50, %v9219_v17 }
 0xc89   :  { %v3917_v14 = vrot.slane %v10177_v50, %v9225_v0  ;;  %v3949_v21 = vrot.slane %v10179_v1, %v9225_v0  ;;  %v3921_v34 = vrot.slane %v10177_v50, %v9232_v51  ;;  %v3953_v53 = vrot.slane %v10179_v1, %v9232_v51 }
 0xc8a   :  { %8321 = vrcp.f32 %v3909_v38  ;;  %v3925_v37 = vrot.slane %v10177_v50, %v9237_v58 }
 0xc8b   :  { %8323 = vrcp.f32 %v3905_v60 }
 0xc8c   :  { %8325 = vrcp.f32 %v3901_v39 }
 0xc8d   :  { %8327 = vrcp.f32 %v3933_v9 }
 0xc8e   :  { %8329 = vrcp.f32 %v3937_v2 }
 0xc8f   :  { %8331 = vrcp.f32 %v3941_v24 }
 0xc90   :  { %8333 = vrcp.f32 %v3913_v57 }
 0xc91   :  { %8335 = vrcp.f32 %v3945_v16 }
 0xc92   :  { %8337 = vrcp.f32 %v3917_v14 }
 0xc93   :  { %8339 = vrcp.f32 %v3949_v21 }
 0xc94   :  { %v8322_v11 = vpop.eup %8321  ;;  %8341 = vrcp.f32 %v3921_v34 }
 0xc95   :  { %v8324_v54 = vpop.eup %8323  ;;  %v3983_v30 = vmul.f32 %v8322_v11, %v10107_v43  ;;  %8343 = vrcp.f32 %v3953_v53 }
 0xc96   :  { %v8326_v18 = vpop.eup %8325  ;;  %v3981_v42 = vmul.f32 %v8324_v54, %v10079_v4  ;;  %v3957_v4 = vrot.slane %v10179_v1, %v9237_v58  ;;  %8345 = vrcp.f32 %v3925_v37 }
 0xc97   :  { %v8328_v44 = vpop.eup %8327  ;;  %v3979_v52 = vmul.f32 %v8326_v18, %v10077_v41  ;;  %v4012_v39 = vpack.c.bf16 %v3983_v30, %v3983_v30 }
 0xc98   :  { %v8330_v12 = vpop.eup %8329  ;;  %v4011_v20 = vpack.c.bf16 %v3981_v42, %v3981_v42  ;;  %v3995_v56 = vmul.f32 %v8328_v44, %v10095_v59  ;;  %v3929_v59 = vrot.slane %v10177_v50, %v9242_v40  ;;  %8347 = vrcp.f32 %v3957_v4 }
 0xc99   :  { %v8332_v61 = vpop.eup %8331  ;;  %v4010_v63 = vpack.c.bf16 %v3979_v52, %v3979_v52  ;;  %v3997_v15 = vmul.f32 %v8330_v12, %v10097_v5  ;;  %v3961_v5 = vrot.slane %v10179_v1, %v9242_v40  ;;  %v4036_v50 = vunpack.c.l.b16 %v4012_v39 }
 0xc9a   :  { %v4035_v36 = vunpack.c.l.b16 %v4011_v20  ;;  %v4018_v45 = vpack.c.bf16 %v3995_v56, %v3995_v56  ;;  %v8334_v41 = vpop.eup %8333  ;;  %v3999_v27 = vmul.f32 %v8332_v61, %v10109_v47  ;;  %8349 = vrcp.f32 %v3929_v59 }
 0xc9b   :  { %v4034_v19 = vunpack.c.l.b16 %v4010_v63  ;;  %v4019_v62 = vpack.c.bf16 %v3997_v15, %v3997_v15  ;;  %v8336_v38 = vpop.eup %8335  ;;  %v3985_v43 = vmul.f32 %v8334_v41, %v10115_v49  ;;  %8351 = vrcp.f32 %v3961_v5 }
 0xc9c   :  { %4046 = vperm.xlu1 %8094, %v4035_v36   ;;  %v4161_v60 = vunpack.c.l.b16 %v4018_v45  ;;  %v8338_v9 = vpop.eup %8337  ;;  %v4020_v24 = vpack.c.bf16 %v3999_v27, %v3999_v27  ;;  %v4001_v47 = vmul.f32 %v8336_v38, %v10117_v31  ;;  %v8143_v38 = vld [vmem:[#allocation7 + $0x80] sm:$0xff]  }
 0xc9d   :  { %4043 = vperm.xlu0 %8093, %v4034_v19   ;;  %v4162_v2 = vunpack.c.l.b16 %v4019_v62  ;;  %v8340_v57 = vpop.eup %8339  ;;  %v4013_v16 = vpack.c.bf16 %v3985_v43, %v3985_v43  ;;  %v3987_v14 = vmul.f32 %v8338_v9, %v10121_v55  ;;  %7719 = vmatprep.subr.bf16.mxu0 %v8143_v38  ;;  %v8145_v38 = vld [vmem:[#allocation7 + $0x88] sm:$0xff]  }
 0xc9e   :  { %v8342_v1 = vpop.eup %8341  ;;  %v4163_v21 = vunpack.c.l.b16 %v4020_v24  ;;  %v4021_v11 = vpack.c.bf16 %v4001_v47, %v4001_v47  ;;  %v4003_v49 = vmul.f32 %v8340_v57, %v10123_v3 }
 0xc9f   :  { %v8344_v54 = vpop.eup %8343  ;;  %v4037_v34 = vunpack.c.l.b16 %v4013_v16  ;;  %v4014_v18 = vpack.c.bf16 %v3987_v14, %v3987_v14  ;;  %v3989_v31 = vmul.f32 %v8342_v1, %v10127_v6 }
 0xca0   :  { %4170 = vperm.xlu1 %8094, %v4161_v60   ;;  %v8346_v42 = vpop.eup %8345  ;;  %v4164_v53 = vunpack.c.l.b16 %v4021_v11  ;;  %v4022_v44 = vpack.c.bf16 %v4003_v49, %v4003_v49  ;;  %v4005_v52 = vmul.f32 %v8344_v54, %v10129_v13 }
 0xca1   :  { %4173 = vperm.xlu0 %8093, %v4162_v2   ;;  %v4038_v55 = vunpack.c.l.b16 %v4014_v18  ;;  %v4015_v37 = vpack.c.bf16 %v3989_v31, %v3989_v31  ;;  %v3991_v20 = vmul.f32 %v8346_v42, %v10133_v46 }
 0xca2   :  { %v8348_v12 = vpop.eup %8347  ;;  %v4165_v56 = vunpack.c.l.b16 %v4022_v44  ;;  %v4023_v61 = vpack.c.bf16 %v4005_v52, %v4005_v52 }
 0xca3   :  { %v4007_v63 = vmul.f32 %v8348_v12, %v10135_v7  ;;  %v4039_v6 = vunpack.c.l.b16 %v4015_v37  ;;  %v4016_v4 = vpack.c.bf16 %v3991_v20, %v3991_v20 }
 0xca4   :  { %4049 = vperm.xlu1 %8094, %v4036_v50   ;;  %v8350_v3 = vpop.eup %8349  ;;  %v4166_v13 = vunpack.c.l.b16 %v4023_v61 }
 0xca5   :  { %4176 = vperm.xlu0 %8093, %v4163_v21   ;;  %v8352_v15 = vpop.eup %8351  ;;  %v3993_v36 = vmul.f32 %v8350_v3, %v10139_v33  ;;  %v4024_v45 = vpack.c.bf16 %v4007_v63, %v4007_v63  ;;  %v4040_v41 = vunpack.c.l.b16 %v4016_v4 }
 0xca6   :  { %v4009_v30 = vmul.f32 %v8352_v15, %v10141_v32 }
 0xca7   :  { %v4017_v46 = vpack.c.bf16 %v3993_v36, %v3993_v36  ;;  %v4167_v19 = vunpack.c.l.b16 %v4024_v45 }
 0xca8   :  { %4052 = vperm.xlu1 %8094, %v4037_v34   ;;  %v4025_v62 = vpack.c.bf16 %v4009_v30, %v4009_v30 }
 0xca9   :  { %4179 = vperm.xlu0 %8093, %v4164_v53   ;;  %v4041_v7 = vunpack.c.l.b16 %v4017_v46 }
 0xcaa   :  { %v4168_v27 = vunpack.c.l.b16 %v4025_v62  ;;  %v8144_v62 = vld [vmem:[#allocation7 + $0x40] sm:$0xff]  }
 0xcac   :  { %4055 = vperm.xlu1 %8094, %v4038_v55  }
 0xcad   :  { %4182 = vperm.xlu0 %8093, %v4165_v56  }
 0xcb0   :  { %4058 = vperm.xlu1 %8094, %v4039_v6  }
 0xcb1   :  { %4185 = vperm.xlu0 %8093, %v4166_v13  }
 0xcb4   :  { %4061 = vperm.xlu1 %8094, %v4040_v41  }
 0xcb5   :  { %4188 = vperm.xlu0 %8093, %v4167_v19  }
 0xcb8   :  { %4064 = vperm.xlu1 %8094, %v4041_v7  }
 0xcb9   :  { %4191 = vperm.xlu0 %8093, %v4168_v27  }
 0xd1b   :  { %v4047_v59 = vpop.permute.xlu1 %4046 }
 0xd1c   :  { %v4044_v33 = vpop.permute.xlu0 %4043  ;;  %v4073_v57 = vrot.slane %v4047_v59, %v9132_v26 }
 0xd1d   :  { %v4069_v50 = vrot.slane %v4044_v33, %v9132_v26  ;;  %v8146_v33 = vld [vmem:[#allocation7 + $0x48] sm:$0xff]  }
 0xd1f   :  { %v4171_v5 = vpop.permute.xlu1 %4170  ;;  %v4098_v31 = vsel %vm1245_vm0, %v4073_v57, %v4069_v50  ;;  %v8156_v57 = vld [vmem:[#allocation7 + $0x70] sm:$0xff]   ;;  %v8157_v50 = vld [vmem:[#allocation7 + $0xb8] sm:$0xff]  }
 0xd20   :  { %v4174_v60 = vpop.permute.xlu0 %4173  ;;  %v4196_v14 = vrot.slane %v4171_v5, %v9132_v26  ;;  %v8147_v5 = vld [vmem:[#allocation7 + $0x90] sm:$0xff]  }
 0xd21   :  { %v4200_v1 = vrot.slane %v4174_v60, %v9132_v26  ;;  %v8148_v60 = vld [vmem:[#allocation7 + $0x50] sm:$0xff]  }
 0xd23   :  { %v4050_v39 = vpop.permute.xlu1 %4049  ;;  %v4225_v52 = vsel %vm1245_vm0, %v4200_v1, %v4196_v14 }
 0xd24   :  { %v4177_v32 = vpop.permute.xlu0 %4176  ;;  %v4077_v21 = vrot.slane %v4050_v39, %v9132_v26  ;;  %v8149_v39 = vld [vmem:[#allocation7 + $0x98] sm:$0xff]  }
 0xd25   :  { %v4204_v11 = vrot.slane %v4177_v32, %v9132_v26  ;;  %v8150_v32 = vld [vmem:[#allocation7 + $0x58] sm:$0xff]  }
 0xd26   :  { %v4099_v12 = vsel %vm1247_vm1, %v4077_v21, %v4098_v31 }
 0xd27   :  { %v4053_v43 = vpop.permute.xlu1 %4052  ;;  %v4226_v20 = vsel %vm1247_vm1, %v4204_v11, %v4225_v52  ;;  %v8161_v52 = vld [vmem:[#allocation2 + $0xc0] sm:$0xff]  }
 0xd28   :  { %v4180_v9 = vpop.permute.xlu0 %4179  ;;  %v4081_v49 = vrot.slane %v4053_v43, %v9132_v26  ;;  %v8151_v43 = vld [vmem:[#allocation7 + $0xa0] sm:$0xff]  }
 0xd29   :  { %v4208_v54 = vrot.slane %v4180_v9, %v9132_v26  ;;  %v8152_v9 = vld [vmem:[#allocation7 + $0x60] sm:$0xff]  }
 0xd2a   :  { %v4100_v3 = vsel %vm1249_vm2, %v4081_v49, %v4099_v12  ;;  %v8162_v12 = vld [vmem:[#allocation2 + $0x108] sm:$0xff]  }
 0xd2b   :  { %v4056_v2 = vpop.permute.xlu1 %4055  ;;  %v4227_v61 = vsel %vm1249_vm2, %v4208_v54, %v4226_v20  ;;  %v8165_v20 = vld [vmem:[#allocation2 + $0x110] sm:$0xff]  }
 0xd2c   :  { %v4183_v24 = vpop.permute.xlu0 %4182  ;;  %v4085_v34 = vrot.slane %v4056_v2, %v9132_v26  ;;  %v8153_v2 = vld [vmem:[#allocation7 + $0xa8] sm:$0xff]  }
 0xd2d   :  { %v4212_v42 = vrot.slane %v4183_v24, %v9132_v26  ;;  %v8154_v24 = vld [vmem:[#allocation7 + $0x68] sm:$0xff]  }
 0xd2e   :  { %v4101_v63 = vsel %vm1251_vm3, %v4085_v34, %v4100_v3  ;;  %v8166_v3 = vld [vmem:[#allocation2 + $0x150] sm:$0xff]  }
 0xd2f   :  { %v4059_v47 = vpop.permute.xlu1 %4058  ;;  %v4228_v6 = vsel %vm1251_vm3, %v4212_v42, %v4227_v61  ;;  %v8168_v61 = vld [vmem:[#allocation2 + $0x118] sm:$0xff]  }
 0xd30   :  { %v4186_v16 = vpop.permute.xlu0 %4185  ;;  %v4089_v53 = vrot.slane %v4059_v47, %v9132_v26  ;;  %v8155_v47 = vld [vmem:[#allocation7 + $0xb0] sm:$0xff]  }
 0xd31   :  { %v4216_v55 = vrot.slane %v4186_v16, %v9132_v26  ;;  %v8158_v16 = vld [vmem:[#allocation7 + $0x78] sm:$0xff]  }
 0xd32   :  { %v4102_v4 = vsel %vm1253_vm4, %v4089_v53, %v4101_v63  ;;  %v8159_v53 = vld [vmem:[#allocation2 + $0x100] sm:$0xff]   ;;  %v8169_v63 = vld [vmem:[#allocation2 + $0x158] sm:$0xff]  }
 0xd33   :  { %v4062_v18 = vpop.permute.xlu1 %4061  ;;  %v4229_v45 = vsel %vm1253_vm4, %v4216_v55, %v4228_v6  ;;  %v8163_v55 = vld [vmem:[#allocation2 + $0x148] sm:$0xff]   ;;  %7741 = vmatprep.subr.bf16.mxu1 %v8159_v53  ;;  %v8171_v6 = vld [vmem:[#allocation2 + $0x120] sm:$0xff]  }
 0xd34   :  { %v4189_v44 = vpop.permute.xlu0 %4188  ;;  %v4093_v37 = vrot.slane %v4062_v18, %v9132_v26 }
 0xd35   :  { %v4220_v56 = vrot.slane %v4189_v44, %v9132_v26  ;;  %v8160_v44 = vld [vmem:[#allocation2 + $0x140] sm:$0xff]  }
 0xd36   :  { %v4103_v30 = vsel %vm1255_vm5, %v4093_v37, %v4102_v4  ;;  %v8164_v37 = vld [vmem:[#allocation2 + $0xc8] sm:$0xff]   ;;  %v8172_v4 = vld [vmem:[#allocation2 + $0x160] sm:$0xff]  }
 0xd37   :  { %v4065_v15 = vpop.permute.xlu1 %4064  ;;  %v4230_v46 = vsel %vm1255_vm5, %v4220_v56, %v4229_v45  ;;  %v8167_v56 = vld [vmem:[#allocation2 + $0xd0] sm:$0xff]   ;;  %v8175_v45 = vld [vmem:[#allocation2 + $0x168] sm:$0xff]  }
 0xd38   :  { %v4097_v36 = vrot.slane %v4065_v15, %v9132_v26  ;;  %v4192_v13 = vpop.permute.xlu0 %4191  ;;  %v8170_v15 = vld [vmem:[#allocation2 + $0xd8] sm:$0xff]  }
 0xd39   :  { %v4224_v41 = vrot.slane %v4192_v13, %v9132_v26  ;;  %v8174_v13 = vld [vmem:[#allocation2 + $0x128] sm:$0xff]  }
 0xd3a   :  { %v4104_v19 = vsel %vm1257_vm6, %v4097_v36, %v4103_v30  ;;  %v8173_v36 = vld [vmem:[#allocation2 + $0xe0] sm:$0xff]   ;;  %v8176_v30 = vld [vmem:[#allocation2 + $0xe8] sm:$0xff]  }
 0xd3b   :  { %v4105_v7 = vpack.c.b16 %v4104_v19, %v4104_v19  ;;  %v4231_v27 = vsel %vm1257_vm6, %v4224_v41, %v4230_v46  ;;  %v8177_v41 = vld [vmem:[#allocation2 + $0x130] sm:$0xff]  }
 0xd3c   :  { %v4232_v59 = vpack.c.b16 %v4231_v27, %v4231_v27  ;;  %v8178_v46 = vld [vmem:[#allocation2 + $0x170] sm:$0xff]   ;;  %v8182_v27 = vld [vmem:[#allocation2 + $0xf8] sm:$0xff]  }
 0xd3d   :  { %7473 = vmatmul.mubr.msk.bf16.vlgmr.msra.gmra.mrb[36].mxu0 %vm1268_vm7, %v4105_v7  ;;  %v8179_v19 = vld [vmem:[#allocation2 + $0xf0] sm:$0xff]   ;;  %v8181_v7 = vld [vmem:[#allocation2 + $0x178] sm:$0xff]  }
 0xd3e   :  { %7475 = vmatmul.mubr.msk.bf16.vlgmr.msra.gmra.mrb[56].mxu1 %vm1268_vm7, %v4232_v59  ;;  %7720 = vmatpush3.bf16.msra.mxu0 %v8144_v62  ;;  %v8180_v62 = vld [vmem:[#allocation2 + $0x138] sm:$0xff]  }
 0xd3f   :  { %7721 = vmatprep.subr.bf16.mxu0 %v8145_v38  ;;  %7742 = vmatpush3.bf16.msra.mxu1 %v8161_v52 }
 0xd40   :  { %7743 = vmatprep.subr.bf16.mxu1 %v8162_v12 }
 0xd42   :  { %7722 = vmatpush3.bf16.msra.mxu0 %v8146_v33 }
 0xd43   :  { %7723 = vmatprep.subr.bf16.mxu0 %v8147_v5  ;;  %7744 = vmatpush3.bf16.msra.mxu1 %v8164_v37 }
 0xd44   :  { %7745 = vmatprep.subr.bf16.mxu1 %v8165_v20  ;;  %v7492_v20 = vld [vmem:[%s11256_s4 + $0x11] ss:$0 sm:$0xff] }
 0xd46   :  { %7724 = vmatpush3.bf16.msra.mxu0 %v8148_v60 }
 0xd47   :  { %7725 = vmatprep.subr.bf16.mxu0 %v8149_v39  ;;  %7746 = vmatpush3.bf16.msra.mxu1 %v8167_v56 }
 0xd48   :  { %7747 = vmatprep.subr.bf16.mxu1 %v8168_v61  ;;  %v7493_v61 = vld [vmem:[%s11256_s4 + $0x12] ss:$0 sm:$0xff] }
 0xd4a   :  { %7726 = vmatpush3.bf16.msra.mxu0 %v8150_v32 }
 0xd4b   :  { %7727 = vmatprep.subr.bf16.mxu0 %v8151_v43  ;;  %7748 = vmatpush3.bf16.msra.mxu1 %v8170_v15 }
 0xd4c   :  { %7749 = vmatprep.subr.bf16.mxu1 %v8171_v6 }
 0xd4e   :  { %7728 = vmatpush3.bf16.msra.mxu0 %v8152_v9 }
 0xd4f   :  { %7729 = vmatprep.subr.bf16.mxu0 %v8153_v2  ;;  %7750 = vmatpush3.bf16.msra.mxu1 %v8173_v36 }
 0xd50   :  { %7751 = vmatprep.subr.bf16.mxu1 %v8174_v13 }
 0xd52   :  { %7730 = vmatpush3.bf16.msra.mxu0 %v8154_v24 }
 0xd53   :  { %7731 = vmatprep.subr.bf16.mxu0 %v8155_v47  ;;  %7752 = vmatpush3.bf16.msra.mxu1 %v8176_v30 }
 0xd54   :  { %7753 = vmatprep.subr.bf16.mxu1 %v8177_v41 }
 0xd56   :  { %7732 = vmatpush3.bf16.msra.mxu0 %v8156_v57 }
 0xd57   :  { %7733 = vmatprep.subr.bf16.mxu0 %v8157_v50  ;;  %7754 = vmatpush3.bf16.msra.mxu1 %v8179_v19 }
 0xd58   :  { %7755 = vmatprep.subr.bf16.mxu1 %v8180_v62 }
 0xd5a   :  { %7734 = vmatpush3.bf16.msra.mxu0 %v8158_v16 }
 0xd5b   :  { %7996 = vmatprep.subr.bf16.mxu0 %v8160_v44  ;;  %7756 = vmatpush3.bf16.msra.mxu1 %v8182_v27 }
 0xe10   :  { %v4146_v14 = vpop.f32.mrb[36].mxu0 }
 0xe11   :  { %v4273_v1 = vpop.f32.mrb[56].mxu1  ;;  %v4148_v21 = vpop.f32.mrb[37].mxu0 }
 0xe12   :  { %v4280_v11 = vpack.c.bf16 %v4273_v1, %v4146_v14  ;;  %v4275_v49 = vpop.f32.mrb[57].mxu1  ;;  %v4150_v54 = vpop.f32.mrb[38].mxu0 }
 0xe13   :  { %v4281_v34 = vpack.c.bf16 %v4275_v49, %v4148_v21  ;;  %v4277_v18 = vpop.f32.mrb[58].mxu1  ;;  %v4151_v31 = vpop.f32.mrb[39].mxu0 }
 0xe14   :  { %v4278_v42 = vpop.f32.mrb[59].mxu1 }
 0xe15   :  { %4442 = vmatprep.mubr.bf16.mxu0 %v4281_v34 }
 0xe16   :  { %4443 = vmatmul.mubr.bf16.vlgmr.msra.gmra.mrb[40].mxu0 %v4280_v11 }
 0xe17   :  { %7997 = vmatpush3.bf16.msra.mxu0 %v8160_v44 }
 0xe18   :  { %7998 = vmatprep.subr.bf16.mxu0 %v8163_v55 }
 0xe1b   :  { %7999 = vmatpush3.bf16.msra.mxu0 %v8163_v55 }
 0xe1c   :  { %8000 = vmatprep.subr.bf16.mxu0 %v8166_v3 }
 0xe1f   :  { %8001 = vmatpush3.bf16.msra.mxu0 %v8166_v3 }
 0xe20   :  { %8002 = vmatprep.subr.bf16.mxu0 %v8169_v63 }
 0xe23   :  { %8003 = vmatpush3.bf16.msra.mxu0 %v8169_v63 }
 0xe24   :  { %8004 = vmatprep.subr.bf16.mxu0 %v8172_v4 }
 0xe27   :  { %8005 = vmatpush3.bf16.msra.mxu0 %v8172_v4 }
 0xe28   :  { %8006 = vmatprep.subr.bf16.mxu0 %v8175_v45 }
 0xe2b   :  { %8007 = vmatpush3.bf16.msra.mxu0 %v8175_v45 }
 0xe2c   :  { %8008 = vmatprep.subr.bf16.mxu0 %v8178_v46 }
 0xe2f   :  { %8009 = vmatpush3.bf16.msra.mxu0 %v8178_v46 }
 0xe30   :  { %8010 = vmatprep.subr.bf16.mxu0 %v8181_v7 }
 0xe33   :  { %8011 = vmatpush3.bf16.msra.mxu0 %v8181_v7 }
 0xee9   :  { %v7735_v38 = vpop.f32.mrb[40].mxu0 }
 0xeea   :  { %v7736_v59 = vpop.f32.mrb[41].mxu0 }
 0xeeb   :  { %v7737_v33 = vadd.f32 %v7736_v59, %v7735_v38  ;;  %v7738_v5 = vpop.f32.mrb[42].mxu0 }
 0xeec   :  { %v7739_v60 = vpop.f32.mrb[43].mxu0 }
 0xeed   :  { %v7740_v39 = vadd.f32 %v7739_v60, %v7738_v5  ;;  %v4460_v32 = vmul.f32 %v7737_v33, %v7737_v33 }
 0xeef   :  { %v4453_v43 = vadd.f32 %v7740_v39, %v7737_v33  ;;  %v4461_v9 = vmul.f32 %v7740_v39, %v7740_v39 }
 0xef1   :  { %v4454_v2 = vrot.slane %v4453_v43, 4  ;;  %v4462_v24 = vadd.f32 %v4461_v9, %v4460_v32 }
 0xef3   :  { %v4455_v47 = vadd.f32 %v4454_v2, %v4453_v43  ;;  %v4463_v57 = vrot.slane %v4462_v24, 4 }
 0xef5   :  { %v4456_v50 = vrot.slane %v4455_v47, 2  ;;  %v4464_v16 = vadd.f32 %v4463_v57, %v4462_v24 }
 0xef7   :  { %v4457_v14 = vadd.f32 %v4456_v50, %v4455_v47  ;;  %v4465_v1 = vrot.slane %v4464_v16, 2 }
 0xef9   :  { %v4458_v21 = vrot.slane %v4457_v14, 1  ;;  %v4466_v11 = vadd.f32 %v4465_v1, %v4464_v16 }
 0xefb   :  { %v4459_v49 = vadd.f32 %v4458_v21, %v4457_v14  ;;  %v4467_v54 = vrot.slane %v4466_v11, 1 }
 0xefd   :  { %v4468_v34 = vadd.f32 %v4467_v54, %v4466_v11  ;;  %v4469_v18 = vmul.f32 0.0625, %v4459_v49 }
 0xeff   :  { %v4470_v31 = vmul.f32 0.0625, %v4468_v34  ;;  %v4471_v42 = vmul.f32 %v4469_v18, %v4469_v18  ;;  %v4474_v53 = vsub.f32 %v7737_v33, %v4469_v18  ;;  %v4475_v44 = vsub.f32 %v7740_v39, %v4469_v18 }
 0xf01   :  { %v4472_v52 = vsub.f32 %v4470_v31, %v4471_v42 }
 0xf03   :  { %v4473_v12 = vmax.f32 %v4472_v52, 0.0 }
 0xf05   :  { %v4476_v55 = vadd.f32 1e-05, %v4473_v12 }
 0xf07   :  { %8353 = vrsqrt.f32 %v4476_v55 }
 0xf11   :  { %v8354_v37 = vpop.eup %8353 }
 0xf12   :  { %v4478_v3 = vmul.f32 %v8354_v37, %v4474_v53  ;;  %v4479_v56 = vmul.f32 %v8354_v37, %v4475_v44 }
 0xf14   :  { %v4484_v63 = vmul.f32 %v7492_v20, %v4478_v3  ;;  %v4485_v15 = vmul.f32 %v7492_v20, %v4479_v56 }
 0xf16   :  { %v4490_v6 = vadd.f32 %v7493_v61, %v4484_v63  ;;  %v4491_v4 = vadd.f32 %v7493_v61, %v4485_v15 }
 0xf18   :  { %vm4492_vm8 = vcmp.ge.f32.partialorder %v4490_v6, 0.0  ;;  %vm4493_vm10 = vcmp.ge.f32.partialorder %v4491_v4, 0.0  ;;  %v4494_v36 = vmul.f32 0.1, %v4490_v6  ;;  %v4495_v13 = vmul.f32 0.1, %v4491_v4 }
 0xf1a   :  { %v4496_v45 = vsel %vm4492_vm8, %v4490_v6, %v4494_v36  ;;  %v4497_v30 = vsel %vm4493_vm10, %v4491_v4, %v4495_v13  ;;  %v10322_v13 = vld [vmem:[%s11252_s0] sm:$0xf] }
 0xf1b   :  { %v10267_v41 = vpack.c.bf16 %v4496_v45, %v4496_v45  ;;  %v10269_v46 = vpack.c.bf16 %v4497_v30, %v4497_v30 }
 0xf1d   :  { %v4512_v19 = vrot.slane %v10267_v41, %v8651_v8  ;;  %v4537_v62 = vrot.slane %v10269_v46, %v8651_v8 }
 0xf1f   :  { %v4513_v7 = vcombine.low %v9463_v25, %v4512_v19  ;;  %v4514_v27 = vcombine.high %v9463_v25, %v4512_v19  ;;  %v4538_v38 = vcombine.low %v9466_v28, %v4537_v62  ;;  %v4539_v59 = vcombine.high %v9466_v28, %v4537_v62 }
 0xf21   :  { %v4521_v33 = vrot.slane %v4513_v7, %v8651_v8  ;;  %v4528_v5 = vrot.slane %v4514_v27, %v8651_v8  ;;  %v10282_v60 = vrot.slane %v4538_v38, %v8651_v8  ;;  %v10285_v39 = vrot.slane %v4539_v59, %v8651_v8 }
 0xf23   :  { %v4557_v32 = vunpack.i.h.s16 %v4521_v33  ;;  %v7496_v43 = vpack.i.b16 %v4521_v33, %v4521_v33  ;;  %v4559_v9 = vunpack.i.h.s16 %v4528_v5  ;;  %v10287_v2 = vpack.i.b16 %v4528_v5, %v4528_v5 }
 0xf24   :  { %v4529_v25 = vcombine.high %v4521_v33, %v4521_v33  ;;  %v10289_v24 = vcombine.high %v4528_v5, %v4528_v5  ;;  %v4565_v28 = vunpack.i.h.s16 %v10282_v60  ;;  %v10294_v47 = vpack.i.b16 %v10282_v60, %v10282_v60 }
 0xf25   :  { %v4573_v57 = vpack.i.b16 %v4557_v32, %v4557_v32  ;;  %v4595_v50 = vrot.slane %v7496_v43, %v9213_v23  ;;  %v4599_v8 = vrot.slane %v7496_v43, %v9216_v35  ;;  %v4591_v16 = vrot.slane %v7496_v43, %v8654_v10 }
 0xf26   :  { %v10299_v14 = vpack.i.b16 %v4559_v9, %v4559_v9  ;;  %v4623_v1 = vrot.slane %v10287_v2, %v9216_v35  ;;  %v4619_v21 = vrot.slane %v10287_v2, %v9213_v23  ;;  %v4561_v11 = vunpack.i.h.s16 %v4529_v25 }
 0xf27   :  { %v4607_v49 = vrot.slane %v4573_v57, %v9213_v23  ;;  %v4788_v54 = vpack.i.b16 %v4595_v50, %v4595_v50  ;;  %v4611_v34 = vrot.slane %v4573_v57, %v9216_v35  ;;  %v4795_v18 = vpack.i.b16 %v4599_v8, %v4599_v8 }
 0xf28   :  { %v4603_v31 = vrot.slane %v4573_v57, %v8654_v10  ;;  %v4781_v42 = vpack.i.b16 %v4591_v16, %v4591_v16  ;;  %v4635_v53 = vrot.slane %v10299_v14, %v9216_v35  ;;  %v4837_v44 = vpack.i.b16 %v4623_v1, %v4623_v1 }
 0xf29   :  { %v4793_v52 = vrot.slane %v4788_v54, %v8654_v10  ;;  %v4809_v12 = vpack.i.b16 %v4607_v49, %v4607_v49  ;;  %v4800_v55 = vrot.slane %v4795_v18, %v8654_v10  ;;  %v4816_v37 = vpack.i.b16 %v4611_v34, %v4611_v34 }
 0xf2a   :  { %v4786_v20 = vrot.slane %v4781_v42, %v8654_v10  ;;  %v4802_v3 = vpack.i.b16 %v4603_v31, %v4603_v31  ;;  %v4842_v56 = vrot.slane %v4837_v44, %v8654_v10  ;;  %v4858_v61 = vpack.i.b16 %v4635_v53, %v4635_v53 }
 0xf2b   :  { %v4814_v63 = vrot.slane %v4809_v12, %v8654_v10  ;;  %v5117_v15 = vsub.bf16 %v4793_v52, %v9451_v29  ;;  %v4821_v6 = vrot.slane %v4816_v37, %v8654_v10  ;;  %v5118_v4 = vsub.bf16 %v4800_v55, %v10267_v41 }
 0xf2c   :  { %v4807_v36 = vrot.slane %v4802_v3, %v8654_v10  ;;  %v5116_v45 = vsub.bf16 %v4786_v20, %v10322_v13  ;;  %v4863_v30 = vrot.slane %v4858_v61, %v8654_v10  ;;  %v5124_v19 = vsub.bf16 %v4842_v56, %v10267_v41 }
 0xf2d   :  { %v5120_v62 = vsub.bf16 %v4814_v63, %v9451_v29  ;;  %v5165_v7 = vand.u32 2147450879, %v5117_v15  ;;  %v5121_v27 = vsub.bf16 %v4821_v6, %v10267_v41  ;;  %v5166_v38 = vand.u32 2147450879, %v5118_v4 }
 0xf2e   :  { %v5119_v59 = vsub.bf16 %v4807_v36, %v10322_v13  ;;  %v5164_v33 = vand.u32 2147450879, %v5116_v45  ;;  %v5127_v5 = vsub.bf16 %v4863_v30, %v10267_v41  ;;  %v5172_v32 = vand.u32 2147450879, %v5124_v19 }
 0xf2f   :  { %v5168_v43 = vand.u32 2147450879, %v5120_v62  ;;  %v5169_v9 = vand.u32 2147450879, %v5121_v27  ;;  %v4631_v57 = vrot.slane %v10299_v14, %v9213_v23  ;;  %v4830_v50 = vpack.i.b16 %v4619_v21, %v4619_v21 }
 0xf30   :  { %v5167_v8 = vand.u32 2147450879, %v5119_v59  ;;  %v5175_v16 = vand.u32 2147450879, %v5127_v5  ;;  %v10333_v1 = vpack.i.b16 %v4529_v25, %v4529_v25  ;;  %v10335_v49 = vpack.i.b16 %v4561_v11, %v4561_v11 }
 0xf31   :  { %v7505_v54 = vcombine.low %v5165_v7, %v5168_v43  ;;  %v7506_v34 = vcombine.low %v5166_v38, %v5169_v9  ;;  %v4835_v18 = vrot.slane %v4830_v50, %v8654_v10  ;;  %v4851_v31 = vpack.i.b16 %v4631_v57, %v4631_v57 }
 0xf32   :  { %v7504_v42 = vcombine.low %v5164_v33, %v5167_v8  ;;  %v7509_v53 = vcombine.low %v5172_v32, %v5175_v16  ;;  %v4647_v44 = vrot.slane %v10333_v1, %v9216_v35  ;;  %v4659_v52 = vrot.slane %v10335_v49, %v9216_v35 }
 0xf33   :  { %5580 = vmatprep.mubr.bf16.mxu1 %v7505_v54  ;;  %8012 = vmatprep.mubr.bf16.mxu0 %v7506_v34  ;;  %v4856_v25 = vrot.slane %v4851_v31, %v8654_v10  ;;  %v5123_v21 = vsub.bf16 %v4835_v18, %v9451_v29  ;;  %v4615_v11 = vrot.slane %v10287_v2, %v8654_v10  ;;  %v4563_v12 = vunpack.i.h.s16 %v10289_v24 }
 0xf34   :  { %5581 = vmatmul.mubr.bf16.vlgmr.msra.gmra.mrb[60].mxu1 %v7504_v42  ;;  %8013 = vmatmul.mubr.bf16.vlgmr.msra.gmra.mrb[44].mxu0 %v7509_v53  ;;  %v4879_v55 = vpack.i.b16 %v4647_v44, %v4647_v44  ;;  %v4900_v37 = vpack.i.b16 %v4659_v52, %v4659_v52  ;;  %v4627_v20 = vrot.slane %v10299_v14, %v8654_v10  ;;  %v4567_v3 = vunpack.i.h.s16 %v10285_v39 }
 0xf35   :  { %v5126_v56 = vsub.bf16 %v4856_v25, %v9451_v29  ;;  %v5171_v61 = vand.u32 2147450879, %v5123_v21  ;;  %v4823_v63 = vpack.i.b16 %v4615_v11, %v4615_v11  ;;  %v10353_v15 = vpack.i.b16 %v10289_v24, %v10289_v24 }
 0xf36   :  { %v4884_v2 = vrot.slane %v4879_v55, %v8654_v10  ;;  %v4905_v6 = vrot.slane %v4900_v37, %v8654_v10  ;;  %v4844_v4 = vpack.i.b16 %v4627_v20, %v4627_v20  ;;  %v10357_v36 = vpack.i.b16 %v4563_v12, %v4563_v12 }
 0xf37   :  { %v5174_v45 = vand.u32 2147450879, %v5126_v56  ;;  %v4828_v14 = vrot.slane %v4823_v63, %v8654_v10  ;;  %v4671_v30 = vrot.slane %v10353_v15, %v9216_v35  ;;  %v4643_v19 = vrot.slane %v10333_v1, %v9213_v23 }
 0xf38   :  { %v5130_v62 = vsub.bf16 %v4884_v2, %v10267_v41  ;;  %v5133_v24 = vsub.bf16 %v4905_v6, %v10267_v41  ;;  %v4849_v7 = vrot.slane %v4844_v4, %v8654_v10  ;;  %v4683_v27 = vrot.slane %v10357_v36, %v9216_v35 }
 0xf39   :  { %v7508_v38 = vcombine.low %v5171_v61, %v5174_v45  ;;  %v5122_v59 = vsub.bf16 %v4828_v14, %v10322_v13  ;;  %v4921_v33 = vpack.i.b16 %v4671_v30, %v4671_v30  ;;  %v4655_v5 = vrot.slane %v10335_v49, %v9213_v23 }
 0xf3a   :  { %v5178_v32 = vand.u32 2147450879, %v5130_v62  ;;  %v5181_v43 = vand.u32 2147450879, %v5133_v24  ;;  %v5125_v9 = vsub.bf16 %v4849_v7, %v10322_v13  ;;  %v4942_v57 = vpack.i.b16 %v4683_v27, %v4683_v27 }
 0xf3b   :  { %5588 = vmatprep.mubr.bf16.mxu1 %v7508_v38  ;;  %v5170_v50 = vand.u32 2147450879, %v5122_v59  ;;  %v4926_v8 = vrot.slane %v4921_v33, %v8654_v10  ;;  %v4872_v16 = vpack.i.b16 %v4643_v19, %v4643_v19  ;;  %v4893_v54 = vpack.i.b16 %v4655_v5, %v4655_v5 }
 0xf3c   :  { %v7512_v34 = vcombine.low %v5178_v32, %v5181_v43  ;;  %v5173_v18 = vand.u32 2147450879, %v5125_v9  ;;  %v4947_v31 = vrot.slane %v4942_v57, %v8654_v10  ;;  %v10378_v42 = vpack.i.b16 %v4565_v28, %v4565_v28 }
 0xf3d   :  { %v5136_v53 = vsub.bf16 %v4926_v8, %v10267_v41  ;;  %v4877_v44 = vrot.slane %v4872_v16, %v8654_v10  ;;  %v4898_v52 = vrot.slane %v4893_v54, %v8654_v10  ;;  %v4695_v25 = vrot.slane %v10294_v47, %v9216_v35 }
 0xf3e   :  { %8016 = vmatprep.mubr.bf16.mxu0 %v7512_v34  ;;  %v7507_v21 = vcombine.low %v5170_v50, %v5173_v18  ;;  %v5139_v11 = vsub.bf16 %v4947_v31, %v10267_v41  ;;  %v4707_v12 = vrot.slane %v10378_v42, %v9216_v35  ;;  %v4639_v28 = vrot.slane %v10333_v1, %v8654_v10 }
 0xf3f   :  { %v5184_v55 = vand.u32 2147450879, %v5136_v53  ;;  %v5129_v37 = vsub.bf16 %v4877_v44, %v9451_v29  ;;  %v5132_v20 = vsub.bf16 %v4898_v52, %v9451_v29  ;;  %v4963_v56 = vpack.i.b16 %v4695_v25, %v4695_v25 }
 0xf40   :  { %5589 = vmatmul.mubr.bf16.gmra.mrb[64].mxu1 %v7507_v21  ;;  %v5187_v61 = vand.u32 2147450879, %v5139_v11  ;;  %v4984_v63 = vpack.i.b16 %v4707_v12, %v4707_v12  ;;  %v4651_v2 = vrot.slane %v10335_v49, %v8654_v10  ;;  %v4865_v6 = vpack.i.b16 %v4639_v28, %v4639_v28 }
 0xf41   :  { %v5177_v4 = vand.u32 2147450879, %v5129_v37  ;;  %v5180_v45 = vand.u32 2147450879, %v5132_v20  ;;  %v4968_v14 = vrot.slane %v4963_v56, %v8654_v10  ;;  %v10397_v1 = vpack.i.b16 %v10285_v39, %v10285_v39 }
 0xf42   :  { %v7515_v30 = vcombine.low %v5184_v55, %v5187_v61  ;;  %v4989_v19 = vrot.slane %v4984_v63, %v8654_v10  ;;  %v4870_v62 = vrot.slane %v4865_v6, %v8654_v10  ;;  %v4886_v24 = vpack.i.b16 %v4651_v2, %v4651_v2 }
 0xf43   :  { %v7511_v7 = vcombine.low %v5177_v4, %v5180_v45  ;;  %v5142_v27 = vsub.bf16 %v4968_v14, %v10269_v46  ;;  %v10402_v38 = vpack.i.b16 %v4567_v3, %v4567_v3  ;;  %v4719_v49 = vrot.slane %v10397_v1, %v9216_v35 }
 0xf44   :  { %8017 = vmatmul.mubr.bf16.gmra.mrb[48].mxu0 %v7515_v30  ;;  %v5145_v59 = vsub.bf16 %v4989_v19, %v10269_v46  ;;  %v4891_v33 = vrot.slane %v4886_v24, %v8654_v10  ;;  %v5128_v5 = vsub.bf16 %v4870_v62, %v10322_v13  ;;  %v4667_v32 = vrot.slane %v10353_v15, %v9213_v23 }
 0xf45   :  { %5596 = vmatprep.mubr.bf16.mxu1 %v7511_v7  ;;  %v5190_v43 = vand.u32 2147450879, %v5142_v27  ;;  %v4731_v9 = vrot.slane %v10402_v38, %v9216_v35  ;;  %v5005_v3 = vpack.i.b16 %v4719_v49, %v4719_v49  ;;  %v4679_v57 = vrot.slane %v10357_v36, %v9213_v23 }
 0xf46   :  { %v5193_v50 = vand.u32 2147450879, %v5145_v59  ;;  %v5131_v8 = vsub.bf16 %v4891_v33, %v10322_v13  ;;  %v5176_v16 = vand.u32 2147450879, %v5128_v5  ;;  %v4914_v54 = vpack.i.b16 %v4667_v32, %v4667_v32 }
 0xf47   :  { %v5010_v34 = vrot.slane %v5005_v3, %v8654_v10  ;;  %v5026_v18 = vpack.i.b16 %v4731_v9, %v4731_v9  ;;  %v4935_v31 = vpack.i.b16 %v4679_v57, %v4679_v57  ;;  %v4554_v53 = vcombine.high %v10282_v60, %v10282_v60 }
 0xf48   :  { %v7518_v44 = vcombine.low %v5190_v43, %v5193_v50  ;;  %v5179_v52 = vand.u32 2147450879, %v5131_v8  ;;  %v4919_v25 = vrot.slane %v4914_v54, %v8654_v10  ;;  %v4663_v21 = vrot.slane %v10353_v15, %v8654_v10 }
 0xf49   :  { %v5031_v11 = vrot.slane %v5026_v18, %v8654_v10  ;;  %v5148_v12 = vsub.bf16 %v5010_v34, %v10269_v46  ;;  %v4940_v28 = vrot.slane %v4935_v31, %v8654_v10  ;;  %v4569_v55 = vunpack.i.h.s16 %v4554_v53 }
 0xf4a   :  { %8020 = vmatprep.mubr.bf16.mxu0 %v7518_v44  ;;  %v7510_v37 = vcombine.low %v5176_v16, %v5179_v52  ;;  %v5135_v20 = vsub.bf16 %v4919_v25, %v9451_v29  ;;  %v10426_v56 = vpack.i.b16 %v4554_v53, %v4554_v53  ;;  %v4675_v60 = vrot.slane %v10357_v36, %v8654_v10 }
 0xf4b   :  { %v5151_v61 = vsub.bf16 %v5031_v11, %v10269_v46  ;;  %v5196_v63 = vand.u32 2147450879, %v5148_v12  ;;  %v5138_v15 = vsub.bf16 %v4940_v28, %v9451_v29  ;;  %v10432_v2 = vpack.i.b16 %v4569_v55, %v4569_v55 }
 0xf4c   :  { %5597 = vmatmul.mubr.bf16.gmra.mrb[68].mxu1 %v7510_v37  ;;  %v5183_v6 = vand.u32 2147450879, %v5135_v20  ;;  %v4743_v4 = vrot.slane %v10426_v56, %v9216_v35  ;;  %v4907_v45 = vpack.i.b16 %v4663_v21, %v4663_v21  ;;  %v4928_v14 = vpack.i.b16 %v4675_v60, %v4675_v60 }
 0xf4d   :  { %v5199_v30 = vand.u32 2147450879, %v5151_v61  ;;  %v5186_v19 = vand.u32 2147450879, %v5138_v15  ;;  %v4755_v62 = vrot.slane %v10432_v2, %v9216_v35  ;;  %v4555_v36 = vcombine.high %v10285_v39, %v10285_v39 }
 0xf4e   :  { %v5047_v24 = vpack.i.b16 %v4743_v4, %v4743_v4  ;;  %v4912_v7 = vrot.slane %v4907_v45, %v8654_v10  ;;  %v4933_v27 = vrot.slane %v4928_v14, %v8654_v10  ;;  %v4691_v49 = vrot.slane %v10294_v47, %v9213_v23 }
 0xf4f   :  { %v7521_v59 = vcombine.low %v5196_v63, %v5199_v30  ;;  %v7514_v33 = vcombine.low %v5183_v6, %v5186_v19  ;;  %v5068_v5 = vpack.i.b16 %v4755_v62, %v4755_v62  ;;  %v4571_v32 = vunpack.i.h.s16 %v4555_v36 }
 0xf50   :  { %v5052_v43 = vrot.slane %v5047_v24, %v8654_v10  ;;  %v5134_v9 = vsub.bf16 %v4912_v7, %v10322_v13  ;;  %v5137_v3 = vsub.bf16 %v4933_v27, %v10322_v13  ;;  %v10447_v57 = vpack.i.b16 %v4555_v36, %v4555_v36 }
 0xf51   :  { %8021 = vmatmul.mubr.bf16.gmra.mrb[52].mxu0 %v7521_v59  ;;  %5604 = vmatprep.mubr.bf16.mxu1 %v7514_v33  ;;  %v5073_v39 = vrot.slane %v5068_v5, %v8654_v10  ;;  %v10450_v50 = vpack.i.b16 %v4571_v32, %v4571_v32  ;;  %v4703_v8 = vrot.slane %v10378_v42, %v9213_v23 }
 0xf52   :  { %v5154_v16 = vsub.bf16 %v5052_v43, %v10269_v46  ;;  %v5182_v54 = vand.u32 2147450879, %v5134_v9  ;;  %v5185_v34 = vand.u32 2147450879, %v5137_v3  ;;  %v4767_v18 = vrot.slane %v10447_v57, %v9216_v35 }
 0xf53   :  { %v5157_v13 = vsub.bf16 %v5073_v39, %v10269_v46  ;;  %v4779_v31 = vrot.slane %v10450_v50, %v9216_v35  ;;  %v4956_v53 = vpack.i.b16 %v4691_v49, %v4691_v49  ;;  %v4977_v44 = vpack.i.b16 %v4703_v8, %v4703_v8  ;;  %v10481_v49 = vld [vmem:[%s11252_s0 + $0x4] sm:$0xf] }
 0xf54   :  { %v5202_v52 = vand.u32 2147450879, %v5154_v16  ;;  %v7513_v25 = vcombine.low %v5182_v54, %v5185_v34  ;;  %v5089_v21 = vpack.i.b16 %v4767_v18, %v4767_v18  ;;  %v4687_v11 = vrot.slane %v10294_v47, %v8654_v10 }
 0xf55   :  { %v5205_v12 = vand.u32 2147450879, %v5157_v13  ;;  %v5110_v28 = vpack.i.b16 %v4779_v31, %v4779_v31  ;;  %v4961_v55 = vrot.slane %v4956_v53, %v8654_v10  ;;  %v4982_v37 = vrot.slane %v4977_v44, %v8654_v10 }
 0xf56   :  { %5605 = vmatmul.mubr.bf16.gmra.mrb[72].mxu1 %v7513_v25  ;;  %v5094_v20 = vrot.slane %v5089_v21, %v8654_v10  ;;  %v4699_v60 = vrot.slane %v10378_v42, %v8654_v10  ;;  %v4949_v61 = vpack.i.b16 %v4687_v11, %v4687_v11  ;;  %v4715_v63 = vrot.slane %v10397_v1, %v9213_v23 }
 0xf57   :  { %v7524_v15 = vcombine.low %v5202_v52, %v5205_v12  ;;  %v5115_v6 = vrot.slane %v5110_v28, %v8654_v10  ;;  %v5141_v47 = vsub.bf16 %v4961_v55, %v9453_v48  ;;  %v5144_v4 = vsub.bf16 %v4982_v37, %v9453_v48 }
 0xf58   :  { %v5160_v45 = vsub.bf16 %v5094_v20, %v10269_v46  ;;  %v4954_v14 = vrot.slane %v4949_v61, %v8654_v10  ;;  %v4970_v30 = vpack.i.b16 %v4699_v60, %v4699_v60  ;;  %v4727_v19 = vrot.slane %v10402_v38, %v9213_v23 }
 0xf59   :  { %8024 = vmatprep.mubr.bf16.mxu0 %v7524_v15  ;;  %v5163_v42 = vsub.bf16 %v5115_v6, %v10269_v46  ;;  %v5189_v62 = vand.u32 2147450879, %v5141_v47  ;;  %v5192_v36 = vand.u32 2147450879, %v5144_v4  ;;  %v4998_v24 = vpack.i.b16 %v4715_v63, %v4715_v63 }
 0xf5a   :  { %v5208_v7 = vand.u32 2147450879, %v5160_v45  ;;  %v4975_v27 = vrot.slane %v4970_v30, %v8654_v10  ;;  %v5140_v59 = vsub.bf16 %v4954_v14, %v10481_v49  ;;  %v5019_v33 = vpack.i.b16 %v4727_v19, %v4727_v19 }
 0xf5b   :  { %v5211_v5 = vand.u32 2147450879, %v5163_v42  ;;  %v7517_v32 = vcombine.low %v5189_v62, %v5192_v36  ;;  %v5003_v43 = vrot.slane %v4998_v24, %v8654_v10  ;;  %v4711_v9 = vrot.slane %v10397_v1, %v8654_v10 }
 0xf5c   :  { %v5143_v3 = vsub.bf16 %v4975_v27, %v10481_v49  ;;  %v5188_v39 = vand.u32 2147450879, %v5140_v59  ;;  %v5024_v8 = vrot.slane %v5019_v33, %v8654_v10  ;;  %v4723_v16 = vrot.slane %v10402_v38, %v8654_v10 }
 0xf5d   :  { %v7527_v54 = vcombine.low %v5208_v7, %v5211_v5  ;;  %5612 = vmatprep.mubr.bf16.mxu1 %v7517_v32  ;;  %v5147_v34 = vsub.bf16 %v5003_v43, %v9453_v48  ;;  %v4991_v18 = vpack.i.b16 %v4711_v9, %v4711_v9  ;;  %v4739_v13 = vrot.slane %v10426_v56, %v9213_v23 }
 0xf5e   :  { %v5191_v31 = vand.u32 2147450879, %v5143_v3  ;;  %v5150_v53 = vsub.bf16 %v5024_v8, %v9453_v48  ;;  %v5012_v1 = vpack.i.b16 %v4723_v16, %v4723_v16  ;;  %v4751_v44 = vrot.slane %v10432_v2, %v9213_v23 }
 0xf5f   :  { %8025 = vmatmul.mubr.bf16.gmra.mrb[56].mxu0 %v7527_v54  ;;  %v5195_v52 = vand.u32 2147450879, %v5147_v34  ;;  %v4996_v25 = vrot.slane %v4991_v18, %v8654_v10  ;;  %v5040_v38 = vpack.i.b16 %v4739_v13, %v4739_v13  ;;  %v4735_v21 = vrot.slane %v10426_v56, %v8654_v10 }
 0xf60   :  { %v7516_v11 = vcombine.low %v5188_v39, %v5191_v31  ;;  %v5198_v12 = vand.u32 2147450879, %v5150_v53  ;;  %v5017_v28 = vrot.slane %v5012_v1, %v8654_v10  ;;  %v5061_v55 = vpack.i.b16 %v4751_v44, %v4751_v44 }
 0xf61   :  { %v5146_v37 = vsub.bf16 %v4996_v25, %v10481_v49  ;;  %v5045_v20 = vrot.slane %v5040_v38, %v8654_v10  ;;  %v4747_v60 = vrot.slane %v10432_v2, %v8654_v10  ;;  %v5033_v61 = vpack.i.b16 %v4735_v21, %v4735_v21 }
 0xf62   :  { %5613 = vmatmul.mubr.bf16.gmra.mrb[76].mxu1 %v7516_v11  ;;  %v7520_v63 = vcombine.low %v5195_v52, %v5198_v12  ;;  %v5149_v15 = vsub.bf16 %v5017_v28, %v10481_v49  ;;  %v5066_v6 = vrot.slane %v5061_v55, %v8654_v10  ;;  %v4763_v56 = vrot.slane %v10447_v57, %v9213_v23  ;;  %v8183_v11 = vld [vmem:[#allocation5 + $0x80] sm:$0xff]   ;;  %v8184_v12 = vld [vmem:[#allocation5 + $0x88] sm:$0xff]   ;;  %v8185_v28 = vld [vmem:[#allocation5 + $0x90] sm:$0xff]  }
 0xf63   :  { %v5153_v47 = vsub.bf16 %v5045_v20, %v9453_v48  ;;  %v5054_v4 = vpack.i.b16 %v4747_v60, %v4747_v60  ;;  %v4775_v2 = vrot.slane %v10450_v50, %v9213_v23  ;;  %v5194_v19 = vand.u32 2147450879, %v5146_v37  ;;  %8028 = vmatprep.subr.bf16.mxu0 %v8183_v11  ;;  %v8186_v55 = vld [vmem:[#allocation5 + $0x98] sm:$0xff]   ;;  %v8187_v37 = vld [vmem:[#allocation5 + $0xa0] sm:$0xff]  }
 0xf64   :  { %5620 = vmatprep.mubr.bf16.mxu1 %v7520_v63  ;;  %v5197_v45 = vand.u32 2147450879, %v5149_v15  ;;  %v5156_v14 = vsub.bf16 %v5066_v6, %v9453_v48  ;;  %v5082_v30 = vpack.i.b16 %v4763_v56, %v4763_v56  ;;  %v5038_v36 = vrot.slane %v5033_v61, %v8654_v10  ;;  %8029 = vmatpush3.bf16.msra.mxu0 %v8183_v11 }
 0xf65   :  { %v5059_v42 = vrot.slane %v5054_v4, %v8654_v10  ;;  %v5103_v24 = vpack.i.b16 %v4775_v2, %v4775_v2  ;;  %v4759_v7 = vrot.slane %v10447_v57, %v8654_v10  ;;  %v5201_v27 = vand.u32 2147450879, %v5153_v47  ;;  %8030 = vmatprep.subr.bf16.mxu0 %v8184_v12  ;;  %v8188_v4 = vld [vmem:[#allocation5 + $0xa8] sm:$0xff]  }
 0xf66   :  { %v5204_v62 = vand.u32 2147450879, %v5156_v14  ;;  %v5087_v59 = vrot.slane %v5082_v30, %v8654_v10  ;;  %v4771_v33 = vrot.slane %v10450_v50, %v8654_v10  ;;  %v7519_v5 = vcombine.low %v5194_v19, %v5197_v45  ;;  %v8189_v30 = vld [vmem:[#allocation5 + $0xb0] sm:$0xff]  }
 0xf67   :  { %v5155_v32 = vsub.bf16 %v5059_v42, %v10481_v49  ;;  %v5108_v43 = vrot.slane %v5103_v24, %v8654_v10  ;;  %v5152_v39 = vsub.bf16 %v5038_v36, %v10481_v49  ;;  %v5075_v16 = vpack.i.b16 %v4759_v7, %v4759_v7  ;;  %v8190_v24 = vld [vmem:[#allocation5 + $0xb8] sm:$0xff]  }
 0xf68   :  { %v7523_v9 = vcombine.low %v5201_v27, %v5204_v62  ;;  %v5096_v3 = vpack.i.b16 %v4771_v33, %v4771_v33  ;;  %v5159_v57 = vsub.bf16 %v5087_v59, %v9453_v48  ;;  %8031 = vmatpush3.bf16.msra.mxu0 %v8184_v12 }
 0xf69   :  { %v5162_v8 = vsub.bf16 %v5108_v43, %v9453_v48  ;;  %v5203_v54 = vand.u32 2147450879, %v5155_v32  ;;  %v5200_v18 = vand.u32 2147450879, %v5152_v39  ;;  %v5080_v13 = vrot.slane %v5075_v16, %v8654_v10  ;;  %8032 = vmatprep.subr.bf16.mxu0 %v8185_v28 }
 0xf6a   :  { %5621 = vmatmul.mubr.bf16.gmra.mrb[80].mxu1 %v7519_v5  ;;  %v5101_v34 = vrot.slane %v5096_v3, %v8654_v10  ;;  %v5207_v31 = vand.u32 2147450879, %v5159_v57 }
 0xf6b   :  { %5628 = vmatprep.mubr.bf16.mxu1 %v7523_v9  ;;  %v5210_v50 = vand.u32 2147450879, %v5162_v8  ;;  %v7522_v53 = vcombine.low %v5200_v18, %v5203_v54  ;;  %v5158_v52 = vsub.bf16 %v5080_v13, %v10481_v49 }
 0xf6c   :  { %v5161_v1 = vsub.bf16 %v5101_v34, %v10481_v49  ;;  %8033 = vmatpush3.bf16.msra.mxu0 %v8185_v28 }
 0xf6d   :  { %v7526_v44 = vcombine.low %v5207_v31, %v5210_v50  ;;  %v5206_v38 = vand.u32 2147450879, %v5158_v52  ;;  %8034 = vmatprep.subr.bf16.mxu0 %v8186_v55 }
 0xf6e   :  { %v5209_v25 = vand.u32 2147450879, %v5161_v1 }
 0xf70   :  { %v7525_v21 = vcombine.low %v5206_v38, %v5209_v25  ;;  %8035 = vmatpush3.bf16.msra.mxu0 %v8186_v55 }
 0xf71   :  { %8036 = vmatprep.subr.bf16.mxu0 %v8187_v37 }
 0xf72   :  { %5629 = vmatmul.mubr.bf16.gmra.mrb[84].mxu1 %v7522_v53 }
 0xf73   :  { %5636 = vmatprep.mubr.bf16.mxu1 %v7526_v44 }
 0xf74   :  { %8037 = vmatpush3.bf16.msra.mxu0 %v8187_v37 }
 0xf75   :  { %8038 = vmatprep.subr.bf16.mxu0 %v8188_v4 }
 0xf78   :  { %8039 = vmatpush3.bf16.msra.mxu0 %v8188_v4 }
 0xf79   :  { %8040 = vmatprep.subr.bf16.mxu0 %v8189_v30 }
 0xf7a   :  { %5637 = vmatmul.mubr.bf16.gmra.mrb[88].mxu1 %v7525_v21 }
 0xf7c   :  { %8041 = vmatpush3.bf16.msra.mxu0 %v8189_v30 }
 0xf7d   :  { %8042 = vmatprep.subr.bf16.mxu0 %v8190_v24 }
 0xf80   :  { %8043 = vmatpush3.bf16.msra.mxu0 %v8190_v24 }
 0xf81   :  { %8060 = vmatprep.subr.bf16.mxu0 %v8554_v22 }
0x1007   :  { %v7757_v20 = vpop.f32.mrb[60].mxu1  ;;  %v8014_v60 = vpop.f32.mrb[44].mxu0 }
0x1008   :  { %v7758_v49 = vpop.f32.mrb[61].mxu1  ;;  %v5679_v61 = vpop.f32.mrb[45].mxu0 }
0x1009   :  { %v7759_v63 = vadd.f32 %v7758_v49, %v7757_v20  ;;  %v7760_v15 = vpop.f32.mrb[62].mxu1  ;;  %v8015_v6 = vpop.f32.mrb[46].mxu0 }
0x100a   :  { %v7761_v56 = vpop.f32.mrb[63].mxu1  ;;  %v5682_v47 = vpop.f32.mrb[47].mxu0 }
0x100b   :  { %v10529_v45 = vadd.f32 %v7759_v63, %v5679_v61  ;;  %v7762_v14 = vadd.f32 %v7761_v56, %v7760_v15 }
0x100d   :  { %v10531_v2 = vadd.f32 %v7762_v14, %v5682_v47  ;;  %v5765_v19 = vmul.f32 %v10529_v45, %v10529_v45 }
0x100f   :  { %v5744_v42 = vadd.f32 %v10531_v2, %v10529_v45  ;;  %v5766_v62 = vmul.f32 %v10531_v2, %v10531_v2 }
0x1011   :  { %v5781_v36 = vadd.f32 %v5766_v62, %v5765_v19 }
0x1013   :  { %v7763_v7 = vpop.f32.mrb[64].mxu1 }
0x1014   :  { %v7764_v27 = vpop.f32.mrb[65].mxu1 }
0x1015   :  { %v7765_v59 = vadd.f32 %v7764_v27, %v7763_v7  ;;  %v7766_v33 = vpop.f32.mrb[66].mxu1 }
0x1016   :  { %v7767_v5 = vpop.f32.mrb[67].mxu1 }
0x1017   :  { %v8018_v32 = vpop.f32.mrb[48].mxu0  ;;  %v10539_v43 = vadd.f32 %v8014_v60, %v7765_v59  ;;  %v7768_v9 = vadd.f32 %v7767_v5, %v7766_v33 }
0x1018   :  { %v5695_v3 = vpop.f32.mrb[49].mxu0 }
0x1019   :  { %v5745_v39 = vadd.f32 %v5744_v42, %v10539_v43  ;;  %v5767_v8 = vmul.f32 %v10539_v43, %v10539_v43  ;;  %v8019_v16 = vpop.f32.mrb[50].mxu0  ;;  %v10544_v57 = vadd.f32 %v8015_v6, %v7768_v9 }
0x101a   :  { %v5698_v54 = vpop.f32.mrb[51].mxu0 }
0x101b   :  { %v5782_v34 = vadd.f32 %v5781_v36, %v5767_v8  ;;  %v5746_v50 = vadd.f32 %v5745_v39, %v10544_v57  ;;  %v5768_v18 = vmul.f32 %v10544_v57, %v10544_v57 }
0x101d   :  { %v5783_v13 = vadd.f32 %v5782_v34, %v5768_v18 }
0x101f   :  { %v7769_v31 = vpop.f32.mrb[68].mxu1 }
0x1020   :  { %v7770_v53 = vpop.f32.mrb[69].mxu1 }
0x1021   :  { %v7771_v1 = vadd.f32 %v7770_v53, %v7769_v31  ;;  %v7772_v44 = vpop.f32.mrb[70].mxu1 }
0x1022   :  { %v7773_v52 = vpop.f32.mrb[71].mxu1 }
0x1023   :  { %v10550_v25 = vadd.f32 %v7771_v1, %v5695_v3  ;;  %v7774_v38 = vadd.f32 %v7773_v52, %v7772_v44 }
0x1024   :  { %v8022_v21 = vpop.f32.mrb[52].mxu0 }
0x1025   :  { %v5747_v11 = vadd.f32 %v5746_v50, %v10550_v25  ;;  %v5769_v12 = vmul.f32 %v10550_v25, %v10550_v25  ;;  %v5711_v28 = vpop.f32.mrb[53].mxu0  ;;  %v10555_v55 = vadd.f32 %v7774_v38, %v5698_v54 }
0x1026   :  { %v8023_v37 = vpop.f32.mrb[54].mxu0 }
0x1027   :  { %v5784_v20 = vadd.f32 %v5783_v13, %v5769_v12  ;;  %v5748_v60 = vadd.f32 %v5747_v11, %v10555_v55  ;;  %v5770_v49 = vmul.f32 %v10555_v55, %v10555_v55  ;;  %v5714_v61 = vpop.f32.mrb[55].mxu0 }
0x1029   :  { %v5785_v63 = vadd.f32 %v5784_v20, %v5770_v49  ;;  %v7775_v15 = vpop.f32.mrb[72].mxu1 }
0x102a   :  { %v7776_v6 = vpop.f32.mrb[73].mxu1 }
0x102b   :  { %v7777_v56 = vadd.f32 %v7776_v6, %v7775_v15  ;;  %v7778_v47 = vpop.f32.mrb[74].mxu1 }
0x102c   :  { %v7779_v4 = vpop.f32.mrb[75].mxu1 }
0x102d   :  { %v10560_v14 = vadd.f32 %v8018_v32, %v7777_v56  ;;  %v7780_v30 = vadd.f32 %v7779_v4, %v7778_v47 }
0x102f   :  { %v5749_v19 = vadd.f32 %v5748_v60, %v10560_v14  ;;  %v5771_v42 = vmul.f32 %v10560_v14, %v10560_v14  ;;  %v10565_v62 = vadd.f32 %v8019_v16, %v7780_v30 }
0x1031   :  { %v5786_v36 = vadd.f32 %v5785_v63, %v5771_v42  ;;  %v5750_v24 = vadd.f32 %v5749_v19, %v10565_v62  ;;  %v5772_v7 = vmul.f32 %v10565_v62, %v10565_v62 }
0x1032   :  { %v8026_v27 = vpop.f32.mrb[56].mxu0 }
0x1033   :  { %v5727_v59 = vpop.f32.mrb[57].mxu0  ;;  %v5787_v33 = vadd.f32 %v5786_v36, %v5772_v7 }
0x1034   :  { %v8027_v5 = vpop.f32.mrb[58].mxu0 }
0x1035   :  { %v5730_v32 = vpop.f32.mrb[59].mxu0  ;;  %v7781_v9 = vpop.f32.mrb[76].mxu1 }
0x1036   :  { %v7782_v3 = vpop.f32.mrb[77].mxu1 }
0x1037   :  { %v7783_v39 = vadd.f32 %v7782_v3, %v7781_v9  ;;  %v7784_v8 = vpop.f32.mrb[78].mxu1 }
0x1038   :  { %v7785_v54 = vpop.f32.mrb[79].mxu1 }
0x1039   :  { %v10570_v34 = vadd.f32 %v7783_v39, %v5711_v28  ;;  %v7786_v16 = vadd.f32 %v7785_v54, %v7784_v8 }
0x103b   :  { %v5751_v50 = vadd.f32 %v5750_v24, %v10570_v34  ;;  %v5773_v18 = vmul.f32 %v10570_v34, %v10570_v34  ;;  %v10575_v13 = vadd.f32 %v7786_v16, %v5714_v61 }
0x103d   :  { %v5788_v31 = vadd.f32 %v5787_v33, %v5773_v18  ;;  %v5752_v53 = vadd.f32 %v5751_v50, %v10575_v13  ;;  %v5774_v1 = vmul.f32 %v10575_v13, %v10575_v13  ;;  %v7787_v44 = vpop.f32.mrb[80].mxu1 }
0x103e   :  { %v7788_v52 = vpop.f32.mrb[81].mxu1 }
0x103f   :  { %v5789_v38 = vadd.f32 %v5788_v31, %v5774_v1  ;;  %v7789_v11 = vadd.f32 %v7788_v52, %v7787_v44  ;;  %v7790_v12 = vpop.f32.mrb[82].mxu1 }
0x1040   :  { %v7791_v28 = vpop.f32.mrb[83].mxu1 }
0x1041   :  { %v10580_v20 = vadd.f32 %v8022_v21, %v7789_v11  ;;  %v7792_v60 = vadd.f32 %v7791_v28, %v7790_v12 }
0x1043   :  { %v5753_v49 = vadd.f32 %v5752_v53, %v10580_v20  ;;  %v5775_v61 = vmul.f32 %v10580_v20, %v10580_v20  ;;  %v10585_v63 = vadd.f32 %v8023_v37, %v7792_v60 }
0x1045   :  { %v5790_v15 = vadd.f32 %v5789_v38, %v5775_v61  ;;  %v5754_v6 = vadd.f32 %v5753_v49, %v10585_v63  ;;  %v5776_v56 = vmul.f32 %v10585_v63, %v10585_v63  ;;  %v7793_v47 = vpop.f32.mrb[84].mxu1 }
0x1046   :  { %v7794_v4 = vpop.f32.mrb[85].mxu1 }
0x1047   :  { %v5791_v30 = vadd.f32 %v5790_v15, %v5776_v56  ;;  %v7795_v19 = vadd.f32 %v7794_v4, %v7793_v47  ;;  %v7796_v21 = vpop.f32.mrb[86].mxu1 }
0x1048   :  { %v7797_v42 = vpop.f32.mrb[87].mxu1 }
0x1049   :  { %v10590_v36 = vadd.f32 %v7795_v19, %v5727_v59  ;;  %v7798_v24 = vadd.f32 %v7797_v42, %v7796_v21 }
0x104b   :  { %v5755_v7 = vadd.f32 %v5754_v6, %v10590_v36  ;;  %v5777_v37 = vmul.f32 %v10590_v36, %v10590_v36  ;;  %v10595_v33 = vadd.f32 %v7798_v24, %v5730_v32 }
0x104d   :  { %v5792_v9 = vadd.f32 %v5791_v30, %v5777_v37  ;;  %v5756_v3 = vadd.f32 %v5755_v7, %v10595_v33  ;;  %v5778_v39 = vmul.f32 %v10595_v33, %v10595_v33  ;;  %v7799_v8 = vpop.f32.mrb[88].mxu1 }
0x104e   :  { %v7800_v54 = vpop.f32.mrb[89].mxu1 }
0x104f   :  { %v5793_v16 = vadd.f32 %v5792_v9, %v5778_v39  ;;  %v7801_v50 = vadd.f32 %v7800_v54, %v7799_v8  ;;  %v7802_v59 = vpop.f32.mrb[90].mxu1 }
0x1050   :  { %v7803_v18 = vpop.f32.mrb[91].mxu1 }
0x1051   :  { %v10600_v31 = vadd.f32 %v8026_v27, %v7801_v50  ;;  %v7804_v53 = vadd.f32 %v7803_v18, %v7802_v59 }
0x1053   :  { %v5757_v1 = vadd.f32 %v5756_v3, %v10600_v31  ;;  %v5779_v32 = vmul.f32 %v10600_v31, %v10600_v31  ;;  %v5739_v44 = vadd.f32 %v8027_v5, %v7804_v53 }
0x1055   :  { %v5794_v52 = vadd.f32 %v5793_v16, %v5779_v32  ;;  %v5758_v38 = vadd.f32 %v5757_v1, %v5739_v44  ;;  %v5780_v11 = vmul.f32 %v5739_v44, %v5739_v44  ;;  %v10654_v32 = vld [vmem:[%s11256_s4 + $0xb] ss:$0 sm:$0xff] }
0x1057   :  { %v5759_v12 = vrot.slane %v5758_v38, 4  ;;  %v5795_v28 = vadd.f32 %v5794_v52, %v5780_v11 }
0x1059   :  { %v5760_v60 = vadd.f32 %v5759_v12, %v5758_v38  ;;  %v5796_v49 = vrot.slane %v5795_v28, 4 }
0x105b   :  { %v5761_v61 = vrot.slane %v5760_v60, 2  ;;  %v5797_v15 = vadd.f32 %v5796_v49, %v5795_v28 }
0x105d   :  { %v5762_v6 = vadd.f32 %v5761_v61, %v5760_v60  ;;  %v5798_v56 = vrot.slane %v5797_v15, 2 }
0x105f   :  { %v5763_v27 = vrot.slane %v5762_v6, 1  ;;  %v5799_v47 = vadd.f32 %v5798_v56, %v5797_v15 }
0x1061   :  { %v5764_v4 = vadd.f32 %v5763_v27, %v5762_v6  ;;  %v5800_v30 = vrot.slane %v5799_v47, 1 }
0x1063   :  { %v5801_v19 = vadd.f32 %v5800_v30, %v5799_v47  ;;  %v10605_v21 = vmul.f32 0.0078125, %v5764_v4 }
0x1065   :  { %v5803_v42 = vmul.f32 0.0078125, %v5801_v19  ;;  %v5804_v5 = vmul.f32 %v10605_v21, %v10605_v21  ;;  %v5822_v24 = vsub.f32 %v5739_v44, %v10605_v21  ;;  %v5807_v7 = vsub.f32 %v10529_v45, %v10605_v21 }
0x1066   :  { %v5808_v37 = vsub.f32 %v10531_v2, %v10605_v21  ;;  %v5809_v9 = vsub.f32 %v10539_v43, %v10605_v21  ;;  %v5810_v3 = vsub.f32 %v10544_v57, %v10605_v21  ;;  %v5811_v39 = vsub.f32 %v10550_v25, %v10605_v21 }
0x1067   :  { %v5805_v8 = vsub.f32 %v5803_v42, %v5804_v5  ;;  %v5812_v54 = vsub.f32 %v10555_v55, %v10605_v21  ;;  %v5813_v16 = vsub.f32 %v10560_v14, %v10605_v21  ;;  %v5814_v45 = vsub.f32 %v10565_v62, %v10605_v21 }
0x1068   :  { %v5815_v2 = vsub.f32 %v10570_v34, %v10605_v21  ;;  %v5816_v43 = vsub.f32 %v10575_v13, %v10605_v21  ;;  %v5817_v57 = vsub.f32 %v10580_v20, %v10605_v21  ;;  %v5818_v25 = vsub.f32 %v10585_v63, %v10605_v21  ;;  %v10645_v13 = vld [vmem:[%s11256_s4 + $0xa] ss:$0 sm:$0xff] }
0x1069   :  { %v5806_v50 = vmax.f32 %v5805_v8, 0.0  ;;  %v5819_v55 = vsub.f32 %v10590_v36, %v10605_v21  ;;  %v5820_v14 = vsub.f32 %v10595_v33, %v10605_v21  ;;  %v5821_v62 = vsub.f32 %v10600_v31, %v10605_v21 }
0x106b   :  { %v5823_v34 = vadd.f32 1e-05, %v5806_v50 }
0x106d   :  { %8355 = vrsqrt.f32 %v5823_v34 }
0x1077   :  { %v10640_v59 = vpop.eup %8355 }
0x1078   :  { %v5840_v20 = vmul.f32 %v10640_v59, %v5822_v24  ;;  %v5825_v18 = vmul.f32 %v10640_v59, %v5807_v7  ;;  %v5826_v53 = vmul.f32 %v10640_v59, %v5808_v37  ;;  %v5827_v1 = vmul.f32 %v10640_v59, %v5809_v9 }
0x1079   :  { %v5828_v44 = vmul.f32 %v10640_v59, %v5810_v3  ;;  %v5829_v52 = vmul.f32 %v10640_v59, %v5811_v39  ;;  %v5830_v38 = vmul.f32 %v10640_v59, %v5812_v54  ;;  %v5831_v11 = vmul.f32 %v10640_v59, %v5813_v16 }
0x107a   :  { %v10661_v12 = vmul.f32 %v10645_v13, %v5840_v20  ;;  %v5845_v28 = vmul.f32 %v10645_v13, %v5825_v18  ;;  %v5846_v60 = vmul.f32 %v10645_v13, %v5826_v53  ;;  %v5847_v49 = vmul.f32 %v10645_v13, %v5827_v1 }
0x107b   :  { %v5848_v61 = vmul.f32 %v10645_v13, %v5828_v44  ;;  %v5849_v15 = vmul.f32 %v10645_v13, %v5829_v52  ;;  %v5850_v6 = vmul.f32 %v10645_v13, %v5830_v38  ;;  %v5832_v56 = vmul.f32 %v10640_v59, %v5814_v45 }
0x107c   :  { %v5865_v27 = vadd.f32 %v10654_v32, %v5845_v28  ;;  %v5866_v47 = vadd.f32 %v10654_v32, %v5846_v60  ;;  %v5867_v4 = vadd.f32 %v10654_v32, %v5847_v49  ;;  %v5851_v30 = vmul.f32 %v10645_v13, %v5831_v11 }
0x107d   :  { %v5868_v19 = vadd.f32 %v10654_v32, %v5848_v61  ;;  %v5869_v42 = vadd.f32 %v10654_v32, %v5849_v15  ;;  %v5870_v5 = vadd.f32 %v10654_v32, %v5850_v6  ;;  %v5852_v24 = vmul.f32 %v10645_v13, %v5832_v56 }
0x107e   :  { %vm5881_vm11 = vcmp.ge.f32.partialorder %v5865_v27, 0.0  ;;  %vm5882_vm12 = vcmp.ge.f32.partialorder %v5866_v47, 0.0  ;;  %v5897_v7 = vmul.f32 0.01, %v5865_v27  ;;  %v5898_v37 = vmul.f32 0.01, %v5866_v47 }
0x107f   :  { %vm5883_vm13 = vcmp.ge.f32.partialorder %v5867_v4, 0.0  ;;  %vm5884_vm14 = vcmp.ge.f32.partialorder %v5868_v19, 0.0  ;;  %v5899_v9 = vmul.f32 0.01, %v5867_v4  ;;  %v5900_v3 = vmul.f32 0.01, %v5868_v19 }
0x1080   :  { %v5913_v39 = vsel %vm5881_vm11, %v5865_v27, %v5897_v7  ;;  %v5914_v8 = vsel %vm5882_vm12, %v5866_v47, %v5898_v37  ;;  %vm5885_vm15 = vcmp.ge.f32.partialorder %v5869_v42, 0.0  ;;  %vm5886_vm8 = vcmp.ge.f32.partialorder %v5870_v5, 0.0 }
0x1081   :  { %v5929_v54 = vpack.c.bf16 %v5914_v8, %v5913_v39  ;;  %v5915_v16 = vsel %vm5883_vm13, %v5867_v4, %v5899_v9  ;;  %v5916_v45 = vsel %vm5884_vm14, %v5868_v19, %v5900_v3  ;;  %v5901_v50 = vmul.f32 0.01, %v5869_v42 }
0x1082   :  { %v5930_v34 = vpack.c.bf16 %v5916_v45, %v5915_v16  ;;  %v5902_v20 = vmul.f32 0.01, %v5870_v5  ;;  %v5871_v18 = vadd.f32 %v10654_v32, %v5851_v30  ;;  %v5872_v53 = vadd.f32 %v10654_v32, %v5852_v24 }
0x1083   :  { %8044 = vmatprep.mubr.bf16.mxu0 %v5929_v54  ;;  %v5917_v1 = vsel %vm5885_vm15, %v5869_v42, %v5901_v50  ;;  %v5833_v44 = vmul.f32 %v10640_v59, %v5815_v2  ;;  %v5834_v52 = vmul.f32 %v10640_v59, %v5816_v43  ;;  %v5835_v38 = vmul.f32 %v10640_v59, %v5817_v57 }
0x1084   :  { %8045 = vmatmul.mubr.bf16.vlgmr.msra.gmra.mrb[60].mxu0 %v5930_v34  ;;  %v5918_v11 = vsel %vm5886_vm8, %v5870_v5, %v5902_v20  ;;  %vm5887_vm10 = vcmp.ge.f32.partialorder %v5871_v18, 0.0  ;;  %vm5888_vm11 = vcmp.ge.f32.partialorder %v5872_v53, 0.0  ;;  %v5903_v28 = vmul.f32 0.01, %v5871_v18 }
0x1085   :  { %v5931_v60 = vpack.c.bf16 %v5918_v11, %v5917_v1  ;;  %v5904_v49 = vmul.f32 0.01, %v5872_v53  ;;  %v5853_v61 = vmul.f32 %v10645_v13, %v5833_v44  ;;  %v5854_v15 = vmul.f32 %v10645_v13, %v5834_v52 }
0x1086   :  { %v5919_v6 = vsel %vm5887_vm10, %v5871_v18, %v5903_v28  ;;  %v5836_v2 = vmul.f32 %v10640_v59, %v5818_v25  ;;  %v5855_v43 = vmul.f32 %v10645_v13, %v5835_v38  ;;  %v5837_v57 = vmul.f32 %v10640_v59, %v5819_v55 }
0x1087   :  { %8048 = vmatprep.mubr.bf16.mxu0 %v5931_v60  ;;  %v5920_v56 = vsel %vm5888_vm11, %v5872_v53, %v5904_v49  ;;  %v5873_v27 = vadd.f32 %v10654_v32, %v5853_v61  ;;  %v5874_v47 = vadd.f32 %v10654_v32, %v5854_v15  ;;  %v5838_v63 = vmul.f32 %v10640_v59, %v5820_v14 }
0x1088   :  { %v5932_v4 = vpack.c.bf16 %v5920_v56, %v5919_v6  ;;  %v5856_v25 = vmul.f32 %v10645_v13, %v5836_v2  ;;  %v5875_v30 = vadd.f32 %v10654_v32, %v5855_v43  ;;  %v5857_v36 = vmul.f32 %v10645_v13, %v5837_v57 }
0x1089   :  { %vm5889_vm12 = vcmp.ge.f32.partialorder %v5873_v27, 0.0  ;;  %vm5890_vm13 = vcmp.ge.f32.partialorder %v5874_v47, 0.0  ;;  %v5905_v55 = vmul.f32 0.01, %v5873_v27  ;;  %v5906_v19 = vmul.f32 0.01, %v5874_v47 }
0x108a   :  { %v5876_v42 = vadd.f32 %v10654_v32, %v5856_v25  ;;  %vm5891_vm14 = vcmp.ge.f32.partialorder %v5875_v30, 0.0  ;;  %v5907_v5 = vmul.f32 0.01, %v5875_v30  ;;  %v5858_v24 = vmul.f32 %v10645_v13, %v5838_v63 }
0x108b   :  { %v5921_v33 = vsel %vm5889_vm12, %v5873_v27, %v5905_v55  ;;  %v5922_v7 = vsel %vm5890_vm13, %v5874_v47, %v5906_v19  ;;  %v5877_v14 = vadd.f32 %v10654_v32, %v5857_v36  ;;  %v5839_v37 = vmul.f32 %v10640_v59, %v5821_v62 }
0x108c   :  { %8049 = vmatmul.mubr.bf16.gmra.mrb[64].mxu0 %v5932_v4  ;;  %v5933_v9 = vpack.c.bf16 %v5922_v7, %v5921_v33  ;;  %vm5892_vm15 = vcmp.ge.f32.partialorder %v5876_v42, 0.0  ;;  %v5908_v3 = vmul.f32 0.01, %v5876_v42  ;;  %v5923_v39 = vsel %vm5891_vm14, %v5875_v30, %v5907_v5 }
0x108d   :  { %v5878_v8 = vadd.f32 %v10654_v32, %v5858_v24  ;;  %vm5893_vm8 = vcmp.ge.f32.partialorder %v5877_v14, 0.0  ;;  %v5909_v54 = vmul.f32 0.01, %v5877_v14  ;;  %v5859_v16 = vmul.f32 %v10645_v13, %v5839_v37 }
0x108e   :  { %8052 = vmatprep.mubr.bf16.mxu0 %v5933_v9  ;;  %v5924_v45 = vsel %vm5892_vm15, %v5876_v42, %v5908_v3  ;;  %v5880_v50 = vadd.f32 %v10654_v32, %v10661_v12 }
0x108f   :  { %v5934_v34 = vpack.c.bf16 %v5924_v45, %v5923_v39  ;;  %vm5894_vm10 = vcmp.ge.f32.partialorder %v5878_v8, 0.0  ;;  %v5910_v31 = vmul.f32 0.01, %v5878_v8  ;;  %v5925_v21 = vsel %vm5893_vm8, %v5877_v14, %v5909_v54 }
0x1090   :  { %v5879_v62 = vadd.f32 %v10654_v32, %v5859_v16  ;;  %vm5896_vm11 = vcmp.ge.f32.partialorder %v5880_v50, 0.0  ;;  %v5912_v59 = vmul.f32 0.01, %v5880_v50 }
0x1091   :  { %v5926_v20 = vsel %vm5894_vm10, %v5878_v8, %v5910_v31 }
0x1092   :  { %v5935_v18 = vpack.c.bf16 %v5926_v20, %v5925_v21  ;;  %vm5895_vm12 = vcmp.ge.f32.partialorder %v5879_v62, 0.0  ;;  %v5911_v53 = vmul.f32 0.01, %v5879_v62  ;;  %v5928_v1 = vsel %vm5896_vm11, %v5880_v50, %v5912_v59 }
0x1094   :  { %8053 = vmatmul.mubr.bf16.gmra.mrb[68].mxu0 %v5934_v34  ;;  %v5927_v13 = vsel %vm5895_vm12, %v5879_v62, %v5911_v53 }
0x1095   :  { %8056 = vmatprep.mubr.bf16.mxu0 %v5935_v18  ;;  %v5936_v44 = vpack.c.bf16 %v5928_v1, %v5927_v13 }
0x109c   :  { %8057 = vmatmul.mubr.bf16.gmra.mrb[72].mxu0 %v5936_v44 }
0x109d   :  { %8076 = vmatprep.mubr.msk.bf16.mxu0 %vm8555_vm9, %v8554_v22 }
0x1157   :  { %v10717_v12 = vpop.f32.mrb[60].mxu0 }
0x1158   :  { %v10719_v52 = vpop.f32.mrb[61].mxu0  ;;  %v6123_v49 = vmul.f32 %v10717_v12, %v10717_v12 }
0x1159   :  { %v10721_v32 = vpop.f32.mrb[62].mxu0  ;;  %v6121_v11 = vmul.f32 %v10719_v52, %v10719_v52 }
0x115a   :  { %v10723_v38 = vpop.f32.mrb[63].mxu0  ;;  %v6124_v6 = vmul.f32 %v10721_v32, %v10721_v32 }
0x115b   :  { %v6100_v28 = vadd.f32 %v10723_v38, %v10719_v52  ;;  %v6122_v60 = vmul.f32 %v10723_v38, %v10723_v38 }
0x115d   :  { %v6101_v61 = vadd.f32 %v10717_v12, %v6100_v28  ;;  %v6137_v15 = vadd.f32 %v6122_v60, %v6121_v11 }
0x115f   :  { %v6138_v2 = vadd.f32 %v6137_v15, %v6123_v49  ;;  %v10736_v43 = vpop.f32.mrb[64].mxu0  ;;  %v6102_v57 = vadd.f32 %v10721_v32, %v6101_v61 }
0x1160   :  { %v10739_v56 = vpop.f32.mrb[65].mxu0  ;;  %v6127_v19 = vmul.f32 %v10736_v43, %v10736_v43 }
0x1161   :  { %v6103_v27 = vadd.f32 %v6102_v57, %v10739_v56  ;;  %v6125_v47 = vmul.f32 %v10739_v56, %v10739_v56  ;;  %v6139_v63 = vadd.f32 %v6138_v2, %v6124_v6  ;;  %v10744_v4 = vpop.f32.mrb[66].mxu0 }
0x1162   :  { %v10746_v25 = vpop.f32.mrb[67].mxu0  ;;  %v6128_v24 = vmul.f32 %v10744_v4, %v10744_v4 }
0x1163   :  { %v6140_v30 = vadd.f32 %v6139_v63, %v6125_v47  ;;  %v6104_v36 = vadd.f32 %v6103_v27, %v10746_v25  ;;  %v6126_v55 = vmul.f32 %v10746_v25, %v10746_v25 }
0x1165   :  { %v6105_v42 = vadd.f32 %v10736_v43, %v6104_v36  ;;  %v6141_v5 = vadd.f32 %v6140_v30, %v6126_v55 }
0x1167   :  { %v6142_v33 = vadd.f32 %v6141_v5, %v6127_v19  ;;  %v10756_v7 = vpop.f32.mrb[68].mxu0  ;;  %v6106_v14 = vadd.f32 %v10744_v4, %v6105_v42 }
0x1168   :  { %v10759_v37 = vpop.f32.mrb[69].mxu0  ;;  %v6131_v34 = vmul.f32 %v10756_v7, %v10756_v7 }
0x1169   :  { %v6107_v9 = vadd.f32 %v6106_v14, %v10759_v37  ;;  %v6129_v3 = vmul.f32 %v10759_v37, %v10759_v37  ;;  %v6143_v39 = vadd.f32 %v6142_v33, %v6128_v24  ;;  %v10764_v8 = vpop.f32.mrb[70].mxu0 }
0x116a   :  { %v10766_v54 = vpop.f32.mrb[71].mxu0  ;;  %v6132_v62 = vmul.f32 %v10764_v8, %v10764_v8 }
0x116b   :  { %v6144_v16 = vadd.f32 %v6143_v39, %v6129_v3  ;;  %v6108_v45 = vadd.f32 %v6107_v9, %v10766_v54  ;;  %v6130_v50 = vmul.f32 %v10766_v54, %v10766_v54 }
0x116d   :  { %v6109_v31 = vadd.f32 %v10756_v7, %v6108_v45  ;;  %v6145_v21 = vadd.f32 %v6144_v16, %v6130_v50 }
0x116f   :  { %v6146_v59 = vadd.f32 %v6145_v21, %v6131_v34  ;;  %v10776_v20 = vpop.f32.mrb[72].mxu0  ;;  %v6110_v18 = vadd.f32 %v10764_v8, %v6109_v31 }
0x1170   :  { %v10779_v53 = vpop.f32.mrb[73].mxu0  ;;  %v6135_v15 = vmul.f32 %v10776_v20, %v10776_v20 }
0x1171   :  { %v6111_v1 = vadd.f32 %v6110_v18, %v10779_v53  ;;  %v6133_v13 = vmul.f32 %v10779_v53, %v10779_v53  ;;  %v6147_v44 = vadd.f32 %v6146_v59, %v6132_v62  ;;  %v10784_v11 = vpop.f32.mrb[74].mxu0 }
0x1172   :  { %v6086_v28 = vpop.f32.mrb[75].mxu0  ;;  %v6136_v57 = vmul.f32 %v10784_v11, %v10784_v11 }
0x1173   :  { %v6148_v60 = vadd.f32 %v6147_v44, %v6133_v13  ;;  %v6112_v49 = vadd.f32 %v6111_v1, %v6086_v28  ;;  %v6134_v61 = vmul.f32 %v6086_v28, %v6086_v28 }
0x1175   :  { %v6113_v6 = vadd.f32 %v10776_v20, %v6112_v49  ;;  %v6149_v2 = vadd.f32 %v6148_v60, %v6134_v61 }
0x1177   :  { %v6114_v27 = vadd.f32 %v10784_v11, %v6113_v6  ;;  %v6150_v47 = vadd.f32 %v6149_v2, %v6135_v15  ;;  %v10841_v6 = vld [vmem:[%s11256_s4 + $0xd] ss:$0 sm:$0xff] }
0x1179   :  { %v6115_v63 = vrot.slane %v6114_v27, 4  ;;  %v6151_v30 = vadd.f32 %v6150_v47, %v6136_v57 }
0x117b   :  { %v6116_v36 = vadd.f32 %v6115_v63, %v6114_v27  ;;  %v6152_v55 = vrot.slane %v6151_v30, 4 }
0x117d   :  { %v6117_v19 = vrot.slane %v6116_v36, 2  ;;  %v6153_v42 = vadd.f32 %v6152_v55, %v6151_v30 }
0x117f   :  { %v6118_v5 = vadd.f32 %v6117_v19, %v6116_v36  ;;  %v6154_v24 = vrot.slane %v6153_v42, 2 }
0x1181   :  { %v6119_v33 = vrot.slane %v6118_v5, 1  ;;  %v6155_v14 = vadd.f32 %v6154_v24, %v6153_v42 }
0x1183   :  { %v6120_v9 = vadd.f32 %v6119_v33, %v6118_v5  ;;  %v6156_v3 = vrot.slane %v6155_v14, 1 }
0x1185   :  { %v6157_v39 = vadd.f32 %v6156_v3, %v6155_v14  ;;  %v10792_v16 = vmul.f32 0.0078125, %v6120_v9  ;;  %v10861_v3 = vld [vmem:[%s11256_s4 + $0xe] ss:$0 sm:$0xff] }
0x1187   :  { %v6159_v45 = vmul.f32 0.0078125, %v6157_v39  ;;  %v6160_v50 = vmul.f32 %v10792_v16, %v10792_v16  ;;  %v6176_v34 = vsub.f32 %v6086_v28, %v10792_v16  ;;  %v6164_v31 = vsub.f32 %v10723_v38, %v10792_v16 }
0x1188   :  { %v6163_v21 = vsub.f32 %v10719_v52, %v10792_v16  ;;  %v6171_v62 = vsub.f32 %v10759_v37, %v10792_v16  ;;  %v6172_v59 = vsub.f32 %v10766_v54, %v10792_v16  ;;  %v6165_v18 = vsub.f32 %v10717_v12, %v10792_v16 }
0x1189   :  { %v6161_v1 = vsub.f32 %v6159_v45, %v6160_v50  ;;  %v6173_v13 = vsub.f32 %v10756_v7, %v10792_v16  ;;  %v6166_v44 = vsub.f32 %v10721_v32, %v10792_v16  ;;  %v6174_v38 = vsub.f32 %v10764_v8, %v10792_v16 }
0x118a   :  { %v6167_v52 = vsub.f32 %v10739_v56, %v10792_v16  ;;  %v6175_v37 = vsub.f32 %v10779_v53, %v10792_v16  ;;  %v6168_v54 = vsub.f32 %v10746_v25, %v10792_v16  ;;  %v6169_v12 = vsub.f32 %v10736_v43, %v10792_v16  ;;  %v10832_v25 = vld [vmem:[%s11256_s4 + $0xc] ss:$0 sm:$0xff] }
0x118b   :  { %v6162_v28 = vmax.f32 %v6161_v1, 0.0  ;;  %v6177_v7 = vsub.f32 %v10776_v20, %v10792_v16  ;;  %v6170_v32 = vsub.f32 %v10744_v4, %v10792_v16  ;;  %v6178_v8 = vsub.f32 %v10784_v11, %v10792_v16 }
0x118d   :  { %v6179_v56 = vadd.f32 1e-05, %v6162_v28 }
0x118f   :  { %8357 = vrsqrt.f32 %v6179_v56 }
0x1199   :  { %v10827_v60 = vpop.eup %8357 }
0x119a   :  { %v6194_v53 = vmul.f32 %v10827_v60, %v6176_v34  ;;  %v6182_v49 = vmul.f32 %v10827_v60, %v6164_v31  ;;  %v6181_v61 = vmul.f32 %v10827_v60, %v6163_v21  ;;  %v6189_v15 = vmul.f32 %v10827_v60, %v6171_v62 }
0x119b   :  { %v6190_v2 = vmul.f32 %v10827_v60, %v6172_v59  ;;  %v6183_v57 = vmul.f32 %v10827_v60, %v6165_v18  ;;  %v6191_v27 = vmul.f32 %v10827_v60, %v6173_v13  ;;  %v6184_v47 = vmul.f32 %v10827_v60, %v6166_v44 }
0x119c   :  { %v6202_v63 = vmul.f32 %v10832_v25, %v6182_v49  ;;  %v6201_v30 = vmul.f32 %v10832_v25, %v6181_v61  ;;  %v6209_v36 = vmul.f32 %v10832_v25, %v6189_v15  ;;  %v6192_v9 = vmul.f32 %v10827_v60, %v6174_v38 }
0x119d   :  { %v6210_v55 = vmul.f32 %v10832_v25, %v6190_v2  ;;  %v6203_v19 = vmul.f32 %v10832_v25, %v6183_v57  ;;  %v6211_v42 = vmul.f32 %v10832_v25, %v6191_v27  ;;  %v6204_v5 = vmul.f32 %v10832_v25, %v6184_v47 }
0x119e   :  { %v6222_v24 = vadd.f32 %v10841_v6, %v6202_v63  ;;  %v6221_v33 = vadd.f32 %v10841_v6, %v6201_v30  ;;  %v6229_v14 = vadd.f32 %v10841_v6, %v6209_v36  ;;  %v6214_v28 = vmul.f32 %v10832_v25, %v6194_v53 }
0x119f   :  { %v6230_v39 = vadd.f32 %v10841_v6, %v6210_v55  ;;  %v6223_v45 = vadd.f32 %v10841_v6, %v6203_v19  ;;  %v6231_v50 = vadd.f32 %v10841_v6, %v6211_v42  ;;  %v6224_v34 = vadd.f32 %v10841_v6, %v6204_v5 }
0x11a0   :  { %vm6238_vm9 = vcmp.ge.f32.partialorder %v6222_v24, 0.0  ;;  %v6254_v31 = vmul.f32 0.01, %v6222_v24  ;;  %vm6237_vm13 = vcmp.ge.f32.partialorder %v6221_v33, 0.0  ;;  %v6253_v21 = vmul.f32 0.01, %v6221_v33 }
0x11a1   :  { %vm6245_vm14 = vcmp.ge.f32.partialorder %v6229_v14, 0.0  ;;  %v6261_v62 = vmul.f32 0.01, %v6229_v14  ;;  %vm6246_vm15 = vcmp.ge.f32.partialorder %v6230_v39, 0.0  ;;  %v6262_v59 = vmul.f32 0.01, %v6230_v39 }
0x11a2   :  { %v6270_v18 = vsel %vm6238_vm9, %v6222_v24, %v6254_v31  ;;  %v6269_v1 = vsel %vm6237_vm13, %v6221_v33, %v6253_v21  ;;  %vm6239_vm8 = vcmp.ge.f32.partialorder %v6223_v45, 0.0  ;;  %v6255_v13 = vmul.f32 0.01, %v6223_v45 }
0x11a3   :  { %v6291_v44 = vmul.f32 %v10861_v3, %v6270_v18  ;;  %v6290_v38 = vmul.f32 %v10861_v3, %v6269_v1  ;;  %v6277_v56 = vsel %vm6245_vm14, %v6229_v14, %v6261_v62  ;;  %v6278_v49 = vsel %vm6246_vm15, %v6230_v39, %v6262_v59 }
0x11a4   :  { %v6271_v61 = vsel %vm6239_vm8, %v6223_v45, %v6255_v13  ;;  %vm6247_vm10 = vcmp.ge.f32.partialorder %v6231_v50, 0.0  ;;  %v6263_v15 = vmul.f32 0.01, %v6231_v50  ;;  %vm6240_vm11 = vcmp.ge.f32.partialorder %v6224_v34, 0.0 }
0x11a5   :  { %6308 = vadd.xlane.f32.xlu0 %v6291_v44  ;;  %6306 = vadd.xlane.f32.xlu1 %v6290_v38  ;;  %v6256_v2 = vmul.f32 0.01, %v6224_v34  ;;  %v6212_v57 = vmul.f32 %v10832_v25, %v6192_v9  ;;  %v6185_v27 = vmul.f32 %v10827_v60, %v6167_v52  ;;  %v6193_v47 = vmul.f32 %v10827_v60, %v6175_v37 }
0x11a6   :  { %v6186_v63 = vmul.f32 %v10827_v60, %v6168_v54  ;;  %v6298_v30 = vmul.f32 %v10861_v3, %v6277_v56  ;;  %v6299_v53 = vmul.f32 %v10861_v3, %v6278_v49  ;;  %v6187_v36 = vmul.f32 %v10827_v60, %v6169_v12 }
0x11a7   :  { %v6292_v55 = vmul.f32 %v10861_v3, %v6271_v61  ;;  %v6279_v19 = vsel %vm6247_vm10, %v6231_v50, %v6263_v15  ;;  %v6232_v42 = vadd.f32 %v10841_v6, %v6212_v57  ;;  %v6205_v52 = vmul.f32 %v10832_v25, %v6185_v27 }
0x11a8   :  { %v6272_v37 = vsel %vm6240_vm11, %v6224_v34, %v6256_v2  ;;  %v6213_v54 = vmul.f32 %v10832_v25, %v6193_v47  ;;  %v6206_v5 = vmul.f32 %v10832_v25, %v6186_v63  ;;  %v6234_v12 = vadd.f32 %v10841_v6, %v6214_v28 }
0x11a9   :  { %6322 = vadd.xlane.f32.xlu0 %v6298_v30  ;;  %6324 = vadd.xlane.f32.xlu1 %v6299_v53  ;;  %vm6248_vm12 = vcmp.ge.f32.partialorder %v6232_v42, 0.0  ;;  %v6264_v24 = vmul.f32 0.01, %v6232_v42  ;;  %v6225_v43 = vadd.f32 %v10841_v6, %v6205_v52  ;;  %v6300_v33 = vmul.f32 %v10861_v3, %v6279_v19 }
0x11aa   :  { %v6233_v14 = vadd.f32 %v10841_v6, %v6213_v54  ;;  %v6226_v9 = vadd.f32 %v10841_v6, %v6206_v5  ;;  %v6195_v39 = vmul.f32 %v10827_v60, %v6177_v7  ;;  %v6207_v34 = vmul.f32 %v10832_v25, %v6187_v36 }
0x11ab   :  { %v6280_v45 = vsel %vm6248_vm12, %v6232_v42, %v6264_v24  ;;  %v6257_v50 = vmul.f32 0.01, %v6225_v43  ;;  %vm6241_vm9 = vcmp.ge.f32.partialorder %v6225_v43, 0.0  ;;  %v6293_v21 = vmul.f32 %v10861_v3, %v6272_v37 }
0x11ac   :  { %vm6249_vm13 = vcmp.ge.f32.partialorder %v6233_v14, 0.0  ;;  %v6265_v31 = vmul.f32 0.01, %v6233_v14  ;;  %vm6250_vm14 = vcmp.ge.f32.partialorder %v6234_v12, 0.0  ;;  %v6266_v62 = vmul.f32 0.01, %v6234_v12 }
0x11ad   :  { %6310 = vadd.xlane.f32.xlu0 %v6292_v55  ;;  %6326 = vadd.xlane.f32.xlu1 %v6300_v33  ;;  %v6215_v59 = vmul.f32 %v10832_v25, %v6195_v39  ;;  %v6301_v18 = vmul.f32 %v10861_v3, %v6280_v45  ;;  %v6258_v20 = vmul.f32 0.01, %v6226_v9  ;;  %v6188_v7 = vmul.f32 %v10827_v60, %v6170_v32 }
0x11ae   :  { %v6196_v1 = vmul.f32 %v10827_v60, %v6178_v8  ;;  %v6273_v13 = vsel %vm6241_vm9, %v6225_v43, %v6257_v50  ;;  %v6281_v44 = vsel %vm6249_vm13, %v6233_v14, %v6265_v31  ;;  %vm6242_vm15 = vcmp.ge.f32.partialorder %v6226_v9, 0.0 }
0x11af   :  { %v6227_v38 = vadd.f32 %v10841_v6, %v6207_v34  ;;  %v6235_v28 = vadd.f32 %v10841_v6, %v6215_v59  ;;  %v6208_v56 = vmul.f32 %v10832_v25, %v6188_v7  ;;  %v6294_v32 = vmul.f32 %v10861_v3, %v6273_v13 }
0x11b0   :  { %v6216_v4 = vmul.f32 %v10832_v25, %v6196_v1  ;;  %v6302_v49 = vmul.f32 %v10861_v3, %v6281_v44  ;;  %v6274_v11 = vsel %vm6242_vm15, %v6226_v9, %v6258_v20  ;;  %v6282_v16 = vsel %vm6250_vm14, %v6234_v12, %v6266_v62 }
0x11b1   :  { %6312 = vadd.xlane.f32.xlu0 %v6293_v21  ;;  %6328 = vadd.xlane.f32.xlu1 %v6301_v18  ;;  %v6259_v8 = vmul.f32 0.01, %v6227_v38  ;;  %v6267_v60 = vmul.f32 0.01, %v6235_v28  ;;  %v6228_v61 = vadd.f32 %v10841_v6, %v6208_v56  ;;  %vm6243_vm8 = vcmp.ge.f32.partialorder %v6227_v38, 0.0 }
0x11b2   :  { %v6236_v15 = vadd.f32 %v10841_v6, %v6216_v4  ;;  %vm6251_vm10 = vcmp.ge.f32.partialorder %v6235_v28, 0.0  ;;  %v6295_v2 = vmul.f32 %v10861_v3, %v6274_v11  ;;  %v6303_v25 = vmul.f32 %v10861_v3, %v6282_v16 }
0x11b3   :  { %v6275_v57 = vsel %vm6243_vm8, %v6227_v38, %v6259_v8  ;;  %v6283_v27 = vsel %vm6251_vm10, %v6235_v28, %v6267_v60  ;;  %v6260_v47 = vmul.f32 0.01, %v6228_v61  ;;  %vm6244_vm11 = vcmp.ge.f32.partialorder %v6228_v61, 0.0 }
0x11b4   :  { %v6268_v63 = vmul.f32 0.01, %v6236_v15  ;;  %vm6252_vm12 = vcmp.ge.f32.partialorder %v6236_v15, 0.0  ;;  %v6296_v30 = vmul.f32 %v10861_v3, %v6275_v57  ;;  %v6304_v6 = vmul.f32 %v10861_v3, %v6283_v27 }
0x11b5   :  { %6314 = vadd.xlane.f32.xlu0 %v6294_v32  ;;  %6330 = vadd.xlane.f32.xlu1 %v6302_v49  ;;  %v6276_v53 = vsel %vm6244_vm11, %v6228_v61, %v6260_v47 }
0x11b6   :  { %v6284_v36 = vsel %vm6252_vm12, %v6236_v15, %v6268_v63  ;;  %v6297_v55 = vmul.f32 %v10861_v3, %v6276_v53 }
0x11b7   :  { %v6305_v19 = vmul.f32 %v10861_v3, %v6284_v36 }
0x11b9   :  { %6316 = vadd.xlane.f32.xlu0 %v6295_v2  ;;  %6332 = vadd.xlane.f32.xlu1 %v6303_v25 }
0x11bd   :  { %6318 = vadd.xlane.f32.xlu0 %v6296_v30  ;;  %6334 = vadd.xlane.f32.xlu1 %v6304_v6 }
0x11c1   :  { %6320 = vadd.xlane.f32.xlu0 %v6297_v55  ;;  %6336 = vadd.xlane.f32.xlu1 %v6305_v19 }
0x1232   :  { %v6309_v42 = vpop.xlane.xlu0 %6308  ;;  %v6307_v52 = vpop.xlane.xlu1 %6306 }
0x1233   :  { %v6361_v39 = vrot.slane %v6309_v42, %v9132_v26  ;;  %v6357_v45 = vrot.slane %v6307_v52, %v9132_v26 }
0x1235   :  { %v6418_v13 = vsel %vm1245_vm0, %v6361_v39, %v6357_v45 }
0x1236   :  { %v6323_v37 = vpop.xlane.xlu0 %6322  ;;  %v6325_v54 = vpop.xlane.xlu1 %6324 }
0x1237   :  { %v6389_v50 = vrot.slane %v6323_v37, %v9132_v26  ;;  %v6393_v34 = vrot.slane %v6325_v54, %v9132_v26 }
0x1239   :  { %v6425_v44 = vsel %vm1245_vm0, %v6393_v34, %v6389_v50 }
0x123a   :  { %v10921_v5 = vpop.xlane.xlu0 %6310  ;;  %v10923_v24 = vpop.xlane.xlu1 %6326 }
0x123b   :  { %v6365_v31 = vrot.slane %v10921_v5, %v9132_v26  ;;  %v6397_v21 = vrot.slane %v10923_v24, %v9132_v26 }
0x123d   :  { %v6419_v56 = vsel %vm1247_vm1, %v6365_v31, %v6418_v13  ;;  %v6426_v4 = vsel %vm1247_vm1, %v6397_v21, %v6425_v44 }
0x123e   :  { %v10925_v43 = vpop.xlane.xlu0 %6312  ;;  %v10927_v12 = vpop.xlane.xlu1 %6328 }
0x123f   :  { %v6369_v62 = vrot.slane %v10925_v43, %v9132_v26  ;;  %v6401_v59 = vrot.slane %v10927_v12, %v9132_v26 }
0x1241   :  { %v6420_v11 = vsel %vm1249_vm2, %v6369_v62, %v6419_v56  ;;  %v6427_v16 = vsel %vm1249_vm2, %v6401_v59, %v6426_v4 }
0x1242   :  { %v10929_v33 = vpop.xlane.xlu0 %6314  ;;  %v10931_v14 = vpop.xlane.xlu1 %6330 }
0x1243   :  { %v6373_v18 = vrot.slane %v10929_v33, %v9132_v26  ;;  %v6405_v20 = vrot.slane %v10931_v14, %v9132_v26 }
0x1245   :  { %v6421_v8 = vsel %vm1251_vm3, %v6373_v18, %v6420_v11  ;;  %v6428_v60 = vsel %vm1251_vm3, %v6405_v20, %v6427_v16 }
0x1246   :  { %v10933_v9 = vpop.xlane.xlu0 %6316  ;;  %v10935_v3 = vpop.xlane.xlu1 %6332 }
0x1247   :  { %v6377_v38 = vrot.slane %v10933_v9, %v9132_v26  ;;  %v6409_v28 = vrot.slane %v10935_v3, %v9132_v26 }
0x1249   :  { %v6422_v2 = vsel %vm1253_vm4, %v6377_v38, %v6421_v8  ;;  %v6429_v25 = vsel %vm1253_vm4, %v6409_v28, %v6428_v60 }
0x124a   :  { %v10953_v7 = vpop.xlane.xlu0 %6318  ;;  %v10955_v1 = vpop.xlane.xlu1 %6334 }
0x124b   :  { %v6381_v32 = vrot.slane %v10953_v7, %v9132_v26  ;;  %v6413_v49 = vrot.slane %v10955_v1, %v9132_v26 }
0x124d   :  { %v6423_v47 = vsel %vm1255_vm5, %v6381_v32, %v6422_v2  ;;  %v6430_v63 = vsel %vm1255_vm5, %v6413_v49, %v6429_v25 }
0x124e   :  { %v10973_v61 = vpop.xlane.xlu0 %6320  ;;  %v10975_v15 = vpop.xlane.xlu1 %6336 }
0x124f   :  { %v6385_v57 = vrot.slane %v10973_v61, %v9132_v26  ;;  %v6417_v27 = vrot.slane %v10975_v15, %v9132_v26 }
0x1251   :  { %v6424_v30 = vsel %vm1257_vm6, %v6385_v57, %v6423_v47  ;;  %v6431_v6 = vsel %vm1257_vm6, %v6417_v27, %v6430_v63 }
0x1252   :  { %v6434_v53 = vsel %vm1268_vm7, %v6424_v30, -inf  ;;  %v6437_v36 = vsel %vm1268_vm7, %v6431_v6, -inf }
0x1253   :  { %6435 = vmax.xlane.f32.xlu0 %v6434_v53  ;;  %6438 = vmax.xlane.f32.xlu1 %v6437_v36 }
0x12e0   :  { %v10989_v55 = vpop.xlane.xlu0 %6435  ;;  %v10995_v45 = vpop.xlane.xlu1 %6438 }
0x12e1   :  { %v6445_v19 = vrot.slane %v10989_v55, %v8654_v10  ;;  %v6449_v39 = vrot.slane %v10989_v55, %v9213_v23  ;;  %v6477_v62 = vrot.slane %v10995_v45, %v8654_v10  ;;  %v6481_v59 = vrot.slane %v10995_v45, %v9213_v23 }
0x12e2   :  { %v6453_v18 = vrot.slane %v10989_v55, %v9216_v35  ;;  %v6485_v20 = vrot.slane %v10995_v45, %v9216_v35  ;;  %v6489_v38 = vrot.slane %v10995_v45, %v9219_v17  ;;  %v6461_v32 = vrot.slane %v10989_v55, %v9225_v0 }
0x12e3   :  { %v6522_v50 = vsub.f32 %v6307_v52, %v6445_v19  ;;  %v6523_v34 = vsub.f32 %v6309_v42, %v6449_v39  ;;  %v6530_v13 = vsub.f32 %v6323_v37, %v6477_v62  ;;  %v6531_v44 = vsub.f32 %v6325_v54, %v6481_v59 }
0x12e4   :  { %v6457_v42 = vrot.slane %v10989_v55, %v9219_v17  ;;  %v6524_v52 = vsub.f32 %v10921_v5, %v6453_v18  ;;  %v6532_v28 = vsub.f32 %v10923_v24, %v6485_v20  ;;  %v6493_v37 = vrot.slane %v10995_v45, %v9225_v0 }
0x12e5   :  { %v6538_v31 = vmul.f32 1.442695, %v6522_v50  ;;  %v6540_v21 = vmul.f32 1.442695, %v6523_v34  ;;  %v6554_v56 = vmul.f32 1.442695, %v6530_v13  ;;  %v6533_v54 = vsub.f32 %v10927_v12, %v6489_v38 }
0x12e6   :  { %v6556_v4 = vmul.f32 1.442695, %v6531_v44  ;;  %v6525_v49 = vsub.f32 %v10925_v43, %v6457_v42  ;;  %v6542_v11 = vmul.f32 1.442695, %v6524_v52  ;;  %v6558_v5 = vmul.f32 1.442695, %v6532_v28 }
0x12e7   :  { %8359 = vpow2.f32 %v6538_v31  ;;  %v6465_v24 = vrot.slane %v10989_v55, %v9232_v51  ;;  %v6526_v43 = vsub.f32 %v10929_v33, %v6461_v32  ;;  %v6497_v12 = vrot.slane %v10995_v45, %v9232_v51 }
0x12e8   :  { %8361 = vpow2.f32 %v6540_v21  ;;  %v6544_v60 = vmul.f32 1.442695, %v6525_v49  ;;  %v6534_v2 = vsub.f32 %v10931_v14, %v6493_v37  ;;  %v6560_v25 = vmul.f32 1.442695, %v6533_v54 }
0x12e9   :  { %8363 = vpow2.f32 %v6554_v56  ;;  %v6469_v57 = vrot.slane %v10989_v55, %v9237_v58  ;;  %v6527_v27 = vsub.f32 %v10933_v9, %v6465_v24  ;;  %v6546_v47 = vmul.f32 1.442695, %v6526_v43 }
0x12ea   :  { %8365 = vpow2.f32 %v6556_v4  ;;  %v6501_v33 = vrot.slane %v10995_v45, %v9237_v58  ;;  %v6535_v63 = vsub.f32 %v10935_v3, %v6497_v12  ;;  %v6562_v30 = vmul.f32 1.442695, %v6534_v2 }
0x12eb   :  { %8367 = vpow2.f32 %v6542_v11  ;;  %v6473_v14 = vrot.slane %v10989_v55, %v9242_v40  ;;  %v6528_v9 = vsub.f32 %v10953_v7, %v6469_v57  ;;  %v6548_v36 = vmul.f32 1.442695, %v6527_v27 }
0x12ec   :  { %8369 = vpow2.f32 %v6558_v5  ;;  %v6505_v3 = vrot.slane %v10995_v45, %v9242_v40  ;;  %v6536_v19 = vsub.f32 %v10955_v1, %v6501_v33  ;;  %v6564_v39 = vmul.f32 1.442695, %v6535_v63 }
0x12ed   :  { %8371 = vpow2.f32 %v6544_v60  ;;  %v6529_v55 = vsub.f32 %v10973_v61, %v6473_v14  ;;  %v6550_v7 = vmul.f32 1.442695, %v6528_v9 }
0x12ee   :  { %8373 = vpow2.f32 %v6560_v25  ;;  %v6537_v31 = vsub.f32 %v10975_v15, %v6505_v3  ;;  %v6566_v45 = vmul.f32 1.442695, %v6536_v19 }
0x12ef   :  { %8375 = vpow2.f32 %v6546_v47  ;;  %v6552_v62 = vmul.f32 1.442695, %v6529_v55 }
0x12f0   :  { %8377 = vpow2.f32 %v6562_v30  ;;  %v6568_v61 = vmul.f32 1.442695, %v6537_v31 }
0x12f1   :  { %v11017_v16 = vpop.eup %8359  ;;  %8379 = vpow2.f32 %v6548_v36 }
0x12f2   :  { %v11019_v8 = vpop.eup %8361  ;;  %6587 = vperm.xlu0 %8093, %v11017_v16   ;;  %8381 = vpow2.f32 %v6564_v39 }
0x12f3   :  { %6590 = vperm.xlu1 %8094, %v11019_v8   ;;  %v11035_v6 = vpop.eup %8363  ;;  %8383 = vpow2.f32 %v6550_v7 }
0x12f4   :  { %v11037_v53 = vpop.eup %8365  ;;  %8385 = vpow2.f32 %v6566_v45 }
0x12f5   :  { %v11047_v50 = vpop.eup %8367  ;;  %8387 = vpow2.f32 %v6552_v62 }
0x12f6   :  { %6614 = vperm.xlu0 %8093, %v11037_v53   ;;  %v11049_v34 = vpop.eup %8369  ;;  %8389 = vpow2.f32 %v6568_v61 }
0x12f7   :  { %6611 = vperm.xlu1 %8094, %v11035_v6   ;;  %v11055_v21 = vpop.eup %8371 }
0x12f8   :  { %v11057_v1 = vpop.eup %8373 }
0x12f9   :  { %v11061_v59 = vpop.eup %8375 }
0x12fa   :  { %6617 = vperm.xlu0 %8093, %v11049_v34   ;;  %v11063_v18 = vpop.eup %8377 }
0x12fb   :  { %6593 = vperm.xlu1 %8094, %v11047_v50   ;;  %v11067_v15 = vpop.eup %8379 }
0x12fc   :  { %v11069_v20 = vpop.eup %8381 }
0x12fd   :  { %v11073_v13 = vpop.eup %8383 }
0x12fe   :  { %6620 = vperm.xlu0 %8093, %v11057_v1   ;;  %v11075_v44 = vpop.eup %8385 }
0x12ff   :  { %6596 = vperm.xlu1 %8094, %v11055_v21   ;;  %v11079_v42 = vpop.eup %8387 }
0x1300   :  { %v11081_v52 = vpop.eup %8389 }
0x1302   :  { %6623 = vperm.xlu0 %8093, %v11063_v18  }
0x1303   :  { %6599 = vperm.xlu1 %8094, %v11061_v59  }
0x1306   :  { %6626 = vperm.xlu0 %8093, %v11069_v20  }
0x1307   :  { %6602 = vperm.xlu1 %8094, %v11067_v15  }
0x130a   :  { %6629 = vperm.xlu0 %8093, %v11075_v44  }
0x130b   :  { %6605 = vperm.xlu1 %8094, %v11073_v13  }
0x130e   :  { %6632 = vperm.xlu0 %8093, %v11081_v52  }
0x130f   :  { %6608 = vperm.xlu1 %8094, %v11079_v42  }
0x1371   :  { %v6588_v28 = vpop.permute.xlu0 %6587 }
0x1372   :  { %v6591_v38 = vpop.permute.xlu1 %6590  ;;  %v6637_v43 = vrot.slane %v6588_v28, %v9132_v26 }
0x1373   :  { %v6641_v60 = vrot.slane %v6591_v38, %v9132_v26 }
0x1375   :  { %v6615_v4 = vpop.permute.xlu0 %6614  ;;  %v6698_v14 = vsel %vm1245_vm0, %v6641_v60, %v6637_v43 }
0x1376   :  { %v6612_v56 = vpop.permute.xlu1 %6611  ;;  %v6673_v2 = vrot.slane %v6615_v4, %v9132_v26 }
0x1377   :  { %v6669_v25 = vrot.slane %v6612_v56, %v9132_v26 }
0x1379   :  { %v6618_v49 = vpop.permute.xlu0 %6617  ;;  %v6705_v19 = vsel %vm1245_vm0, %v6673_v2, %v6669_v25  ;;  %v8191_v2 = vld [vmem:[#allocation7 + $0x100] sm:$0xff]  }
0x137a   :  { %v6594_v32 = vpop.permute.xlu1 %6593  ;;  %v6677_v27 = vrot.slane %v6618_v49, %v9132_v26  ;;  %v8192_v25 = vld [vmem:[#allocation7 + $0xc0] sm:$0xff]   ;;  %7837 = vmatprep.subr.bf16.mxu1 %v8191_v2 }
0x137b   :  { %v6645_v57 = vrot.slane %v6594_v32, %v9132_v26  ;;  %7838 = vmatpush3.bf16.msra.mxu1 %v8192_v25 }
0x137c   :  { %v6706_v31 = vsel %vm1247_vm1, %v6677_v27, %v6705_v19  ;;  %v8194_v27 = vld [vmem:[#allocation7 + $0xc8] sm:$0xff]   ;;  %v8200_v19 = vld [vmem:[#allocation7 + $0xe0] sm:$0xff]  }
0x137d   :  { %v6621_v37 = vpop.permute.xlu0 %6620  ;;  %v6699_v39 = vsel %vm1247_vm1, %v6645_v57, %v6698_v14  ;;  %v8193_v57 = vld [vmem:[#allocation7 + $0x108] sm:$0xff]   ;;  %v8197_v14 = vld [vmem:[#allocation7 + $0x118] sm:$0xff]  }
0x137e   :  { %v6597_v11 = vpop.permute.xlu1 %6596  ;;  %v6681_v33 = vrot.slane %v6621_v37, %v9132_v26  ;;  %7839 = vmatprep.subr.bf16.mxu1 %v8193_v57 }
0x137f   :  { %v6649_v47 = vrot.slane %v6597_v11, %v9132_v26  ;;  %7840 = vmatpush3.bf16.msra.mxu1 %v8194_v27 }
0x1380   :  { %v6707_v61 = vsel %vm1249_vm2, %v6681_v33, %v6706_v31  ;;  %v8195_v33 = vld [vmem:[#allocation7 + $0x110] sm:$0xff]  }
0x1381   :  { %v6624_v5 = vpop.permute.xlu0 %6623  ;;  %v6700_v45 = vsel %vm1249_vm2, %v6649_v47, %v6699_v39  ;;  %v8201_v47 = vld [vmem:[#allocation7 + $0x140] sm:$0xff]   ;;  %7841 = vmatprep.subr.bf16.mxu1 %v8195_v33  ;;  %v8203_v39 = vld [vmem:[#allocation7 + $0x128] sm:$0xff]  }
0x1382   :  { %v6600_v54 = vpop.permute.xlu1 %6599  ;;  %v6685_v9 = vrot.slane %v6624_v5, %v9132_v26  ;;  %8061 = vmatpush3.bf16.msra.mxu0 %v8201_v47 }
0x1383   :  { %v6653_v63 = vrot.slane %v6600_v54, %v9132_v26  ;;  %8062 = vmatprep.subr.bf16.mxu0 %v8554_v22 }
0x1384   :  { %v6708_v56 = vsel %vm1251_vm3, %v6685_v9, %v6707_v61  ;;  %v8205_v9 = vld [vmem:[#allocation7 + $0x150] sm:$0xff]  }
0x1385   :  { %v6627_v12 = vpop.permute.xlu0 %6626  ;;  %v6701_v38 = vsel %vm1251_vm3, %v6653_v63, %v6700_v45  ;;  %v8202_v63 = vld [vmem:[#allocation7 + $0x148] sm:$0xff]  }
0x1386   :  { %v6603_v24 = vpop.permute.xlu1 %6602  ;;  %v6689_v55 = vrot.slane %v6627_v12, %v9132_v26  ;;  %8063 = vmatpush3.bf16.msra.mxu0 %v8202_v63 }
0x1387   :  { %v6657_v36 = vrot.slane %v6603_v24, %v9132_v26  ;;  %8064 = vmatprep.subr.bf16.mxu0 %v8554_v22 }
0x1388   :  { %v6709_v11 = vsel %vm1253_vm4, %v6689_v55, %v6708_v56  ;;  %v8204_v55 = vld [vmem:[#allocation7 + $0xe8] sm:$0xff]  }
0x1389   :  { %v6630_v3 = vpop.permute.xlu0 %6629  ;;  %v6702_v4 = vsel %vm1253_vm4, %v6657_v36, %v6701_v38  ;;  %v8198_v36 = vld [vmem:[#allocation7 + $0xd8] sm:$0xff]  }
0x138a   :  { %v6606_v30 = vpop.permute.xlu1 %6605  ;;  %v6693_v62 = vrot.slane %v6630_v3, %v9132_v26  ;;  %v8199_v3 = vld [vmem:[#allocation7 + $0x120] sm:$0xff]   ;;  %8065 = vmatpush3.bf16.msra.mxu0 %v8205_v9  ;;  %v8208_v9 = vld [vmem:[#allocation7 + $0xf0] sm:$0xff]  }
0x138b   :  { %v6661_v7 = vrot.slane %v6606_v30, %v9132_v26  ;;  %v8196_v30 = vld [vmem:[#allocation7 + $0xd0] sm:$0xff]   ;;  %8066 = vmatprep.subr.bf16.mxu0 %v8554_v22 }
0x138c   :  { %v6710_v5 = vsel %vm1255_vm5, %v6693_v62, %v6709_v11  ;;  %7842 = vmatpush3.bf16.msra.mxu1 %v8196_v30 }
0x138d   :  { %v6633_v32 = vpop.permute.xlu0 %6632  ;;  %v6703_v54 = vsel %vm1255_vm5, %v6661_v7, %v6702_v4  ;;  %7843 = vmatprep.subr.bf16.mxu1 %v8197_v14  ;;  %v8207_v14 = vld [vmem:[#allocation7 + $0x130] sm:$0xff]  }
0x138e   :  { %v6609_v28 = vpop.permute.xlu1 %6608  ;;  %v6697_v37 = vrot.slane %v6633_v32, %v9132_v26 }
0x138f   :  { %v6665_v49 = vrot.slane %v6609_v28, %v9132_v26 }
0x1390   :  { %v6711_v43 = vsel %vm1257_vm6, %v6697_v37, %v6710_v5  ;;  %7844 = vmatpush3.bf16.msra.mxu1 %v8198_v36  ;;  %v8211_v36 = vld [vmem:[#allocation7 + $0x138] sm:$0xff]  }
0x1391   :  { %v6704_v24 = vsel %vm1257_vm6, %v6665_v49, %v6703_v54  ;;  %v6717_v12 = vsel %vm1268_vm7, %v6711_v43, 0.0  ;;  %7845 = vmatprep.subr.bf16.mxu1 %v8199_v3 }
0x1392   :  { %v6714_v60 = vsel %vm1268_vm7, %v6704_v24, 0.0  ;;  %6718 = vadd.xlane.f32.xlu0 %v6717_v12 }
0x1393   :  { %6715 = vadd.xlane.f32.xlu1 %v6714_v60 }
0x1394   :  { %7846 = vmatpush3.bf16.msra.mxu1 %v8200_v19  ;;  %v8209_v19 = vld [vmem:[#allocation7 + $0x160] sm:$0xff]  }
0x1395   :  { %7847 = vmatprep.subr.bf16.mxu1 %v8203_v39 }
0x1398   :  { %7848 = vmatpush3.bf16.msra.mxu1 %v8204_v55 }
0x1399   :  { %7849 = vmatprep.subr.bf16.mxu1 %v8207_v14 }
0x139c   :  { %7850 = vmatpush3.bf16.msra.mxu1 %v8208_v9 }
0x139d   :  { %7851 = vmatprep.subr.bf16.mxu1 %v8211_v36 }
0x141f   :  { %v6719_v31 = vpop.xlane.xlu0 %6718 }
0x1420   :  { %v6716_v7 = vpop.xlane.xlu1 %6715  ;;  %v6757_v61 = vrot.slane %v6719_v31, %v8654_v10  ;;  %v6761_v38 = vrot.slane %v6719_v31, %v9213_v23  ;;  %v6765_v28 = vrot.slane %v6719_v31, %v9216_v35  ;;  %v6769_v4 = vrot.slane %v6719_v31, %v9219_v17 }
0x1421   :  { %v6725_v45 = vrot.slane %v6716_v7, %v8654_v10  ;;  %v6729_v62 = vrot.slane %v6716_v7, %v9213_v23  ;;  %v6733_v56 = vrot.slane %v6716_v7, %v9216_v35  ;;  %v6737_v32 = vrot.slane %v6716_v7, %v9219_v17 }
0x1422   :  { %v6773_v10 = vrot.slane %v6719_v31, %v9225_v0  ;;  %v6741_v37 = vrot.slane %v6716_v7, %v9225_v0  ;;  %v6777_v24 = vrot.slane %v6719_v31, %v9232_v51  ;;  %v6745_v43 = vrot.slane %v6716_v7, %v9232_v51 }
0x1423   :  { %8391 = vrcp.f32 %v6725_v45  ;;  %v6781_v0 = vrot.slane %v6719_v31, %v9237_v58  ;;  %v6749_v2 = vrot.slane %v6716_v7, %v9237_v58  ;;  %v6785_v51 = vrot.slane %v6719_v31, %v9242_v40 }
0x1424   :  { %8393 = vrcp.f32 %v6757_v61  ;;  %v6753_v27 = vrot.slane %v6716_v7, %v9242_v40  ;;  %v8210_v7 = vld [vmem:[#allocation7 + $0x168] sm:$0xff]  }
0x1425   :  { %8395 = vrcp.f32 %v6729_v62  ;;  %v8213_v62 = vld [vmem:[#allocation7 + $0x170] sm:$0xff]  }
0x1426   :  { %8397 = vrcp.f32 %v6761_v38  ;;  %v6981_v38 = vunpack.c.l.bf16 %v9451_v29 }
0x1427   :  { %8399 = vrcp.f32 %v6765_v28  ;;  %v6982_v28 = vunpack.c.l.bf16 %v10267_v41 }
0x1428   :  { %8401 = vrcp.f32 %v6733_v56 }
0x1429   :  { %8403 = vrcp.f32 %v6769_v4  ;;  %v6984_v4 = vunpack.c.l.bf16 %v9453_v48 }
0x142a   :  { %8405 = vrcp.f32 %v6737_v32 }
0x142b   :  { %8407 = vrcp.f32 %v6773_v10 }
0x142c   :  { %8409 = vrcp.f32 %v6741_v37 }
0x142d   :  { %v8392_v49 = vpop.eup %8391  ;;  %8411 = vrcp.f32 %v6777_v24 }
0x142e   :  { %v8394_v11 = vpop.eup %8393  ;;  %v6803_v23 = vmul.f32 %v8392_v49, %v11017_v16  ;;  %8413 = vrcp.f32 %v6745_v43 }
0x142f   :  { %v8396_v54 = vpop.eup %8395  ;;  %v6819_v5 = vmul.f32 %v8394_v11, %v11035_v6  ;;  %8415 = vrcp.f32 %v6781_v0 }
0x1430   :  { %v8398_v35 = vpop.eup %8397  ;;  %6851 = vperm.xlu0 %8093, %v6803_v23   ;;  %v6805_v16 = vmul.f32 %v8396_v54, %v11019_v8  ;;  %8417 = vrcp.f32 %v6749_v2 }
0x1431   :  { %6875 = vperm.xlu1 %8094, %v6819_v5   ;;  %v6821_v17 = vmul.f32 %v8398_v35, %v11037_v53  ;;  %v8400_v60 = vpop.eup %8399  ;;  %8419 = vrcp.f32 %v6785_v51 }
0x1432   :  { %v8402_v12 = vpop.eup %8401  ;;  %v6823_v6 = vmul.f32 %v8400_v60, %v11049_v34  ;;  %8421 = vrcp.f32 %v6753_v27 }
0x1433   :  { %v8404_v25 = vpop.eup %8403  ;;  %v6807_v53 = vmul.f32 %v8402_v12, %v11047_v50 }
0x1434   :  { %6878 = vperm.xlu0 %8093, %v6821_v17   ;;  %v8406_v57 = vpop.eup %8405  ;;  %v6825_v8 = vmul.f32 %v8404_v25, %v11057_v1  ;;  %v8206_v1 = vld [vmem:[#allocation7 + $0x158] sm:$0xff]  }
0x1435   :  { %6854 = vperm.xlu1 %8094, %v6805_v16   ;;  %v8408_v47 = vpop.eup %8407  ;;  %v6809_v34 = vmul.f32 %v8406_v57, %v11055_v21  ;;  %8067 = vmatpush3.bf16.msra.mxu0 %v8206_v1 }
0x1436   :  { %v8410_v33 = vpop.eup %8409  ;;  %v6827_v58 = vmul.f32 %v8408_v47, %v11063_v18  ;;  %8068 = vmatprep.subr.bf16.mxu0 %v8554_v22 }
0x1437   :  { %v8412_v50 = vpop.eup %8411  ;;  %v6811_v63 = vmul.f32 %v8410_v33, %v11061_v59  ;;  %v8212_v59 = vld [vmem:[#allocation7 + $0xf8] sm:$0xff]  }
0x1438   :  { %6881 = vperm.xlu0 %8093, %v6823_v6   ;;  %v8414_v30 = vpop.eup %8413  ;;  %v6829_v40 = vmul.f32 %v8412_v50, %v11069_v20  ;;  %7852 = vmatpush3.bf16.msra.mxu1 %v8212_v59 }
0x1439   :  { %6857 = vperm.xlu1 %8094, %v6807_v53   ;;  %v8416_v21 = vpop.eup %8415  ;;  %v6813_v3 = vmul.f32 %v8414_v30, %v11067_v15  ;;  %8069 = vmatpush3.bf16.msra.mxu0 %v8209_v19 }
0x143a   :  { %v8418_v18 = vpop.eup %8417  ;;  %v6831_v39 = vmul.f32 %v8416_v21, %v11075_v44  ;;  %8070 = vmatprep.subr.bf16.mxu0 %v8554_v22  ;;  %v8427_v44 = vld [vmem:[%s11252_s0] sm:$0xf] }
0x143b   :  { %v8420_v55 = vpop.eup %8419  ;;  %v6815_v20 = vmul.f32 %v8418_v18, %v11073_v13  ;;  %v8214_v13 = vld [vmem:[#allocation7 + $0x178] sm:$0xff]   ;;  %v6980_v61 = vunpack.c.l.bf16 %v8427_v44 }
0x143c   :  { %6884 = vperm.xlu0 %8093, %v6825_v8   ;;  %v8422_v31 = vpop.eup %8421  ;;  %v6833_v15 = vmul.f32 %v8420_v55, %v11081_v52 }
0x143d   :  { %6860 = vperm.xlu1 %8094, %v6809_v34   ;;  %v6817_v45 = vmul.f32 %v8422_v31, %v11079_v42  ;;  %8071 = vmatpush3.bf16.msra.mxu0 %v8210_v7  ;;  %v8428_v42 = vld [vmem:[%s11252_s0 + $0x4] sm:$0xf]  ;;  %s8556_s0 = smov [#allocation9]  }
0x143e   :  { %8072 = vmatprep.subr.bf16.mxu0 %v8554_v22  ;;  %v6983_v52 = vunpack.c.l.bf16 %v8428_v42  ;;  %s7350_s3 = sshll.u32 %s8556_s0, 4  ;;  %s7351_s3 = int_to_ptr.vmem [resolvable:$true] %s7350_s3 }
0x143f   :  { %s8495_s9 = scalar_lea.vmem %s7351_s3, 256  ;;  %p8500_p11 = scmp.lt.s32.totalorder %s7351_s3, %s7351_s3 }
0x1440   :  { %6887 = vperm.xlu0 %8093, %v6827_v58   ;;  %p8496_p10 = scmp.ne.s32.totalorder %s7351_s3, %s8495_s9  ;;  %p8501_p12 = scmp.lt.s32.totalorder %s8495_s9, %s8495_s9 }
0x1441   :  { %6863 = vperm.xlu1 %8094, %v6811_v63   ;;  %8073 = vmatpush3.bf16.msra.mxu0 %v8213_v62 }
0x1442   :  { %8074 = vmatprep.subr.bf16.mxu0 %v8554_v22  ;;  %v6985_v22 = vunpack.c.l.bf16 %v10269_v46  ;;  %p8502_p13 = por %p8501_p12, %p8500_p11 }
0x1444   :  { %6890 = vperm.xlu0 %8093, %v6829_v40   ;;  %p8503_p0 = pnand %p8502_p13, %p8496_p10 }
0x1445   :  { %6866 = vperm.xlu1 %8094, %v6813_v3   ;;  %8075 = vmatpush3.bf16.msra.mxu0 %v8214_v13 }
0x1448   :  { %6893 = vperm.xlu0 %8093, %v6831_v39  }
0x1449   :  { %6869 = vperm.xlu1 %8094, %v6815_v20  }
0x144c   :  { %6896 = vperm.xlu0 %8093, %v6833_v15  }
0x144d   :  { %6872 = vperm.xlu1 %8094, %v6817_v45  }
0x14af   :  { %v11164_v56 = vpop.permute.xlu0 %6851 }
0x14b0   :  { %v6988_v32 = vmul.f32 %v6980_v61, %v11164_v56  ;;  %v6989_v49 = vmul.f32 %v6981_v38, %v11164_v56  ;;  %v6990_v10 = vmul.f32 %v6982_v28, %v11164_v56  ;;  %v11171_v11 = vpop.permute.xlu1 %6875 }
0x14b1   :  { %v6991_v23 = vmul.f32 %v6983_v52, %v11171_v11  ;;  %v6992_v29 = vmul.f32 %v6984_v4, %v11171_v11  ;;  %v6993_v41 = vmul.f32 %v6985_v22, %v11171_v11 }
0x14b2   :  { %v6994_v37 = vrot.slane %v6988_v32, 4  ;;  %v7000_v54 = vrot.slane %v6989_v49, 4  ;;  %v7006_v5 = vrot.slane %v6990_v10, 4 }
0x14b3   :  { %v7012_v48 = vrot.slane %v6991_v23, 4  ;;  %v7018_v35 = vrot.slane %v6992_v29, 4  ;;  %v7024_v46 = vrot.slane %v6993_v41, 4  ;;  %v11176_v24 = vpop.permute.xlu0 %6878 }
0x14b4   :  { %v6995_v17 = vadd.f32 %v6994_v37, %v6988_v32  ;;  %v7001_v43 = vadd.f32 %v7000_v54, %v6989_v49  ;;  %v7007_v60 = vadd.f32 %v7006_v5, %v6990_v10  ;;  %v11178_v16 = vpop.permute.xlu1 %6854 }
0x14b5   :  { %v7013_v12 = vadd.f32 %v7012_v48, %v6991_v23  ;;  %v7019_v0 = vadd.f32 %v7018_v35, %v6992_v29  ;;  %v7025_v6 = vadd.f32 %v7024_v46, %v6993_v41  ;;  %v6937_v41 = vrot.slane %v11176_v24, %v9132_v26 }
0x14b6   :  { %v6996_v2 = vrot.slane %v6995_v17, 2  ;;  %v7002_v25 = vrot.slane %v7001_v43, 2  ;;  %v7008_v53 = vrot.slane %v7007_v60, 2  ;;  %v6905_v35 = vrot.slane %v11178_v16, %v9132_v26 }
0x14b7   :  { %v7014_v57 = vrot.slane %v7013_v12, 2  ;;  %v7020_v51 = vrot.slane %v7019_v0, 2  ;;  %v7026_v8 = vrot.slane %v7025_v6, 2  ;;  %v11180_v27 = vpop.permute.xlu0 %6881  ;;  %v6901_v24 = vrot.slane %v11164_v56, %v9132_v26 }
0x14b8   :  { %v6997_v47 = vadd.f32 %v6996_v2, %v6995_v17  ;;  %v7003_v34 = vadd.f32 %v7002_v25, %v7001_v43  ;;  %v7009_v33 = vadd.f32 %v7008_v53, %v7007_v60  ;;  %v11182_v58 = vpop.permute.xlu1 %6857  ;;  %v6941_v46 = vrot.slane %v11180_v27, %v9132_v26 }
0x14b9   :  { %v7015_v50 = vadd.f32 %v7014_v57, %v7013_v12  ;;  %v7021_v63 = vadd.f32 %v7020_v51, %v7019_v0  ;;  %v7027_v30 = vadd.f32 %v7026_v8, %v7025_v6  ;;  %v6933_v17 = vrot.slane %v11171_v11, %v9132_v26 }
0x14ba   :  { %v6998_v1 = vrot.slane %v6997_v47, 1  ;;  %v7010_v14 = vrot.slane %v7009_v33, 1  ;;  %v7004_v9 = vrot.slane %v7003_v34, 1  ;;  %v6909_v43 = vrot.slane %v11182_v58, %v9132_v26 }
0x14bb   :  { %v7016_v40 = vrot.slane %v7015_v50, 1  ;;  %v7028_v36 = vrot.slane %v7027_v30, 1  ;;  %v6885_v21 = vpop.permute.xlu0 %6884  ;;  %v7022_v3 = vrot.slane %v7021_v63, 1  ;;  %v6969_v6 = vsel %vm1245_vm0, %v6937_v41, %v6933_v17 }
0x14bc   :  { %v6999_v19 = vadd.f32 %v6998_v1, %v6997_v47  ;;  %v7011_v18 = vadd.f32 %v7010_v14, %v7009_v33  ;;  %v6861_v59 = vpop.permute.xlu1 %6860  ;;  %v7005_v39 = vadd.f32 %v7004_v9, %v7003_v34  ;;  %v6945_v60 = vrot.slane %v6885_v21, %v9132_v26 }
0x14bd   :  { %v7017_v55 = vadd.f32 %v7016_v40, %v7015_v50  ;;  %v7029_v20 = vadd.f32 %v7028_v36, %v7027_v30  ;;  %v7023_v7 = vadd.f32 %v7022_v3, %v7021_v63  ;;  %v6913_v12 = vrot.slane %v6861_v59, %v9132_v26 }
0x14be   :  { %v7030_v31 = vpack.c.bf16 %v6999_v19, %v6999_v19  ;;  %v7032_v15 = vpack.c.bf16 %v7011_v18, %v7011_v18  ;;  %v7031_v45 = vpack.c.bf16 %v7005_v39, %v7005_v39  ;;  %v6962_v53 = vsel %vm1245_vm0, %v6905_v35, %v6901_v24 }
0x14bf   :  { %v7033_v62 = vpack.c.bf16 %v7017_v55, %v7017_v55  ;;  %v7035_v13 = vpack.c.bf16 %v7029_v20, %v7029_v20  ;;  %v6888_v44 = vpop.permute.xlu0 %6887  ;;  %v7034_v61 = vpack.c.bf16 %v7023_v7, %v7023_v7  ;;  %v6970_v57 = vsel %vm1247_vm1, %v6941_v46, %v6969_v6 }
0x14c0   :  { %v7095_v42 = vunpack.c.l.b16 %v7030_v31  ;;  %v7097_v52 = vunpack.c.l.b16 %v7032_v15  ;;  %v6864_v38 = vpop.permute.xlu1 %6863  ;;  %v7096_v28 = vunpack.c.l.b16 %v7031_v45  ;;  %v6949_v16 = vrot.slane %v6888_v44, %v9132_v26 }
0x14c1   :  { %v7098_v4 = vunpack.c.l.b16 %v7033_v62  ;;  %v7100_v22 = vunpack.c.l.b16 %v7035_v13  ;;  %v7099_v32 = vunpack.c.l.b16 %v7034_v61  ;;  %v6917_v11 = vrot.slane %v6864_v38, %v9132_v26 }
0x14c2   :  { %v6963_v8 = vsel %vm1247_vm1, %v6909_v43, %v6962_v53  ;;  %v6971_v27 = vsel %vm1249_vm2, %v6945_v60, %v6970_v57 }
0x14c3   :  { %v6891_v49 = vpop.permute.xlu0 %6890  ;;  %v7102_v10 = vsel %vm1245_vm0, %v7099_v32, %v7096_v28  ;;  %v7103_v23 = vsel %vm1245_vm0, %v7100_v22, %v7097_v52  ;;  %v7101_v29 = vsel %vm1245_vm0, %v7098_v4, %v7095_v42  ;;  %v6964_v34 = vsel %vm1249_vm2, %v6913_v12, %v6963_v8 }
0x14c4   :  { %v6867_v37 = vpop.permute.xlu1 %6866  ;;  %v7105_v54 = vpack.c.b16 %v7102_v10, %v7102_v10  ;;  %v7106_v5 = vpack.c.b16 %v7103_v23, %v7103_v23  ;;  %v7104_v48 = vpack.c.b16 %v7101_v29, %v7101_v29  ;;  %v6953_v2 = vrot.slane %v6891_v49, %v9132_v26 }
0x14c5   :  { %v6921_v51 = vrot.slane %v6867_v37, %v9132_v26  ;;  %v6972_v33 = vsel %vm1251_vm3, %v6949_v16, %v6971_v27  ;;  %v6965_v50 = vsel %vm1251_vm3, %v6917_v11, %v6964_v34 }
0x14c6   :  { %7286 = vmatprep.mubr.bf16.mxu1 %v7105_v54  ;;  %8077 = vmatmul.mubr.bf16.vlgmr.msra.gmra.mrb[76].mxu0 %v7106_v5  ;;  %v6973_v63 = vsel %vm1253_vm4, %v6953_v2, %v6972_v33 }
0x14c7   :  { %7287 = vmatmul.mubr.bf16.vlgmr.msra.gmra.mrb[92].mxu1 %v7104_v48  ;;  %v6894_v0 = vpop.permute.xlu0 %6893  ;;  %v6966_v14 = vsel %vm1253_vm4, %v6921_v51, %v6965_v50 }
0x14c8   :  { %v6870_v25 = vpop.permute.xlu1 %6869  ;;  %v6957_v56 = vrot.slane %v6894_v0, %v9132_v26 }
0x14c9   :  { %v6925_v47 = vrot.slane %v6870_v25, %v9132_v26 }
0x14ca   :  { %v6974_v9 = vsel %vm1255_vm5, %v6957_v56, %v6973_v63 }
0x14cb   :  { %v6897_v58 = vpop.permute.xlu0 %6896  ;;  %v6967_v36 = vsel %vm1255_vm5, %v6925_v47, %v6966_v14 }
0x14cc   :  { %v6961_v30 = vrot.slane %v6897_v58, %v9132_v26  ;;  %v6873_v1 = vpop.permute.xlu1 %6872 }
0x14cd   :  { %v6929_v40 = vrot.slane %v6873_v1, %v9132_v26 }
0x14ce   :  { %v6975_v21 = vsel %vm1257_vm6, %v6961_v30, %v6974_v9 }
0x14cf   :  { %6979 = vst.msk [vmem:[#allocation9 + $0x8] sm:$0xff] %vm1268_vm7, %v6975_v21  ;;  %v6968_v3 = vsel %vm1257_vm6, %v6929_v40, %v6967_v36 }
0x14d0   :  { %6978 = vst.msk [vmem:[#allocation9] sm:$0xff] %vm1268_vm7, %v6968_v3 }
0x14d1   :  { %8506 = shalt.err (!%p8503_p0)
}
0x14d2   :  { %s8507_s12 = scalar_lea.hbm %s11258_s6, 256 }
0x14d3   :  { %p8508_p1 = scmp.ne.s32.totalorder %s11258_s6, %s8507_s12  ;;  %p8511_p2 = scmp.lt.u32.totalorder %s8507_s12, %s11258_s6 }
0x14d5   :  { %p8513_p3 = pnand %p8511_p2, %p8508_p1 }
0x14d7   :  { %8516 = shalt.err (!%p8513_p3)
}
0x14d8   :  { %s8557_s17 = smov 128   ;;  %s8558_s18 = smov 8   ;;  %v7565_v59 = vld [vmem:[%s11256_s4 + $0x13] ss:$0 sm:$0xff] }
0x14d9   :  { %7356 = dma.vmem_to_hbm [thread:$0]  %s7351_s3, 256, %s11258_s6, [#allocation10], %s8557_s17, %s8557_s17, %s8558_s18  }
0x14da   :  { %s8559_s22 = smov [#allocation8]  }
0x14db   :  { %s7341_s23 = sshll.u32 %s8559_s22, 4  ;;  %s7342_s23 = int_to_ptr.vmem [resolvable:$true] %s7341_s23 }
0x14dc   :  { %s8517_s6 = scalar_lea.vmem %s7342_s23, 32  ;;  %p8522_p5 = scmp.lt.s32.totalorder %s7342_s23, %s7342_s23 }
0x14dd   :  { %p8518_p4 = scmp.ne.s32.totalorder %s7342_s23, %s8517_s6  ;;  %p8523_p6 = scmp.lt.s32.totalorder %s8517_s6, %s8517_s6 }
0x14df   :  { %p8524_p7 = por %p8523_p6, %p8522_p5 }
0x14e1   :  { %p8525_p8 = pnand %p8524_p7, %p8518_p4 }
0x1599   :  { %v7328_v26 = vpop.f32.mrb[76].mxu0 }
0x159a   :  { %v7853_v19 = vpop.f32.mrb[92].mxu1  ;;  %v8078_v18 = vpop.f32.mrb[77].mxu0 }
0x159b   :  { %v7854_v39 = vpop.f32.mrb[93].mxu1  ;;  %v7331_v55 = vpop.f32.mrb[78].mxu0 }
0x159c   :  { %v7855_v20 = vadd.f32 %v7854_v39, %v7853_v19  ;;  %v7856_v7 = vpop.f32.mrb[94].mxu1  ;;  %v8079_v31 = vpop.f32.mrb[79].mxu0 }
0x159d   :  { %v7857_v15 = vpop.f32.mrb[95].mxu1 }
0x159e   :  { %v7289_v45 = vadd.f32 %v7855_v20, %v7565_v59 }
0x15a0   :  { %v7329_v62 = vadd.f32 %v7328_v26, %v7289_v45 }
0x15a2   :  { %7334 = vst [vmem:[#allocation8] sm:$0x3] %v7329_v62 }
0x15a3   :  { %8528 = shalt.err (!%p8525_p8)
}
0x15a4   :  { %s8529_s26 = scalar_lea.hbm %s11257_s5, 32 }
0x15a5   :  { %p8530_p9 = scmp.ne.s32.totalorder %s11257_s5, %s8529_s26  ;;  %p8533_p10 = scmp.lt.u32.totalorder %s8529_s26, %s11257_s5 }
0x15a7   :  { %p8535_p11 = pnand %p8533_p10, %p8530_p9 }
0x15a9   :  { %8538 = shalt.err (!%p8535_p11)
}
0x15aa   :  { %7344 = dma.vmem_to_hbm [thread:$0]  %s7342_s23, 32, %s11257_s5, [#allocation4]  }
0x15ab   :  { %8543 = dma.done.wait [#allocation4], 32  }
0x15ac   :  { %8544 = vsyncadd [#allocation4], 4294967264 }
0x15ad   :  { %8545 = dma.done.wait [#allocation10], 256  }
0x15ae   :  { %8546 = vsyncadd [#allocation10], 4294967040 }
0x15af   :  { %7363 = vsyncpa [#allocation3], 1 }
0x15b0   :  { %7364 = vsyncpa [#allocation6], 1 }
0x15b1   :  { %7365 = vsyncpa [#allocation4], 1 }
0x15b2   :  { %7366 = vsyncpa [#allocation10], 1 }

</bundles_post_ra>
